<compile_context>
chip_gen: v7x
topology: tpu7x:2x2x1
jax: 0.10.0
libtpu: 0.0.40
codegen_flags: <defaults>
</compile_context>

<pallas_src>
import functools

import jax
import jax.numpy as jnp
from jax.experimental import pallas as pl
from jax.experimental.pallas import tpu as pltpu


# ---------------------------------------------------------------------------
# Fused whole-network kernel
# ---------------------------------------------------------------------------
def _shifted_tap(a, off, length):
    """tap[:, i] = a[:, i + off] if 0 <= i + off < length else 0 ('same' pad)."""
    if off == 0:
        return a
    # XLU lane rotation (separate issue slot from VPU/MXU), then zero the
    # |off| wrapped columns at one end.
    y = pltpu.roll(a, shift=(-off) % length, axis=1)
    i = jax.lax.broadcasted_iota(jnp.int32, y.shape, 1)
    valid = (i < length - off) if off > 0 else (i >= -off)
    return jnp.where(valid, y, jnp.zeros_like(y))


def _tcn_kernel(n_levels, K, L, include_last_relu, has_ds_flags, cdt, *refs):
    """One batch row: run every TemporalBlock with the activation in VMEM."""
    x_ref = refs[0]
    o_ref = refs[-1]
    wrefs = refs[1:-1]

    act = x_ref[...].astype(jnp.float32)          # (C0, L), f32 carry (VMEM only)
    wi = 0
    for lvl in range(n_levels):
        d = 2 ** lvl
        pad = (K - 1) * d // 2
        w1_ref, b1_ref, w2_ref, b2_ref = wrefs[wi:wi + 4]
        wi += 4
        if has_ds_flags[lvl]:
            wds_ref, bds_ref = wrefs[wi:wi + 2]
            wi += 2

        a = act.astype(cdt)                       # MXU operand dtype

        # conv1 (dilated, 'same' zero pad): K accumulating MXU matmuls.
        acc = None
        for k in range(K):
            tap = _shifted_tap(a, k * d - pad, L)
            c = jnp.dot(w1_ref[k], tap, preferred_element_type=jnp.float32)
            acc = c if acc is None else acc + c
        h1 = jnp.maximum(acc + b1_ref[...], 0.0)  # bias add + ReLU in f32

        # conv2 from the VMEM-resident h1.
        a1 = h1.astype(cdt)
        acc = None
        for k in range(K):
            tap = _shifted_tap(a1, k * d - pad, L)
            c = jnp.dot(w2_ref[k], tap, preferred_element_type=jnp.float32)
            acc = c if acc is None else acc + c
        h2 = jnp.maximum(acc + b2_ref[...], 0.0)

        # Residual: identity or fused 1x1 downsample.
        if has_ds_flags[lvl]:
            res = jnp.dot(wds_ref[...], a, preferred_element_type=jnp.float32)
            res = res + bds_ref[...]
        else:
            res = act

        out = h2 + res
        is_last = (lvl == n_levels - 1) and (not include_last_relu)
        if not is_last:
            out = jnp.maximum(out, 0.0)
        act = out                                  # next level's input (f32)

    o_ref[...] = act.astype(o_ref.dtype)


def _estimate_vmem_bytes(C0, channels, L, K, in_bytes, out_bytes, cbytes):
    """Conservative per-grid-step VMEM working-set estimate (bytes)."""
    c_in = C0
    per_level = 0
    w_bytes = 0
    for c_out in channels:
        # f32 carried act + cdt copy + one shifted tap + f32 accumulators /
        # h1 / out / residual (upper bound on simultaneously-live temporaries).
        live = L * (c_in * (4 + 2 * cbytes)
                    + c_out * (12 + cbytes)
                    + cbytes * max(c_in, c_out))
        per_level = max(per_level, live)
        w_bytes += (K * c_out * c_in + K * c_out * c_out
                    + c_out * c_in) * cbytes + 3 * c_out * 4
        c_in = c_out
    io = 2 * L * (C0 * in_bytes + channels[-1] * out_bytes)  # double-buffered DMA
    return int(1.5 * per_level) + io + 2 * w_bytes


def temporal_conv_net(x, blocks, kernel_size=3, include_last_relu=False,
                      compute_dtype=jnp.bfloat16, out_dtype=None,
                      vmem_budget_bytes=40 * 1024 * 1024):
    """Fused TCN forward: x (N, C0, L) -> (N, C_last, L)."""
    N, C0, L = x.shape
    K = kernel_size
    assert K % 2 == 1, "spec uses symmetric padding; odd kernel_size required"
    n_levels = len(blocks)
    cdt = jnp.dtype(compute_dtype)
    odt = jnp.dtype(out_dtype) if out_dtype is not None else x.dtype
    channels = [p["w1"].shape[0] for p in blocks]

    est = _estimate_vmem_bytes(C0, channels, L, K,
                               jnp.dtype(x.dtype).itemsize,
                               odt.itemsize, cdt.itemsize)
    if est > vmem_budget_bytes:
        # TODO(synk): L-tiled fallback with receptive-field halos for very
        # large C*L; not implemented — fail loudly instead of spilling.
        raise NotImplementedError(
            f"per-batch working set ~{est/2**20:.1f} MiB exceeds the "
            f"{vmem_budget_bytes/2**20:.0f} MiB VMEM budget (v7x-safe).")

    args = [x]
    in_specs = [pl.BlockSpec((None, C0, L), lambda n: (n, 0, 0))]
    has_ds = []
    c_in = C0
    for p in blocks:
        c_out = p["w1"].shape[0]
        w1 = jnp.transpose(p["w1"], (2, 0, 1)).astype(cdt)   # (K, c_out, c_in)
        b1 = p["b1"].astype(jnp.float32)[:, None]            # (c_out, 1) f32
        w2 = jnp.transpose(p["w2"], (2, 0, 1)).astype(cdt)   # (K, c_out, c_out)
        b2 = p["b2"].astype(jnp.float32)[:, None]
        args += [w1, b1, w2, b2]
        in_specs += [
            pl.BlockSpec((K, c_out, c_in), lambda n: (0, 0, 0)),
            pl.BlockSpec((c_out, 1), lambda n: (0, 0)),
            pl.BlockSpec((K, c_out, c_out), lambda n: (0, 0, 0)),
            pl.BlockSpec((c_out, 1), lambda n: (0, 0)),
        ]
        ds = "w_ds" in p
        has_ds.append(ds)
        if ds:
            wds = p["w_ds"][:, :, 0].astype(cdt)              # (c_out, c_in)
            bds = p["b_ds"].astype(jnp.float32)[:, None]
            args += [wds, bds]
            in_specs += [
                pl.BlockSpec((c_out, c_in), lambda n: (0, 0)),
                pl.BlockSpec((c_out, 1), lambda n: (0, 0)),
            ]
        c_in = c_out

    kernel = functools.partial(
        _tcn_kernel, n_levels, K, L, include_last_relu, tuple(has_ds), cdt)

    vmem_limit = int(min(vmem_budget_bytes, max(4 * est, 16 * 1024 * 1024)))

    return pl.pallas_call(
        kernel,
        out_shape=jax.ShapeDtypeStruct((N, channels[-1], L), odt),
        grid=(N,),
        in_specs=in_specs,
        out_specs=pl.BlockSpec((None, channels[-1], L), lambda n: (n, 0, 0)),
        compiler_params=pltpu.CompilerParams(
            dimension_semantics=("parallel",),      # batch rows -> v7x's 2 TCs
            vmem_limit_bytes=vmem_limit),
    )(*args)


# ---------------------------------------------------------------------------
# Parameter init (matches PyTorch: weight_norm, N(0, 0.01) weights)
# ---------------------------------------------------------------------------
def weight_norm_effective(v, g):
    """PyTorch weight_norm(dim=0): w = g * v / ||v|| (norm over all but dim 0)."""
    norm = jnp.sqrt(jnp.sum(v * v, axis=(1, 2), keepdims=True))
    return (g.reshape(-1, 1, 1) / norm) * v


def init_params(key, num_inputs, num_channels, kernel_size):
    blocks = []
    c_in = num_inputs
    for i, c_out in enumerate(num_channels):
        ks = jax.random.split(jax.random.fold_in(key, i), 6)
        v1 = 0.01 * jax.random.normal(ks[0], (c_out, c_in, kernel_size),
                                      jnp.float32)
        v2 = 0.01 * jax.random.normal(ks[2], (c_out, c_out, kernel_size),
                                      jnp.float32)
        # default weight_norm init: g = ||v||  (trained checkpoints supply g).
        g1 = jnp.sqrt(jnp.sum(v1 * v1, axis=(1, 2)))
        g2 = jnp.sqrt(jnp.sum(v2 * v2, axis=(1, 2)))
        p = {
            "w1": weight_norm_effective(v1, g1),
            "b1": 0.01 * jax.random.normal(ks[1], (c_out,), jnp.float32),
            "w2": weight_norm_effective(v2, g2),
            "b2": 0.01 * jax.random.normal(ks[3], (c_out,), jnp.float32),
        }
        if c_in != c_out:
            p["w_ds"] = 0.01 * jax.random.normal(ks[4], (c_out, c_in, 1),
                                                 jnp.float32)
            p["b_ds"] = 0.01 * jax.random.normal(ks[5], (c_out,), jnp.float32)
        blocks.append(p)
        c_in = c_out
    return blocks


# ---------------------------------------------------------------------------
# Pure-JAX reference (correctness check only)
# ---------------------------------------------------------------------------
def _ref_conv1d(x, w, b, dilation, padding):
    out = jax.lax.conv_general_dilated(
        x, w, window_strides=(1,), padding=[(padding, padding)],
        rhs_dilation=(dilation,), dimension_numbers=("NCH", "OIH", "NCH"))
    return out + b[None, :, None]


def _ref_block(x, params, dilation, ks, is_last):
    pad = (ks - 1) * dilation // 2
    h1 = jax.nn.relu(_ref_conv1d(x, params["w1"], params["b1"], dilation, pad))
    if "w_ds" in params:
        res = _ref_conv1d(x, params["w_ds"], params["b_ds"], 1, 0)
    else:
        res = x
    out = jax.nn.relu(_ref_conv1d(h1, params["w2"], params["b2"], dilation,
                                  pad)) + res
    return out if is_last else jax.nn.relu(out)


def _ref_tcn(x, blocks, kernel_size=3, include_last_relu=False):
    n = len(blocks)
    for i, params in enumerate(blocks):
        is_last = (i == n - 1) and (not include_last_relu)
        x = _ref_block(x, params, 2 ** i, kernel_size, is_last)
    return x


if __name__ == "__main__":
    key = jax.random.PRNGKey(0)
    kx, kp = jax.random.split(key)

    batch, num_inputs, seq_len = 2, 4, 1024
    num_channels = [16, 32, 32]      # blocks 0,1: 1x1 downsample, block 2: identity
    kernel_size = 3

    x = jax.random.normal(kx, (batch, num_inputs, seq_len), jnp.float32)
    blocks = init_params(kp, num_inputs, num_channels, kernel_size)

    y_ref = _ref_tcn(x, blocks, kernel_size=kernel_size)

    # f32 compute path: tight check of tap/roll/mask + residual wiring.
    run_f32 = jax.jit(functools.partial(
        temporal_conv_net, kernel_size=kernel_size, compute_dtype=jnp.float32))
    y32 = jax.block_until_ready(run_f32(x, blocks))
    assert y32.shape == (batch, num_channels[-1], seq_len), y32.shape
    err32 = float(jnp.max(jnp.abs(y32.astype(jnp.float32) - y_ref)))
    assert err32 < 1e-3, f"f32 max abs err vs reference: {err32}"

    # bf16 compute path (production config): looser tolerance for rounding.
    run_bf16 = jax.jit(functools.partial(
        temporal_conv_net, kernel_size=kernel_size, compute_dtype=jnp.bfloat16))
    ybf = jax.block_until_ready(run_bf16(x, blocks))
    assert ybf.shape == (batch, num_channels[-1], seq_len), ybf.shape
    errbf = float(jnp.max(jnp.abs(ybf.astype(jnp.float32) - y_ref)))
    assert errbf < 2e-2, f"bf16 max abs err vs reference: {errbf}"

    print("KERNEL_OK")
</pallas_src>

<mosaic_0001>
module attributes {stable_mosaic.version = 11 : i64} {
  func.func @_tcn_kernel(%arg0: i32, %arg1: memref<1x4x1024xf32, #tpu.memory_space<vmem>>, %arg2: memref<3x16x4xf32, #tpu.memory_space<vmem>>, %arg3: memref<16x1xf32, #tpu.memory_space<vmem>>, %arg4: memref<3x16x16xf32, #tpu.memory_space<vmem>>, %arg5: memref<16x1xf32, #tpu.memory_space<vmem>>, %arg6: memref<16x4xf32, #tpu.memory_space<vmem>>, %arg7: memref<16x1xf32, #tpu.memory_space<vmem>>, %arg8: memref<3x32x16xf32, #tpu.memory_space<vmem>>, %arg9: memref<32x1xf32, #tpu.memory_space<vmem>>, %arg10: memref<3x32x32xf32, #tpu.memory_space<vmem>>, %arg11: memref<32x1xf32, #tpu.memory_space<vmem>>, %arg12: memref<32x16xf32, #tpu.memory_space<vmem>>, %arg13: memref<32x1xf32, #tpu.memory_space<vmem>>, %arg14: memref<3x32x32xf32, #tpu.memory_space<vmem>>, %arg15: memref<32x1xf32, #tpu.memory_space<vmem>>, %arg16: memref<3x32x32xf32, #tpu.memory_space<vmem>>, %arg17: memref<32x1xf32, #tpu.memory_space<vmem>>, %arg18: memref<1x32x1024xf32, #tpu.memory_space<vmem>>) attributes {dimension_semantics = [#tpu.dimension_semantics<parallel>], iteration_bounds = array<i64: 2>, scalar_prefetch = 0 : i64, scratch_operands = 0 : i64, tpu.core_type = #tpu.core_type<tc>, window_params = [{transform_indices = @transform_0, window_bounds = array<i64: 1, 4, 1024>}, {pipeline_mode = #tpu.pipeline_mode<synchronous>, transform_indices = @transform_1, window_bounds = array<i64: 3, 16, 4>}, {pipeline_mode = #tpu.pipeline_mode<synchronous>, transform_indices = @transform_2, window_bounds = array<i64: 16, 1>}, {pipeline_mode = #tpu.pipeline_mode<synchronous>, transform_indices = @transform_3, window_bounds = array<i64: 3, 16, 16>}, {pipeline_mode = #tpu.pipeline_mode<synchronous>, transform_indices = @transform_4, window_bounds = array<i64: 16, 1>}, {pipeline_mode = #tpu.pipeline_mode<synchronous>, transform_indices = @transform_5, window_bounds = array<i64: 16, 4>}, {pipeline_mode = #tpu.pipeline_mode<synchronous>, transform_indices = @transform_6, window_bounds = array<i64: 16, 1>}, {pipeline_mode = #tpu.pipeline_mode<synchronous>, transform_indices = @transform_7, window_bounds = array<i64: 3, 32, 16>}, {pipeline_mode = #tpu.pipeline_mode<synchronous>, transform_indices = @transform_8, window_bounds = array<i64: 32, 1>}, {pipeline_mode = #tpu.pipeline_mode<synchronous>, transform_indices = @transform_9, window_bounds = array<i64: 3, 32, 32>}, {pipeline_mode = #tpu.pipeline_mode<synchronous>, transform_indices = @transform_10, window_bounds = array<i64: 32, 1>}, {pipeline_mode = #tpu.pipeline_mode<synchronous>, transform_indices = @transform_11, window_bounds = array<i64: 32, 16>}, {pipeline_mode = #tpu.pipeline_mode<synchronous>, transform_indices = @transform_12, window_bounds = array<i64: 32, 1>}, {pipeline_mode = #tpu.pipeline_mode<synchronous>, transform_indices = @transform_13, window_bounds = array<i64: 3, 32, 32>}, {pipeline_mode = #tpu.pipeline_mode<synchronous>, transform_indices = @transform_14, window_bounds = array<i64: 32, 1>}, {pipeline_mode = #tpu.pipeline_mode<synchronous>, transform_indices = @transform_15, window_bounds = array<i64: 3, 32, 32>}, {pipeline_mode = #tpu.pipeline_mode<synchronous>, transform_indices = @transform_16, window_bounds = array<i64: 32, 1>}, {transform_indices = @transform_17, window_bounds = array<i64: 1, 32, 1024>}]} {
    %c0 = arith.constant 0 : index
    %c0_0 = arith.constant 0 : index
    %c0_1 = arith.constant 0 : index
    %0 = vector.load %arg1[%c0, %c0_0, %c0_1] : memref<1x4x1024xf32, #tpu.memory_space<vmem>>, vector<1x4x1024xf32>
    %1 = vector.shape_cast %0 : vector<1x4x1024xf32> to vector<4x1024xf32>
    %c1_i32 = arith.constant 1 : i32
    %2 = tpu.dynamic_rotate %1 by %c1_i32 dim 1 : vector<4x1024xf32>, i32 -> vector<4x1024xf32>
    %3 = tpu.iota {dimensions = array<i32: 1>} : vector<4x1024xi32>
    %c1_i32_2 = arith.constant 1 : i32
    %4 = vector.broadcast %c1_i32_2 : i32 to vector<4x1024xi32>
    %5 = arith.cmpi sge, %3, %4 : vector<4x1024xi32>
    %cst = arith.constant 0.000000e+00 : f32
    %6 = vector.broadcast %cst : f32 to vector<4x1024xf32>
    %7 = arith.select %5, %2, %6 : vector<4x1024xi1>, vector<4x1024xf32>
    %c0_3 = arith.constant 0 : index
    %c0_4 = arith.constant 0 : index
    %c0_5 = arith.constant 0 : index
    %8 = vector.load %arg2[%c0_3, %c0_4, %c0_5] : memref<3x16x4xf32, #tpu.memory_space<vmem>>, vector<1x16x4xf32>
    %9 = vector.shape_cast %8 : vector<1x16x4xf32> to vector<16x4xf32>
    %cst_6 = arith.constant dense<0.000000e+00> : vector<16x1024xf32>
    %10 = tpu.matmul %9, %7, %cst_6 {dimension_numbers = #tpu.dot_dimension_numbers<[1], [0], [0], [1], [0, 0, 1, 1], [], []>} : vector<16x4xf32>, vector<4x1024xf32>, vector<16x1024xf32> -> vector<16x1024xf32>
    %c1 = arith.constant 1 : index
    %c0_7 = arith.constant 0 : index
    %c0_8 = arith.constant 0 : index
    %11 = vector.load %arg2[%c1, %c0_7, %c0_8] : memref<3x16x4xf32, #tpu.memory_space<vmem>>, vector<1x16x4xf32>
    %12 = vector.shape_cast %11 : vector<1x16x4xf32> to vector<16x4xf32>
    %cst_9 = arith.constant dense<0.000000e+00> : vector<16x1024xf32>
    %13 = tpu.matmul %12, %1, %cst_9 {dimension_numbers = #tpu.dot_dimension_numbers<[1], [0], [0], [1], [0, 0, 1, 1], [], []>} : vector<16x4xf32>, vector<4x1024xf32>, vector<16x1024xf32> -> vector<16x1024xf32>
    %14 = arith.addf %10, %13 : vector<16x1024xf32>
    %c1023_i32 = arith.constant 1023 : i32
    %15 = tpu.dynamic_rotate %1 by %c1023_i32 dim 1 : vector<4x1024xf32>, i32 -> vector<4x1024xf32>
    %16 = tpu.iota {dimensions = array<i32: 1>} : vector<4x1024xi32>
    %c1023_i32_10 = arith.constant 1023 : i32
    %17 = vector.broadcast %c1023_i32_10 : i32 to vector<4x1024xi32>
    %18 = arith.cmpi slt, %16, %17 : vector<4x1024xi32>
    %cst_11 = arith.constant 0.000000e+00 : f32
    %19 = vector.broadcast %cst_11 : f32 to vector<4x1024xf32>
    %20 = arith.select %18, %15, %19 : vector<4x1024xi1>, vector<4x1024xf32>
    %c2 = arith.constant 2 : index
    %c0_12 = arith.constant 0 : index
    %c0_13 = arith.constant 0 : index
    %21 = vector.load %arg2[%c2, %c0_12, %c0_13] : memref<3x16x4xf32, #tpu.memory_space<vmem>>, vector<1x16x4xf32>
    %22 = vector.shape_cast %21 : vector<1x16x4xf32> to vector<16x4xf32>
    %cst_14 = arith.constant dense<0.000000e+00> : vector<16x1024xf32>
    %23 = tpu.matmul %22, %20, %cst_14 {dimension_numbers = #tpu.dot_dimension_numbers<[1], [0], [0], [1], [0, 0, 1, 1], [], []>} : vector<16x4xf32>, vector<4x1024xf32>, vector<16x1024xf32> -> vector<16x1024xf32>
    %24 = arith.addf %14, %23 : vector<16x1024xf32>
    %c0_15 = arith.constant 0 : index
    %c0_16 = arith.constant 0 : index
    %25 = vector.load %arg3[%c0_15, %c0_16] : memref<16x1xf32, #tpu.memory_space<vmem>>, vector<16x1xf32>
    %26 = vector.broadcast %25 : vector<16x1xf32> to vector<16x1024xf32>
    %27 = arith.addf %24, %26 : vector<16x1024xf32>
    %cst_17 = arith.constant 0.000000e+00 : f32
    %28 = vector.broadcast %cst_17 : f32 to vector<16x1024xf32>
    %29 = arith.maximumf %27, %28 : vector<16x1024xf32>
    %c1_i32_18 = arith.constant 1 : i32
    %30 = tpu.dynamic_rotate %29 by %c1_i32_18 dim 1 : vector<16x1024xf32>, i32 -> vector<16x1024xf32>
    %31 = tpu.iota {dimensions = array<i32: 1>} : vector<16x1024xi32>
    %c1_i32_19 = arith.constant 1 : i32
    %32 = vector.broadcast %c1_i32_19 : i32 to vector<16x1024xi32>
    %33 = arith.cmpi sge, %31, %32 : vector<16x1024xi32>
    %cst_20 = arith.constant 0.000000e+00 : f32
    %34 = vector.broadcast %cst_20 : f32 to vector<16x1024xf32>
    %35 = arith.select %33, %30, %34 : vector<16x1024xi1>, vector<16x1024xf32>
    %c0_21 = arith.constant 0 : index
    %c0_22 = arith.constant 0 : index
    %c0_23 = arith.constant 0 : index
    %36 = vector.load %arg4[%c0_21, %c0_22, %c0_23] : memref<3x16x16xf32, #tpu.memory_space<vmem>>, vector<1x16x16xf32>
    %37 = vector.shape_cast %36 : vector<1x16x16xf32> to vector<16x16xf32>
    %cst_24 = arith.constant dense<0.000000e+00> : vector<16x1024xf32>
    %38 = tpu.matmul %37, %35, %cst_24 {dimension_numbers = #tpu.dot_dimension_numbers<[1], [0], [0], [1], [0, 0, 1, 1], [], []>} : vector<16x16xf32>, vector<16x1024xf32>, vector<16x1024xf32> -> vector<16x1024xf32>
    %c1_25 = arith.constant 1 : index
    %c0_26 = arith.constant 0 : index
    %c0_27 = arith.constant 0 : index
    %39 = vector.load %arg4[%c1_25, %c0_26, %c0_27] : memref<3x16x16xf32, #tpu.memory_space<vmem>>, vector<1x16x16xf32>
    %40 = vector.shape_cast %39 : vector<1x16x16xf32> to vector<16x16xf32>
    %cst_28 = arith.constant dense<0.000000e+00> : vector<16x1024xf32>
    %41 = tpu.matmul %40, %29, %cst_28 {dimension_numbers = #tpu.dot_dimension_numbers<[1], [0], [0], [1], [0, 0, 1, 1], [], []>} : vector<16x16xf32>, vector<16x1024xf32>, vector<16x1024xf32> -> vector<16x1024xf32>
    %42 = arith.addf %38, %41 : vector<16x1024xf32>
    %c1023_i32_29 = arith.constant 1023 : i32
    %43 = tpu.dynamic_rotate %29 by %c1023_i32_29 dim 1 : vector<16x1024xf32>, i32 -> vector<16x1024xf32>
    %44 = tpu.iota {dimensions = array<i32: 1>} : vector<16x1024xi32>
    %c1023_i32_30 = arith.constant 1023 : i32
    %45 = vector.broadcast %c1023_i32_30 : i32 to vector<16x1024xi32>
    %46 = arith.cmpi slt, %44, %45 : vector<16x1024xi32>
    %cst_31 = arith.constant 0.000000e+00 : f32
    %47 = vector.broadcast %cst_31 : f32 to vector<16x1024xf32>
    %48 = arith.select %46, %43, %47 : vector<16x1024xi1>, vector<16x1024xf32>
    %c2_32 = arith.constant 2 : index
    %c0_33 = arith.constant 0 : index
    %c0_34 = arith.constant 0 : index
    %49 = vector.load %arg4[%c2_32, %c0_33, %c0_34] : memref<3x16x16xf32, #tpu.memory_space<vmem>>, vector<1x16x16xf32>
    %50 = vector.shape_cast %49 : vector<1x16x16xf32> to vector<16x16xf32>
    %cst_35 = arith.constant dense<0.000000e+00> : vector<16x1024xf32>
    %51 = tpu.matmul %50, %48, %cst_35 {dimension_numbers = #tpu.dot_dimension_numbers<[1], [0], [0], [1], [0, 0, 1, 1], [], []>} : vector<16x16xf32>, vector<16x1024xf32>, vector<16x1024xf32> -> vector<16x1024xf32>
    %52 = arith.addf %42, %51 : vector<16x1024xf32>
    %c0_36 = arith.constant 0 : index
    %c0_37 = arith.constant 0 : index
    %53 = vector.load %arg5[%c0_36, %c0_37] : memref<16x1xf32, #tpu.memory_space<vmem>>, vector<16x1xf32>
    %54 = vector.broadcast %53 : vector<16x1xf32> to vector<16x1024xf32>
    %55 = arith.addf %52, %54 : vector<16x1024xf32>
    %cst_38 = arith.constant 0.000000e+00 : f32
    %56 = vector.broadcast %cst_38 : f32 to vector<16x1024xf32>
    %57 = arith.maximumf %55, %56 : vector<16x1024xf32>
    %c0_39 = arith.constant 0 : index
    %c0_40 = arith.constant 0 : index
    %58 = vector.load %arg6[%c0_39, %c0_40] : memref<16x4xf32, #tpu.memory_space<vmem>>, vector<16x4xf32>
    %cst_41 = arith.constant dense<0.000000e+00> : vector<16x1024xf32>
    %59 = tpu.matmul %58, %1, %cst_41 {dimension_numbers = #tpu.dot_dimension_numbers<[1], [0], [0], [1], [0, 0, 1, 1], [], []>} : vector<16x4xf32>, vector<4x1024xf32>, vector<16x1024xf32> -> vector<16x1024xf32>
    %c0_42 = arith.constant 0 : index
    %c0_43 = arith.constant 0 : index
    %60 = vector.load %arg7[%c0_42, %c0_43] : memref<16x1xf32, #tpu.memory_space<vmem>>, vector<16x1xf32>
    %61 = vector.broadcast %60 : vector<16x1xf32> to vector<16x1024xf32>
    %62 = arith.addf %59, %61 : vector<16x1024xf32>
    %63 = arith.addf %57, %62 : vector<16x1024xf32>
    %cst_44 = arith.constant 0.000000e+00 : f32
    %64 = vector.broadcast %cst_44 : f32 to vector<16x1024xf32>
    %65 = arith.maximumf %63, %64 : vector<16x1024xf32>
    %c2_i32 = arith.constant 2 : i32
    %66 = tpu.dynamic_rotate %65 by %c2_i32 dim 1 : vector<16x1024xf32>, i32 -> vector<16x1024xf32>
    %67 = tpu.iota {dimensions = array<i32: 1>} : vector<16x1024xi32>
    %c2_i32_45 = arith.constant 2 : i32
    %68 = vector.broadcast %c2_i32_45 : i32 to vector<16x1024xi32>
    %69 = arith.cmpi sge, %67, %68 : vector<16x1024xi32>
    %cst_46 = arith.constant 0.000000e+00 : f32
    %70 = vector.broadcast %cst_46 : f32 to vector<16x1024xf32>
    %71 = arith.select %69, %66, %70 : vector<16x1024xi1>, vector<16x1024xf32>
    %c0_47 = arith.constant 0 : index
    %c0_48 = arith.constant 0 : index
    %c0_49 = arith.constant 0 : index
    %72 = vector.load %arg8[%c0_47, %c0_48, %c0_49] : memref<3x32x16xf32, #tpu.memory_space<vmem>>, vector<1x32x16xf32>
    %73 = vector.shape_cast %72 : vector<1x32x16xf32> to vector<32x16xf32>
    %cst_50 = arith.constant dense<0.000000e+00> : vector<32x1024xf32>
    %74 = tpu.matmul %73, %71, %cst_50 {dimension_numbers = #tpu.dot_dimension_numbers<[1], [0], [0], [1], [0, 0, 1, 1], [], []>} : vector<32x16xf32>, vector<16x1024xf32>, vector<32x1024xf32> -> vector<32x1024xf32>
    %c1_51 = arith.constant 1 : index
    %c0_52 = arith.constant 0 : index
    %c0_53 = arith.constant 0 : index
    %75 = vector.load %arg8[%c1_51, %c0_52, %c0_53] : memref<3x32x16xf32, #tpu.memory_space<vmem>>, vector<1x32x16xf32>
    %76 = vector.shape_cast %75 : vector<1x32x16xf32> to vector<32x16xf32>
    %cst_54 = arith.constant dense<0.000000e+00> : vector<32x1024xf32>
    %77 = tpu.matmul %76, %65, %cst_54 {dimension_numbers = #tpu.dot_dimension_numbers<[1], [0], [0], [1], [0, 0, 1, 1], [], []>} : vector<32x16xf32>, vector<16x1024xf32>, vector<32x1024xf32> -> vector<32x1024xf32>
    %78 = arith.addf %74, %77 : vector<32x1024xf32>
    %c1022_i32 = arith.constant 1022 : i32
    %79 = tpu.dynamic_rotate %65 by %c1022_i32 dim 1 : vector<16x1024xf32>, i32 -> vector<16x1024xf32>
    %80 = tpu.iota {dimensions = array<i32: 1>} : vector<16x1024xi32>
    %c1022_i32_55 = arith.constant 1022 : i32
    %81 = vector.broadcast %c1022_i32_55 : i32 to vector<16x1024xi32>
    %82 = arith.cmpi slt, %80, %81 : vector<16x1024xi32>
    %cst_56 = arith.constant 0.000000e+00 : f32
    %83 = vector.broadcast %cst_56 : f32 to vector<16x1024xf32>
    %84 = arith.select %82, %79, %83 : vector<16x1024xi1>, vector<16x1024xf32>
    %c2_57 = arith.constant 2 : index
    %c0_58 = arith.constant 0 : index
    %c0_59 = arith.constant 0 : index
    %85 = vector.load %arg8[%c2_57, %c0_58, %c0_59] : memref<3x32x16xf32, #tpu.memory_space<vmem>>, vector<1x32x16xf32>
    %86 = vector.shape_cast %85 : vector<1x32x16xf32> to vector<32x16xf32>
    %cst_60 = arith.constant dense<0.000000e+00> : vector<32x1024xf32>
    %87 = tpu.matmul %86, %84, %cst_60 {dimension_numbers = #tpu.dot_dimension_numbers<[1], [0], [0], [1], [0, 0, 1, 1], [], []>} : vector<32x16xf32>, vector<16x1024xf32>, vector<32x1024xf32> -> vector<32x1024xf32>
    %88 = arith.addf %78, %87 : vector<32x1024xf32>
    %c0_61 = arith.constant 0 : index
    %c0_62 = arith.constant 0 : index
    %89 = vector.load %arg9[%c0_61, %c0_62] : memref<32x1xf32, #tpu.memory_space<vmem>>, vector<32x1xf32>
    %90 = vector.broadcast %89 : vector<32x1xf32> to vector<32x1024xf32>
    %91 = arith.addf %88, %90 : vector<32x1024xf32>
    %cst_63 = arith.constant 0.000000e+00 : f32
    %92 = vector.broadcast %cst_63 : f32 to vector<32x1024xf32>
    %93 = arith.maximumf %91, %92 : vector<32x1024xf32>
    %c2_i32_64 = arith.constant 2 : i32
    %94 = tpu.dynamic_rotate %93 by %c2_i32_64 dim 1 : vector<32x1024xf32>, i32 -> vector<32x1024xf32>
    %95 = tpu.iota {dimensions = array<i32: 1>} : vector<32x1024xi32>
    %c2_i32_65 = arith.constant 2 : i32
    %96 = vector.broadcast %c2_i32_65 : i32 to vector<32x1024xi32>
    %97 = arith.cmpi sge, %95, %96 : vector<32x1024xi32>
    %cst_66 = arith.constant 0.000000e+00 : f32
    %98 = vector.broadcast %cst_66 : f32 to vector<32x1024xf32>
    %99 = arith.select %97, %94, %98 : vector<32x1024xi1>, vector<32x1024xf32>
    %c0_67 = arith.constant 0 : index
    %c0_68 = arith.constant 0 : index
    %c0_69 = arith.constant 0 : index
    %100 = vector.load %arg10[%c0_67, %c0_68, %c0_69] : memref<3x32x32xf32, #tpu.memory_space<vmem>>, vector<1x32x32xf32>
    %101 = vector.shape_cast %100 : vector<1x32x32xf32> to vector<32x32xf32>
    %cst_70 = arith.constant dense<0.000000e+00> : vector<32x1024xf32>
    %102 = tpu.matmul %101, %99, %cst_70 {dimension_numbers = #tpu.dot_dimension_numbers<[1], [0], [0], [1], [0, 0, 1, 1], [], []>} : vector<32x32xf32>, vector<32x1024xf32>, vector<32x1024xf32> -> vector<32x1024xf32>
    %c1_71 = arith.constant 1 : index
    %c0_72 = arith.constant 0 : index
    %c0_73 = arith.constant 0 : index
    %103 = vector.load %arg10[%c1_71, %c0_72, %c0_73] : memref<3x32x32xf32, #tpu.memory_space<vmem>>, vector<1x32x32xf32>
    %104 = vector.shape_cast %103 : vector<1x32x32xf32> to vector<32x32xf32>
    %cst_74 = arith.constant dense<0.000000e+00> : vector<32x1024xf32>
    %105 = tpu.matmul %104, %93, %cst_74 {dimension_numbers = #tpu.dot_dimension_numbers<[1], [0], [0], [1], [0, 0, 1, 1], [], []>} : vector<32x32xf32>, vector<32x1024xf32>, vector<32x1024xf32> -> vector<32x1024xf32>
    %106 = arith.addf %102, %105 : vector<32x1024xf32>
    %c1022_i32_75 = arith.constant 1022 : i32
    %107 = tpu.dynamic_rotate %93 by %c1022_i32_75 dim 1 : vector<32x1024xf32>, i32 -> vector<32x1024xf32>
    %108 = tpu.iota {dimensions = array<i32: 1>} : vector<32x1024xi32>
    %c1022_i32_76 = arith.constant 1022 : i32
    %109 = vector.broadcast %c1022_i32_76 : i32 to vector<32x1024xi32>
    %110 = arith.cmpi slt, %108, %109 : vector<32x1024xi32>
    %cst_77 = arith.constant 0.000000e+00 : f32
    %111 = vector.broadcast %cst_77 : f32 to vector<32x1024xf32>
    %112 = arith.select %110, %107, %111 : vector<32x1024xi1>, vector<32x1024xf32>
    %c2_78 = arith.constant 2 : index
    %c0_79 = arith.constant 0 : index
    %c0_80 = arith.constant 0 : index
    %113 = vector.load %arg10[%c2_78, %c0_79, %c0_80] : memref<3x32x32xf32, #tpu.memory_space<vmem>>, vector<1x32x32xf32>
    %114 = vector.shape_cast %113 : vector<1x32x32xf32> to vector<32x32xf32>
    %cst_81 = arith.constant dense<0.000000e+00> : vector<32x1024xf32>
    %115 = tpu.matmul %114, %112, %cst_81 {dimension_numbers = #tpu.dot_dimension_numbers<[1], [0], [0], [1], [0, 0, 1, 1], [], []>} : vector<32x32xf32>, vector<32x1024xf32>, vector<32x1024xf32> -> vector<32x1024xf32>
    %116 = arith.addf %106, %115 : vector<32x1024xf32>
    %c0_82 = arith.constant 0 : index
    %c0_83 = arith.constant 0 : index
    %117 = vector.load %arg11[%c0_82, %c0_83] : memref<32x1xf32, #tpu.memory_space<vmem>>, vector<32x1xf32>
    %118 = vector.broadcast %117 : vector<32x1xf32> to vector<32x1024xf32>
    %119 = arith.addf %116, %118 : vector<32x1024xf32>
    %cst_84 = arith.constant 0.000000e+00 : f32
    %120 = vector.broadcast %cst_84 : f32 to vector<32x1024xf32>
    %121 = arith.maximumf %119, %120 : vector<32x1024xf32>
    %c0_85 = arith.constant 0 : index
    %c0_86 = arith.constant 0 : index
    %122 = vector.load %arg12[%c0_85, %c0_86] : memref<32x16xf32, #tpu.memory_space<vmem>>, vector<32x16xf32>
    %cst_87 = arith.constant dense<0.000000e+00> : vector<32x1024xf32>
    %123 = tpu.matmul %122, %65, %cst_87 {dimension_numbers = #tpu.dot_dimension_numbers<[1], [0], [0], [1], [0, 0, 1, 1], [], []>} : vector<32x16xf32>, vector<16x1024xf32>, vector<32x1024xf32> -> vector<32x1024xf32>
    %c0_88 = arith.constant 0 : index
    %c0_89 = arith.constant 0 : index
    %124 = vector.load %arg13[%c0_88, %c0_89] : memref<32x1xf32, #tpu.memory_space<vmem>>, vector<32x1xf32>
    %125 = vector.broadcast %124 : vector<32x1xf32> to vector<32x1024xf32>
    %126 = arith.addf %123, %125 : vector<32x1024xf32>
    %127 = arith.addf %121, %126 : vector<32x1024xf32>
    %cst_90 = arith.constant 0.000000e+00 : f32
    %128 = vector.broadcast %cst_90 : f32 to vector<32x1024xf32>
    %129 = arith.maximumf %127, %128 : vector<32x1024xf32>
    %c4_i32 = arith.constant 4 : i32
    %130 = tpu.dynamic_rotate %129 by %c4_i32 dim 1 : vector<32x1024xf32>, i32 -> vector<32x1024xf32>
    %131 = tpu.iota {dimensions = array<i32: 1>} : vector<32x1024xi32>
    %c4_i32_91 = arith.constant 4 : i32
    %132 = vector.broadcast %c4_i32_91 : i32 to vector<32x1024xi32>
    %133 = arith.cmpi sge, %131, %132 : vector<32x1024xi32>
    %cst_92 = arith.constant 0.000000e+00 : f32
    %134 = vector.broadcast %cst_92 : f32 to vector<32x1024xf32>
    %135 = arith.select %133, %130, %134 : vector<32x1024xi1>, vector<32x1024xf32>
    %c0_93 = arith.constant 0 : index
    %c0_94 = arith.constant 0 : index
    %c0_95 = arith.constant 0 : index
    %136 = vector.load %arg14[%c0_93, %c0_94, %c0_95] : memref<3x32x32xf32, #tpu.memory_space<vmem>>, vector<1x32x32xf32>
    %137 = vector.shape_cast %136 : vector<1x32x32xf32> to vector<32x32xf32>
    %cst_96 = arith.constant dense<0.000000e+00> : vector<32x1024xf32>
    %138 = tpu.matmul %137, %135, %cst_96 {dimension_numbers = #tpu.dot_dimension_numbers<[1], [0], [0], [1], [0, 0, 1, 1], [], []>} : vector<32x32xf32>, vector<32x1024xf32>, vector<32x1024xf32> -> vector<32x1024xf32>
    %c1_97 = arith.constant 1 : index
    %c0_98 = arith.constant 0 : index
    %c0_99 = arith.constant 0 : index
    %139 = vector.load %arg14[%c1_97, %c0_98, %c0_99] : memref<3x32x32xf32, #tpu.memory_space<vmem>>, vector<1x32x32xf32>
    %140 = vector.shape_cast %139 : vector<1x32x32xf32> to vector<32x32xf32>
    %cst_100 = arith.constant dense<0.000000e+00> : vector<32x1024xf32>
    %141 = tpu.matmul %140, %129, %cst_100 {dimension_numbers = #tpu.dot_dimension_numbers<[1], [0], [0], [1], [0, 0, 1, 1], [], []>} : vector<32x32xf32>, vector<32x1024xf32>, vector<32x1024xf32> -> vector<32x1024xf32>
    %142 = arith.addf %138, %141 : vector<32x1024xf32>
    %c1020_i32 = arith.constant 1020 : i32
    %143 = tpu.dynamic_rotate %129 by %c1020_i32 dim 1 : vector<32x1024xf32>, i32 -> vector<32x1024xf32>
    %144 = tpu.iota {dimensions = array<i32: 1>} : vector<32x1024xi32>
    %c1020_i32_101 = arith.constant 1020 : i32
    %145 = vector.broadcast %c1020_i32_101 : i32 to vector<32x1024xi32>
    %146 = arith.cmpi slt, %144, %145 : vector<32x1024xi32>
    %cst_102 = arith.constant 0.000000e+00 : f32
    %147 = vector.broadcast %cst_102 : f32 to vector<32x1024xf32>
    %148 = arith.select %146, %143, %147 : vector<32x1024xi1>, vector<32x1024xf32>
    %c2_103 = arith.constant 2 : index
    %c0_104 = arith.constant 0 : index
    %c0_105 = arith.constant 0 : index
    %149 = vector.load %arg14[%c2_103, %c0_104, %c0_105] : memref<3x32x32xf32, #tpu.memory_space<vmem>>, vector<1x32x32xf32>
    %150 = vector.shape_cast %149 : vector<1x32x32xf32> to vector<32x32xf32>
    %cst_106 = arith.constant dense<0.000000e+00> : vector<32x1024xf32>
    %151 = tpu.matmul %150, %148, %cst_106 {dimension_numbers = #tpu.dot_dimension_numbers<[1], [0], [0], [1], [0, 0, 1, 1], [], []>} : vector<32x32xf32>, vector<32x1024xf32>, vector<32x1024xf32> -> vector<32x1024xf32>
    %152 = arith.addf %142, %151 : vector<32x1024xf32>
    %c0_107 = arith.constant 0 : index
    %c0_108 = arith.constant 0 : index
    %153 = vector.load %arg15[%c0_107, %c0_108] : memref<32x1xf32, #tpu.memory_space<vmem>>, vector<32x1xf32>
    %154 = vector.broadcast %153 : vector<32x1xf32> to vector<32x1024xf32>
    %155 = arith.addf %152, %154 : vector<32x1024xf32>
    %cst_109 = arith.constant 0.000000e+00 : f32
    %156 = vector.broadcast %cst_109 : f32 to vector<32x1024xf32>
    %157 = arith.maximumf %155, %156 : vector<32x1024xf32>
    %c4_i32_110 = arith.constant 4 : i32
    %158 = tpu.dynamic_rotate %157 by %c4_i32_110 dim 1 : vector<32x1024xf32>, i32 -> vector<32x1024xf32>
    %159 = tpu.iota {dimensions = array<i32: 1>} : vector<32x1024xi32>
    %c4_i32_111 = arith.constant 4 : i32
    %160 = vector.broadcast %c4_i32_111 : i32 to vector<32x1024xi32>
    %161 = arith.cmpi sge, %159, %160 : vector<32x1024xi32>
    %cst_112 = arith.constant 0.000000e+00 : f32
    %162 = vector.broadcast %cst_112 : f32 to vector<32x1024xf32>
    %163 = arith.select %161, %158, %162 : vector<32x1024xi1>, vector<32x1024xf32>
    %c0_113 = arith.constant 0 : index
    %c0_114 = arith.constant 0 : index
    %c0_115 = arith.constant 0 : index
    %164 = vector.load %arg16[%c0_113, %c0_114, %c0_115] : memref<3x32x32xf32, #tpu.memory_space<vmem>>, vector<1x32x32xf32>
    %165 = vector.shape_cast %164 : vector<1x32x32xf32> to vector<32x32xf32>
    %cst_116 = arith.constant dense<0.000000e+00> : vector<32x1024xf32>
    %166 = tpu.matmul %165, %163, %cst_116 {dimension_numbers = #tpu.dot_dimension_numbers<[1], [0], [0], [1], [0, 0, 1, 1], [], []>} : vector<32x32xf32>, vector<32x1024xf32>, vector<32x1024xf32> -> vector<32x1024xf32>
    %c1_117 = arith.constant 1 : index
    %c0_118 = arith.constant 0 : index
    %c0_119 = arith.constant 0 : index
    %167 = vector.load %arg16[%c1_117, %c0_118, %c0_119] : memref<3x32x32xf32, #tpu.memory_space<vmem>>, vector<1x32x32xf32>
    %168 = vector.shape_cast %167 : vector<1x32x32xf32> to vector<32x32xf32>
    %cst_120 = arith.constant dense<0.000000e+00> : vector<32x1024xf32>
    %169 = tpu.matmul %168, %157, %cst_120 {dimension_numbers = #tpu.dot_dimension_numbers<[1], [0], [0], [1], [0, 0, 1, 1], [], []>} : vector<32x32xf32>, vector<32x1024xf32>, vector<32x1024xf32> -> vector<32x1024xf32>
    %170 = arith.addf %166, %169 : vector<32x1024xf32>
    %c1020_i32_121 = arith.constant 1020 : i32
    %171 = tpu.dynamic_rotate %157 by %c1020_i32_121 dim 1 : vector<32x1024xf32>, i32 -> vector<32x1024xf32>
    %172 = tpu.iota {dimensions = array<i32: 1>} : vector<32x1024xi32>
    %c1020_i32_122 = arith.constant 1020 : i32
    %173 = vector.broadcast %c1020_i32_122 : i32 to vector<32x1024xi32>
    %174 = arith.cmpi slt, %172, %173 : vector<32x1024xi32>
    %cst_123 = arith.constant 0.000000e+00 : f32
    %175 = vector.broadcast %cst_123 : f32 to vector<32x1024xf32>
    %176 = arith.select %174, %171, %175 : vector<32x1024xi1>, vector<32x1024xf32>
    %c2_124 = arith.constant 2 : index
    %c0_125 = arith.constant 0 : index
    %c0_126 = arith.constant 0 : index
    %177 = vector.load %arg16[%c2_124, %c0_125, %c0_126] : memref<3x32x32xf32, #tpu.memory_space<vmem>>, vector<1x32x32xf32>
    %178 = vector.shape_cast %177 : vector<1x32x32xf32> to vector<32x32xf32>
    %cst_127 = arith.constant dense<0.000000e+00> : vector<32x1024xf32>
    %179 = tpu.matmul %178, %176, %cst_127 {dimension_numbers = #tpu.dot_dimension_numbers<[1], [0], [0], [1], [0, 0, 1, 1], [], []>} : vector<32x32xf32>, vector<32x1024xf32>, vector<32x1024xf32> -> vector<32x1024xf32>
    %180 = arith.addf %170, %179 : vector<32x1024xf32>
    %c0_128 = arith.constant 0 : index
    %c0_129 = arith.constant 0 : index
    %181 = vector.load %arg17[%c0_128, %c0_129] : memref<32x1xf32, #tpu.memory_space<vmem>>, vector<32x1xf32>
    %182 = vector.broadcast %181 : vector<32x1xf32> to vector<32x1024xf32>
    %183 = arith.addf %180, %182 : vector<32x1024xf32>
    %cst_130 = arith.constant 0.000000e+00 : f32
    %184 = vector.broadcast %cst_130 : f32 to vector<32x1024xf32>
    %185 = arith.maximumf %183, %184 : vector<32x1024xf32>
    %186 = arith.addf %185, %129 : vector<32x1024xf32>
    %c0_131 = arith.constant 0 : index
    %c0_132 = arith.constant 0 : index
    %c0_133 = arith.constant 0 : index
    %187 = vector.load %arg18[%c0_131, %c0_132, %c0_133] : memref<1x32x1024xf32, #tpu.memory_space<vmem>>, vector<1x32x1024xf32>
    %188 = vector.shape_cast %187 : vector<1x32x1024xf32> to vector<32x1024xf32>
    %189 = vector.shape_cast %186 : vector<32x1024xf32> to vector<1x32x1024xf32>
    tpu.vector_store %arg18[%c0_131, %c0_132, %c0_133], %189 {strides = array<i32>} : memref<1x32x1024xf32, #tpu.memory_space<vmem>>, vector<1x32x1024xf32>,
    return
  }
  func.func @transform_0(%arg0: i32) -> (i32, i32, i32) {
    %c0_i32 = arith.constant 0 : i32
    %c0_i32_0 = arith.constant 0 : i32
    %c0_i32_1 = arith.constant 0 : i32
    return %arg0, %c0_i32, %c0_i32_0 : i32, i32, i32
  }
  func.func @transform_1(%arg0: i32) -> (i32, i32, i32) {
    %c0_i32 = arith.constant 0 : i32
    %c0_i32_0 = arith.constant 0 : i32
    %c0_i32_1 = arith.constant 0 : i32
    %c0_i32_2 = arith.constant 0 : i32
    return %c0_i32, %c0_i32_0, %c0_i32_1 : i32, i32, i32
  }
  func.func @transform_2(%arg0: i32) -> (i32, i32) {
    %c0_i32 = arith.constant 0 : i32
    %c0_i32_0 = arith.constant 0 : i32
    %c0_i32_1 = arith.constant 0 : i32
    return %c0_i32, %c0_i32_0 : i32, i32
  }
  func.func @transform_3(%arg0: i32) -> (i32, i32, i32) {
    %c0_i32 = arith.constant 0 : i32
    %c0_i32_0 = arith.constant 0 : i32
    %c0_i32_1 = arith.constant 0 : i32
    %c0_i32_2 = arith.constant 0 : i32
    return %c0_i32, %c0_i32_0, %c0_i32_1 : i32, i32, i32
  }
  func.func @transform_4(%arg0: i32) -> (i32, i32) {
    %c0_i32 = arith.constant 0 : i32
    %c0_i32_0 = arith.constant 0 : i32
    %c0_i32_1 = arith.constant 0 : i32
    return %c0_i32, %c0_i32_0 : i32, i32
  }
  func.func @transform_5(%arg0: i32) -> (i32, i32) {
    %c0_i32 = arith.constant 0 : i32
    %c0_i32_0 = arith.constant 0 : i32
    %c0_i32_1 = arith.constant 0 : i32
    return %c0_i32, %c0_i32_0 : i32, i32
  }
  func.func @transform_6(%arg0: i32) -> (i32, i32) {
    %c0_i32 = arith.constant 0 : i32
    %c0_i32_0 = arith.constant 0 : i32
    %c0_i32_1 = arith.constant 0 : i32
    return %c0_i32, %c0_i32_0 : i32, i32
  }
  func.func @transform_7(%arg0: i32) -> (i32, i32, i32) {
    %c0_i32 = arith.constant 0 : i32
    %c0_i32_0 = arith.constant 0 : i32
    %c0_i32_1 = arith.constant 0 : i32
    %c0_i32_2 = arith.constant 0 : i32
    return %c0_i32, %c0_i32_0, %c0_i32_1 : i32, i32, i32
  }
  func.func @transform_8(%arg0: i32) -> (i32, i32) {
    %c0_i32 = arith.constant 0 : i32
    %c0_i32_0 = arith.constant 0 : i32
    %c0_i32_1 = arith.constant 0 : i32
    return %c0_i32, %c0_i32_0 : i32, i32
  }
  func.func @transform_9(%arg0: i32) -> (i32, i32, i32) {
    %c0_i32 = arith.constant 0 : i32
    %c0_i32_0 = arith.constant 0 : i32
    %c0_i32_1 = arith.constant 0 : i32
    %c0_i32_2 = arith.constant 0 : i32
    return %c0_i32, %c0_i32_0, %c0_i32_1 : i32, i32, i32
  }
  func.func @transform_10(%arg0: i32) -> (i32, i32) {
    %c0_i32 = arith.constant 0 : i32
    %c0_i32_0 = arith.constant 0 : i32
    %c0_i32_1 = arith.constant 0 : i32
    return %c0_i32, %c0_i32_0 : i32, i32
  }
  func.func @transform_11(%arg0: i32) -> (i32, i32) {
    %c0_i32 = arith.constant 0 : i32
    %c0_i32_0 = arith.constant 0 : i32
    %c0_i32_1 = arith.constant 0 : i32
    return %c0_i32, %c0_i32_0 : i32, i32
  }
  func.func @transform_12(%arg0: i32) -> (i32, i32) {
    %c0_i32 = arith.constant 0 : i32
    %c0_i32_0 = arith.constant 0 : i32
    %c0_i32_1 = arith.constant 0 : i32
    return %c0_i32, %c0_i32_0 : i32, i32
  }
  func.func @transform_13(%arg0: i32) -> (i32, i32, i32) {
    %c0_i32 = arith.constant 0 : i32
    %c0_i32_0 = arith.constant 0 : i32
    %c0_i32_1 = arith.constant 0 : i32
    %c0_i32_2 = arith.constant 0 : i32
    return %c0_i32, %c0_i32_0, %c0_i32_1 : i32, i32, i32
  }
  func.func @transform_14(%arg0: i32) -> (i32, i32) {
    %c0_i32 = arith.constant 0 : i32
    %c0_i32_0 = arith.constant 0 : i32
    %c0_i32_1 = arith.constant 0 : i32
    return %c0_i32, %c0_i32_0 : i32, i32
  }
  func.func @transform_15(%arg0: i32) -> (i32, i32, i32) {
    %c0_i32 = arith.constant 0 : i32
    %c0_i32_0 = arith.constant 0 : i32
    %c0_i32_1 = arith.constant 0 : i32
    %c0_i32_2 = arith.constant 0 : i32
    return %c0_i32, %c0_i32_0, %c0_i32_1 : i32, i32, i32
  }
  func.func @transform_16(%arg0: i32) -> (i32, i32) {
    %c0_i32 = arith.constant 0 : i32
    %c0_i32_0 = arith.constant 0 : i32
    %c0_i32_1 = arith.constant 0 : i32
    return %c0_i32, %c0_i32_0 : i32, i32
  }
  func.func @transform_17(%arg0: i32) -> (i32, i32, i32) {
    %c0_i32 = arith.constant 0 : i32
    %c0_i32_0 = arith.constant 0 : i32
    %c0_i32_1 = arith.constant 0 : i32
    return %arg0, %c0_i32, %c0_i32_0 : i32, i32, i32
  }
}

</mosaic_0001>

<bundles_post_ra>
// kernel: temporal_conv_net.1
= control target key start
LH: loop header
LB: loop body
LE: loop exit
PB: predicated region body
PF: predicated region fallthrough
CT: control target
= control target key end

     0   :  { %s14630_s0 = inlined_call_operand.vmem [shape: f32[2,4,1024], index: 0, kind: input, shape index: {}]   ;;  %s14631_s1 = inlined_call_operand.vmem [shape: f32[3,16,4], index: 1, kind: input, shape index: {}]   ;;  %s14632_s2 = inlined_call_operand.vmem [shape: f32[16,1], index: 2, kind: input, shape index: {}]   ;;  %s14633_s3 = inlined_call_operand.vmem [shape: f32[3,16,16], index: 3, kind: input, shape index: {}]   ;;  %s14634_s4 = inlined_call_operand.vmem [shape: f32[16,1], index: 4, kind: input, shape index: {}]   ;;  %s14635_s5 = inlined_call_operand.vmem [shape: f32[16,4], index: 5, kind: input, shape index: {}]   ;;  %s14636_s6 = inlined_call_operand.vmem [shape: f32[16,1], index: 6, kind: input, shape index: {}]   ;;  %s14637_s7 = inlined_call_operand.vmem [shape: f32[3,32,16], index: 7, kind: input, shape index: {}]   ;;  %s14638_s8 = inlined_call_operand.vmem [shape: f32[32,1], index: 8, kind: input, shape index: {}]   ;;  %s14639_s9 = inlined_call_operand.vmem [shape: f32[3,32,32], index: 9, kind: input, shape index: {}]   ;;  %s14640_s10 = inlined_call_operand.vmem [shape: f32[32,1], index: 10, kind: input, shape index: {}]   ;;  %s14641_s11 = inlined_call_operand.vmem [shape: f32[32,16], index: 11, kind: input, shape index: {}]   ;;  %s14642_s12 = inlined_call_operand.vmem [shape: f32[32,1], index: 12, kind: input, shape index: {}]   ;;  %s14643_s13 = inlined_call_operand.vmem [shape: f32[3,32,32], index: 13, kind: input, shape index: {}]   ;;  %s14644_s14 = inlined_call_operand.vmem [shape: f32[32,1], index: 14, kind: input, shape index: {}]   ;;  %s14645_s15 = inlined_call_operand.vmem [shape: f32[3,32,32], index: 15, kind: input, shape index: {}]   ;;  %s14646_s16 = inlined_call_operand.vmem [shape: f32[32,1], index: 16, kind: input, shape index: {}]   ;;  %s14647_s17 = inlined_call_operand.hbm [shape: f32[2,32,1024], index: 17, kind: output, shape index: {}]  }
   0x1   :  { %14661 = sst [smem:[#allocation14_spill]] %s14630_s0 }
   0x2   :  { %14662 = sst [smem:[#allocation15_spill]] %s14631_s1 }
   0x3   :  { %14663 = sst [smem:[#allocation16_spill]] %s14632_s2 }
   0x4   :  { %14664 = sst [smem:[#allocation17_spill]] %s14633_s3 }
   0x5   :  { %22 = vsyncpa [#allocation3], 0 }
   0x6   :  { %24 = vsyncpa [#allocation3 + $0x1], 0  ;;  %s11692_s24 = smov 0   ;;  %s11694_s25 = smov 0  }
   0x7   :  { %s11696_s26 = smov 0   ;;  %s11698_s27 = smov 0  }
   0x8 LB: > { %14665 = sst [smem:[#allocation5_spill]] %s11585_s26  ;;  %s11713_s28 = sadd.s32 4294967295, %s11589_s27   ;;  %s11589_s27 = sphi %s11698_s27, %s14714_s27   ;;  %s11585_s26 = sphi %s11696_s26, %s14711_s26   ;;  %s11581_s25 = sphi %s11694_s25, %s14713_s25   ;;  %s11577_s24 = sphi %s11692_s24, %s14712_s24  }
   0x9   : > { %s9714_s29 = sadd.s32 4294967294, %s11589_s27   ;;  %s11717_s0 = sadd.s32 1, %s11589_s27  }
   0xa   : > { %s399_s30 = sadd.s32 1, %s11585_s26  ;;  %s396_s18 = ssub.s32 %s11589_s27, %s11717_s0 }
   0xb   : > { %p409_p0 = scmp.ne.s32.totalorder %s11585_s26, %s11581_s25  ;;  %p397_p1 = scmp.eq.s32.totalorder %s396_s18, 0 }
   0xc   : > { %p410_p2 = scmp.eq.s32.totalorder %s11713_s28, 1  ;;  %p415_p3 = scmp.ne.s32.totalorder %s11581_s25, %s11577_s24 }
   0xd   : > { %p416_p4 = scmp.eq.s32.totalorder %s9714_s29, 1  ;;  %p9717_p7 = scmp.ge.s32.totalorder %s11589_s27, 1 }
   0xe   : > { %s11728_s19 = scalar_select %p397_p1, %s11585_s26, %s399_s30  }
   0xf   : > { %p11730_p5 = por %p410_p2, %p409_p0  ;;  %p11734_p6 = por %p416_p4, %p415_p3 }
  0x10   : > { %14666 = sst [smem:[#allocation6_spill]] %s11728_s19  ;;  %p490_p8 = scmp.lt.s32.totalorder %s11589_s27, 3 }
  0x12   : > { %p491_p9 = pnand %p9717_p7, %p490_p8 }
  0x14   : > { %494 = sbr.rel (%p491_p9) target bundleno = 2442 (0x98a), region = 88 }
  0x1b   : > { %p542_p10 = scmp.lt.s32.totalorder %s11713_s28, 1  ;;  %v14651_v0 = vmov 0.0   ;;  %s14669_s30 = sld [smem:[#allocation14_spill]]  ;;  %vm625_vm0 = vcmask 1043456   ;;  %vm618_vm1 = vcmask 31744   ;;  %v11594_v11 = vmov 0  }
  0x1c   : > { %783 = vmatprep.mubr.f32.mxu1 %v14651_v0  ;;  %706 = vmatprep.mubr.f32.mxu0 %v14651_v0  ;;  %s11592_s19 = smov 1   ;;  %s14670_s23 = sld [smem:[#allocation15_spill]]  ;;  %v579_v14 = vlaneseq  ;;  %vm1799_vm6 = vcmask 130048   ;;  %vm4750_vm15 = vcmask 261120  }
  0x1d   : > { %s543_s21 = scalar_select %p542_p10, %s11713_s28, 1  ;;  %10881 = vset.pattern.permute.xlu0 %v11594_v11  ;;  %10882 = vset.pattern.permute.xlu1 %v11594_v11 }
  0x1e   : > { %s14671_s2 = sld [smem:[#allocation16_spill]]  ;;  %v11847_v15 = vand.u32 127, %v579_v14  ;;  %s14672_s3 = sld [smem:[#allocation17_spill]] }
  0x1f   : > { %s10094_s22 = sshll.u32 %s543_s21, 5  ;;  %s11596_s26 = smov 126  }
  0x20   : > { %vm581_vm2 = vcmp.lt.s32.totalorder %v11847_v15, 1  ;;  %vm597_vm3 = vcmp.ge.s32.totalorder %v11847_v15, 1  ;;  %vm1304_vm4 = vcmp.lt.s32.totalorder %v11847_v15, 127  ;;  %v11903_v40 = vadd.s32 896, %v11847_v15  ;;  %s539_s21 = sand.u32 1, %s11581_s25   ;;  %s10095_s29 = sshll.u32 %s11713_s28, 12 }
  0x21   : > { %s546_s18 = scalar_lea.vmem %s14669_s30, %s10094_s22  ;;  %vm10115_vm7 = vmpackc.low %vm597_vm3, %vm597_vm3  ;;  %vm3261_vm9 = vcmp.lt.s32.totalorder %v11847_v15, 2  ;;  %vm3278_vm10 = vcmp.ge.s32.totalorder %v11847_v15, 2  ;;  %vm4079_vm12 = vcmp.lt.s32.totalorder %v11847_v15, 126  ;;  %s9718_s22 = sshll.u32 %s539_s21, 8 }
  0x22   : > { %v11747_v1 = vld [vmem:[%s546_s18 + $0x8] sm:$0xff]  ;;  %v11749_v2 = vld [vmem:[%s546_s18] sm:$0xff]  ;;  %v11761_v5 = vld [vmem:[%s546_s18 + $0x18] sm:$0xff]  ;;  %vm1320_vm5 = vcmp.lt.s32.totalorder %v11903_v40, 1023  ;;  %vm4103_vm13 = vcmp.lt.s32.totalorder %v11903_v40, 1022  ;;  %s14578_s28 = scalar_lea.hbm %s14647_s17, %s10095_s29 }
  0x23   : > { %567 = vrot.lane.b32.xlu0 %v11747_v1, %s11592_s19  ;;  %v11755_v3 = vcombine.high %v11749_v2, %v11749_v2  ;;  %v11759_v4 = vcombine.high %v11747_v1, %v11747_v1  ;;  %v9721_v6 = vld [vmem:[%s14670_s23 + $0x10] sm:$0xff]  ;;  %v11778_v7 = vcombine.high %v11761_v5, %v11761_v5  ;;  %v9722_v9 = vld [vmem:[%s14670_s23 + $0x18] sm:$0xff]  ;;  %v613_v20 = vld [vmem:[%s14670_s23] sm:$0xff] }
  0x24   : > { %v11781_v8 = vld [vmem:[%s546_s18 + $0x10] sm:$0xff]  ;;  %s11593_s18 = smov 127   ;;  %v1686_v12 = vld [vmem:[%s14671_s2] sm:$0xff]  ;;  %v1687_v13 = vld [vmem:[%s14671_s2 + $0x8] sm:$0xff]  ;;  %s11597_s2 = smov 4  }
  0x25   : > { %565 = vrot.lane.b32.xlu1 %v11755_v3, %s11592_s19  ;;  %9727 = vmatprep.subr.msk.mxu1 %vm625_vm0, %v11759_v4  ;;  %v11799_v10 = vcombine.high %v11781_v8, %v11781_v8  ;;  %v614_v26 = vld [vmem:[%s14670_s23 + $0x8] sm:$0xff]  ;;  %v9755_v42 = vld [vmem:[%s14670_s23 + $0x20] sm:$0xff]  ;;  %vm10142_vm8 = vmpackc.low %vm1320_vm5, %vm1320_vm5 }
  0x26   : > { %9728 = vmatpush1.msk.msra.mxu1 %vm625_vm0, %v11747_v1  ;;  %9723 = vmatprep.subr.msk.mxu0 %vm625_vm0, %v11755_v3  ;;  %v9756_v47 = vld [vmem:[%s14670_s23 + $0x28] sm:$0xff]  ;;  %vm12343_vm11 = vmpackc.low %vm3278_vm10, %vm3278_vm10 }
  0x27   : > { %569 = vrot.lane.b32.xlu0 %v11759_v4, %s11592_s19  ;;  %9729 = vmatmul.mubr.msk.f32.vlgmr.msra.gmra.mrb[0].mxu1 %vm618_vm1, %v9721_v6  ;;  %vm12430_vm14 = vmpackc.low %vm4103_vm13, %vm4103_vm13 }
  0x28   : > { %9724 = vmatpush1.msk.msra.mxu0 %vm625_vm0, %v11749_v2  ;;  %789 = vmatprep.mubr.f32.mxu1 %v14651_v0 }
  0x29   : > { %563 = vrot.lane.b32.xlu1 %v11749_v2, %s11592_s19  ;;  %9725 = vmatmul.mubr.msk.f32.vlgmr.msra.gmra.mrb[0].mxu0 %vm618_vm1, %v9721_v6 }
  0x2a   : > { %9735 = vmatprep.subr.msk.mxu1 %vm625_vm0, %v11778_v7  ;;  %712 = vmatprep.mubr.f32.mxu0 %v14651_v0 }
  0x2b   : > { %577 = vrot.lane.b32.xlu0 %v11778_v7, %s11592_s19  ;;  %9730 = vmatmul.mubr.msk.f32.gmra.mrb[2].mxu1 %vm618_vm1, %v9722_v9 }
  0x2c   : > { %9736 = vmatpush1.msk.msra.mxu1 %vm625_vm0, %v11761_v5  ;;  %937 = vmatprep.mubr.f32.mxu1 %v14651_v0 }
  0x2d   : > { %575 = vrot.lane.b32.xlu1 %v11761_v5, %s11592_s19  ;;  %9726 = vmatmul.mubr.msk.f32.gmra.mrb[2].mxu0 %vm618_vm1, %v9722_v9 }
  0x2e   : > { %9731 = vmatprep.subr.msk.mxu0 %vm625_vm0, %v11799_v10  ;;  %860 = vmatprep.mubr.f32.mxu0 %v14651_v0 }
  0x2f   : > { %573 = vrot.lane.b32.xlu0 %v11799_v10, %s11592_s19  ;;  %9737 = vmatmul.mubr.msk.f32.vlgmr.msra.gmra.mrb[4].mxu1 %vm618_vm1, %v9721_v6 }
  0x30   : > { %9732 = vmatpush1.msk.msra.mxu0 %vm625_vm0, %v11781_v8  ;;  %943 = vmatprep.mubr.f32.mxu1 %v14651_v0 }
  0x31   : > { %571 = vrot.lane.b32.xlu1 %v11781_v8, %s11592_s19  ;;  %9733 = vmatmul.mubr.msk.f32.vlgmr.msra.gmra.mrb[4].mxu0 %vm618_vm1, %v9721_v6 }
  0x32   : > { %866 = vmatprep.mubr.f32.mxu0 %v14651_v0 }
  0x33   : > { %1294 = vrot.lane.b32.xlu0 %v11759_v4, %s11593_s18  ;;  %9738 = vmatmul.mubr.msk.f32.gmra.mrb[6].mxu1 %vm618_vm1, %v9722_v9 }
  0x34   : > { %1121 = vmatprep.mubr.f32.mxu1 %v14651_v0 }
  0x35   : > { %1296 = vrot.lane.b32.xlu1 %v11781_v8, %s11593_s18  ;;  %9734 = vmatmul.mubr.msk.f32.gmra.mrb[6].mxu0 %vm618_vm1, %v9722_v9 }
  0x36   : > { %1044 = vmatprep.mubr.f32.mxu0 %v14651_v0 }
  0x37   : > { %1292 = vrot.lane.b32.xlu0 %v11747_v1, %s11593_s18 }
  0x39   : > { %1288 = vrot.lane.b32.xlu1 %v11749_v2, %s11593_s18 }
  0x3b   : > { %1290 = vrot.lane.b32.xlu0 %v11755_v3, %s11593_s18 }
  0x3d   : > { %1302 = vrot.lane.b32.xlu1 %v11778_v7, %s11593_s18 }
  0x3f   : > { %1300 = vrot.lane.b32.xlu0 %v11761_v5, %s11593_s18 }
  0x41   : > { %1298 = vrot.lane.b32.xlu1 %v11799_v10, %s11593_s18 }
  0x43   : > { %1690 = vperm.xlu0 %10881, %v1686_v12  }
  0x45   : > { %1695 = vperm.xlu1 %10882, %v1687_v13  }
  0x95   : > { %v568_v16 = vpop.permute.xlu0 %567 }
  0x97   : > { %v566_v17 = vpop.permute.xlu1 %565 }
  0x98   : > { %v587_v21 = vsel %vm581_vm2, %v566_v17, %v568_v16 }
  0x99   : > { %v570_v18 = vpop.permute.xlu0 %569 }
  0x9a   : > { %v586_v19 = vsel %vm581_vm2, %v568_v16, %v570_v18 }
  0x9b   : > { %9743 = vmatprep.subr.msk.mxu1 %vm625_vm0, %v586_v19  ;;  %v564_v22 = vpop.permute.xlu1 %563 }
  0x9c   : > { %9744 = vmatpush1.msk.msra.mxu1 %vm625_vm0, %v587_v21  ;;  %v588_v23 = vsel %vm581_vm2, %v564_v22, %v566_v17 }
  0x9d   : > { %v578_v24 = vpop.permute.xlu0 %577  ;;  %9739 = vmatprep.subr.msk.mxu0 %vm625_vm0, %v588_v23  ;;  %9745 = vmatmul.mubr.msk.f32.vlgmr.msra.gmra.mrb[0].mxu1 %vm618_vm1, %v613_v20 }
  0x9e   : > { %v589_v25 = vsel %vm581_vm2, %v578_v24, %v564_v22  ;;  %1127 = vmatprep.mubr.f32.mxu1 %v14651_v0 }
  0x9f   : > { %v605_v27 = vsel %vm597_vm3, %v589_v25, 0.0  ;;  %v576_v28 = vpop.permute.xlu1 %575  ;;  %vm7514_vm3 = vcmp.lt.s32.totalorder %v11847_v15, 124 }
  0xa0   : > { %9740 = vmatpush1.msk.msra.mxu0 %vm625_vm0, %v605_v27  ;;  %v582_v29 = vsel %vm581_vm2, %v576_v28, %v578_v24 }
  0xa1   : > { %v574_v30 = vpop.permute.xlu0 %573  ;;  %9741 = vmatmul.mubr.msk.f32.vlgmr.msra.gmra.mrb[0].mxu0 %vm618_vm1, %v613_v20  ;;  %9746 = vmatmul.mubr.msk.f32.gmra.mrb[2].mxu1 %vm618_vm1, %v614_v26 }
  0xa2   : > { %v583_v31 = vsel %vm581_vm2, %v574_v30, %v576_v28  ;;  %9751 = vmatprep.subr.msk.mxu1 %vm625_vm0, %v582_v29  ;;  %1050 = vmatprep.mubr.f32.mxu0 %v14651_v0 }
  0xa3   : > { %9752 = vmatpush1.msk.msra.mxu1 %vm625_vm0, %v583_v31  ;;  %v572_v32 = vpop.permute.xlu1 %571  ;;  %1275 = vmatprep.mubr.f32.mxu1 %v14651_v0 }
  0xa4   : > { %v585_v33 = vsel %vm581_vm2, %v570_v18, %v572_v32  ;;  %v584_v34 = vsel %vm581_vm2, %v572_v32, %v574_v30 }
  0xa5   : > { %v1295_v35 = vpop.permute.xlu0 %1294  ;;  %9742 = vmatmul.mubr.msk.f32.gmra.mrb[2].mxu0 %vm618_vm1, %v614_v26  ;;  %9747 = vmatprep.subr.msk.mxu0 %vm625_vm0, %v584_v34 }
  0xa6   : > { %9753 = vmatmul.mubr.msk.f32.vlgmr.msra.gmra.mrb[4].mxu1 %vm618_vm1, %v613_v20  ;;  %9748 = vmatpush1.msk.msra.mxu0 %vm625_vm0, %v585_v33 }
  0xa7   : > { %v1297_v36 = vpop.permute.xlu1 %1296  ;;  %1198 = vmatprep.mubr.f32.mxu0 %v14651_v0  ;;  %1281 = vmatprep.mubr.f32.mxu1 %v14651_v0 }
  0xa8   : > { %v1308_v37 = vsel %vm1304_vm4, %v1295_v35, %v1297_v36 }
  0xa9   : > { %v1293_v38 = vpop.permute.xlu0 %1292  ;;  %9749 = vmatmul.mubr.msk.f32.vlgmr.msra.gmra.mrb[4].mxu0 %vm618_vm1, %v613_v20  ;;  %9761 = vmatprep.subr.msk.mxu1 %vm625_vm0, %v1308_v37 }
  0xaa   : > { %v1309_v39 = vsel %vm1304_vm4, %v1293_v38, %v1295_v35  ;;  %9754 = vmatmul.mubr.msk.f32.gmra.mrb[6].mxu1 %vm618_vm1, %v614_v26  ;;  %1204 = vmatprep.mubr.f32.mxu0 %v14651_v0 }
  0xab   : > { %9762 = vmatpush1.msk.msra.mxu1 %vm625_vm0, %v1309_v39  ;;  %v1289_v41 = vpop.permute.xlu1 %1288  ;;  %1503 = vmatprep.mubr.f32.mxu1 %v14651_v0 }
  0xad   : > { %v1291_v43 = vpop.permute.xlu0 %1290  ;;  %9750 = vmatmul.mubr.msk.f32.gmra.mrb[6].mxu0 %vm618_vm1, %v614_v26 }
  0xae   : > { %v1311_v44 = vsel %vm1304_vm4, %v1289_v41, %v1291_v43  ;;  %9763 = vmatmul.mubr.msk.f32.vlgmr.msra.gmra.mrb[0].mxu1 %vm618_vm1, %v9755_v42  ;;  %v1310_v45 = vsel %vm1304_vm4, %v1291_v43, %v1293_v38  ;;  %1426 = vmatprep.mubr.f32.mxu0 %v14651_v0 }
  0xaf   : > { %v1303_v46 = vpop.permute.xlu1 %1302  ;;  %9757 = vmatprep.subr.msk.mxu0 %vm625_vm0, %v1310_v45  ;;  %1509 = vmatprep.mubr.f32.mxu1 %v14651_v0 }
  0xb0   : > { %v1312_v48 = vsel %vm1304_vm4, %v1303_v46, %v1289_v41  ;;  %9758 = vmatpush1.msk.msra.mxu0 %vm625_vm0, %v1311_v44 }
  0xb1   : > { %v1301_v49 = vpop.permute.xlu0 %1300  ;;  %9759 = vmatmul.mubr.msk.f32.vlgmr.msra.gmra.mrb[0].mxu0 %vm618_vm1, %v9755_v42  ;;  %v1328_v50 = vsel %vm1320_vm5, %v1312_v48, 0.0 }
  0xb2   : > { %v1305_v51 = vsel %vm1304_vm4, %v1301_v49, %v1303_v46  ;;  %9764 = vmatmul.mubr.msk.f32.gmra.mrb[2].mxu1 %vm618_vm1, %v9756_v47  ;;  %9769 = vmatprep.subr.msk.mxu1 %vm625_vm0, %v1328_v50 }
  0xb3   : > { %9770 = vmatpush1.msk.msra.mxu1 %vm625_vm0, %v1305_v51  ;;  %v1299_v52 = vpop.permute.xlu1 %1298  ;;  %1432 = vmatprep.mubr.f32.mxu0 %v14651_v0 }
  0xb4   : > { %v1307_v53 = vsel %vm1304_vm4, %v1297_v36, %v1299_v52  ;;  %1657 = vmatprep.mubr.f32.mxu1 %v14651_v0  ;;  %v1306_v54 = vsel %vm1304_vm4, %v1299_v52, %v1301_v49 }
  0xb5   : > { %9760 = vmatmul.mubr.msk.f32.gmra.mrb[2].mxu0 %vm618_vm1, %v9756_v47  ;;  %9765 = vmatprep.subr.msk.mxu0 %vm625_vm0, %v1306_v54 }
  0xb6   : > { %9771 = vmatmul.mubr.msk.f32.vlgmr.msra.gmra.mrb[4].mxu1 %vm618_vm1, %v9755_v42  ;;  %9766 = vmatpush1.msk.msra.mxu0 %vm625_vm0, %v1307_v53 }
  0xb7   : > { %1580 = vmatprep.mubr.f32.mxu0 %v14651_v0  ;;  %1663 = vmatprep.mubr.f32.mxu1 %v14651_v0 }
  0xb9   : > { %9767 = vmatmul.mubr.msk.f32.vlgmr.msra.gmra.mrb[4].mxu0 %vm618_vm1, %v9755_v42 }
  0xba   : > { %9772 = vmatmul.mubr.msk.f32.gmra.mrb[6].mxu1 %vm618_vm1, %v9756_v47  ;;  %1586 = vmatprep.mubr.f32.mxu0 %v14651_v0 }
  0xbb   : > { %1947 = vmatprep.mubr.f32.mxu1 %v14651_v0 }
  0xbd   : > { %9768 = vmatmul.mubr.msk.f32.gmra.mrb[6].mxu0 %vm618_vm1, %v9756_v47  ;;  %v9773_v47 = vld [vmem:[%s14672_s3 + $0x10] sm:$0xff] }
  0xbe   : > { %1870 = vmatprep.mubr.f32.mxu0 %v14651_v0 }
  0xc2   : > { %v1691_v55 = vpop.permute.xlu0 %1690 }
  0xc4   : > { %v1696_v58 = vpop.permute.xlu1 %1695 }
 0x181   : > { %v1505_v56 = vpop.f32.mrb[0].mxu1 }
 0x182   : > { %v1507_v57 = vpop.f32.mrb[1].mxu1  ;;  %v1700_v59 = vadd.f32 %v1691_v55, %v1505_v56 }
 0x183   : > { %v1701_v61 = vadd.f32 %v1691_v55, %v1507_v57 }
 0x184   : > { %v1428_v60 = vpop.f32.mrb[0].mxu0  ;;  %v1716_v14 = vmax.f32 %v1700_v59, 0.0 }
 0x185   : > { %v1511_v62 = vpop.f32.mrb[2].mxu1  ;;  %v1698_v63 = vadd.f32 %v1691_v55, %v1428_v60  ;;  %v1430_v6 = vpop.f32.mrb[1].mxu0  ;;  %v1717_v18 = vmax.f32 %v1701_v61, 0.0 }
 0x186   : > { %v1699_v9 = vadd.f32 %v1691_v55, %v1430_v6  ;;  %v1513_v11 = vpop.f32.mrb[3].mxu1  ;;  %v1708_v12 = vadd.f32 %v1696_v58, %v1511_v62 }
 0x187   : > { %v1709_v13 = vadd.f32 %v1696_v58, %v1513_v11  ;;  %v1714_v19 = vmax.f32 %v1698_v63, 0.0  ;;  %v9774_v11 = vld [vmem:[%s14672_s3 + $0x18] sm:$0xff] }
 0x188   : > { %v1434_v16 = vpop.f32.mrb[2].mxu0  ;;  %v1724_v17 = vmax.f32 %v1708_v12, 0.0  ;;  %v1715_v24 = vmax.f32 %v1699_v9, 0.0 }
 0x189   : > { %v1725_v20 = vmax.f32 %v1709_v13, 0.0  ;;  %v1706_v21 = vadd.f32 %v1696_v58, %v1434_v16  ;;  %v1659_v22 = vpop.f32.mrb[4].mxu1  ;;  %v1436_v23 = vpop.f32.mrb[3].mxu0  ;;  %v2825_v16 = vld [vmem:[%s14634_s4] sm:$0xff] }
 0x18a   : > { %v1707_v25 = vadd.f32 %v1696_v58, %v1436_v23  ;;  %v1661_v26 = vpop.f32.mrb[5].mxu1  ;;  %v11952_v27 = vpack.i.bf16 %v1724_v17, %v1716_v14  ;;  %v10102_v28 = vpack.c.bf16 %v1724_v17, %v1716_v14  ;;  %v1704_v30 = vadd.f32 %v1691_v55, %v1659_v22  ;;  %v2826_v17 = vld [vmem:[%s14634_s4 + $0x8] sm:$0xff] }
 0x18b   : > { %v1722_v29 = vmax.f32 %v1706_v21, 0.0  ;;  %v11954_v31 = vpack.i.bf16 %v1725_v20, %v1717_v18  ;;  %v10100_v32 = vpack.c.bf16 %v1725_v20, %v1717_v18  ;;  %v1705_v34 = vadd.f32 %v1691_v55, %v1661_v26  ;;  %v2871_v18 = vld [vmem:[%s14636_s6] sm:$0xff] }
 0x18c   : > { %v1723_v33 = vmax.f32 %v1707_v25, 0.0  ;;  %10884 = vrot.lane.b32.xlu1 %v11952_v27, %s11592_s19  ;;  %v1582_v35 = vpop.f32.mrb[4].mxu0  ;;  %v1720_v48 = vmax.f32 %v1704_v30, 0.0 }
 0x18d   : > { %v10098_v36 = vpack.c.bf16 %v1722_v29, %v1714_v19  ;;  %v1665_v37 = vpop.f32.mrb[6].mxu1  ;;  %10894 = vrot.lane.b32.xlu0 %v11954_v31, %s11592_s19  ;;  %v1702_v38 = vadd.f32 %v1691_v55, %v1582_v35  ;;  %10101 = vmatprep.subr.bf16.mxu1 %v10100_v32  ;;  %v1584_v39 = vpop.f32.mrb[5].mxu0  ;;  %v10888_v41 = vpack.i.bf16 %v1722_v29, %v1714_v19  ;;  %v1721_v52 = vmax.f32 %v1705_v34, 0.0  ;;  %v2872_v19 = vld [vmem:[%s14636_s6 + $0x8] sm:$0xff] }
 0x18e   : > { %v1712_v42 = vadd.f32 %v1696_v58, %v1665_v37  ;;  %v1667_v43 = vpop.f32.mrb[7].mxu1  ;;  %10103 = vmatpush1.bf16.msra.mxu1 %v10102_v28  ;;  %v10898_v44 = vpack.i.bf16 %v1723_v33, %v1715_v24  ;;  %v10096_v45 = vpack.c.bf16 %v1723_v33, %v1715_v24  ;;  %v1703_v50 = vadd.f32 %v1691_v55, %v1584_v39 }
 0x18f   : > { %v1713_v46 = vadd.f32 %v1696_v58, %v1667_v43  ;;  %v1718_v53 = vmax.f32 %v1702_v38, 0.0 }
 0x190   : > { %v1728_v49 = vmax.f32 %v1712_v42, 0.0  ;;  %10889 = vrot.lane.b32.xlu1 %v10888_v41, %s11592_s19  ;;  %v1588_v51 = vpop.f32.mrb[6].mxu0  ;;  %10097 = vmatprep.subr.bf16.mxu0 %v10096_v45  ;;  %v1719_v6 = vmax.f32 %v1703_v50, 0.0 }
 0x191   : > { %v1729_v54 = vmax.f32 %v1713_v46, 0.0  ;;  %10899 = vrot.lane.b32.xlu0 %v10898_v44, %s11592_s19  ;;  %v1710_v56 = vadd.f32 %v1696_v58, %v1588_v51  ;;  %v1590_v57 = vpop.f32.mrb[7].mxu0  ;;  %10099 = vmatpush1.bf16.msra.mxu0 %v10098_v36 }
 0x192   : > { %v10110_v59 = vpack.c.bf16 %v1728_v49, %v1720_v48  ;;  %v1711_v60 = vadd.f32 %v1696_v58, %v1590_v57  ;;  %v10903_v61 = vpack.i.bf16 %v1728_v49, %v1720_v48  ;;  %9777 = vmatmul.mubr.msk.f32.vlgmr.msra.gmra.mrb[8].mxu1 %vm1799_vm6, %v9773_v47  ;;  %v12025_v48 = vld [vmem:[%s14672_s3] sm:$0xff] }
 0x193   : > { %v1726_v62 = vmax.f32 %v1710_v56, 0.0  ;;  %v10108_v63 = vpack.c.bf16 %v1729_v54, %v1721_v52  ;;  %v10908_v55 = vpack.i.bf16 %v1729_v54, %v1721_v52  ;;  %1953 = vmatprep.mubr.f32.mxu1 %v14651_v0 }
 0x194   : > { %v1727_v9 = vmax.f32 %v1711_v60, 0.0  ;;  %9775 = vmatmul.mubr.msk.f32.vlgmr.msra.gmra.mrb[8].mxu0 %vm1799_vm6, %v9773_v47 }
 0x195   : > { %v10106_v12 = vpack.c.bf16 %v1726_v62, %v1718_v53  ;;  %10109 = vmatprep.subr.bf16.mxu1 %v10108_v63  ;;  %10909 = vrot.lane.b32.xlu1 %v10908_v55, %s11592_s19  ;;  %v10913_v58 = vpack.i.bf16 %v1726_v62, %v1718_v53  ;;  %v12044_v63 = vld [vmem:[%s14672_s3 + $0x8] sm:$0xff] }
 0x196   : > { %10904 = vrot.lane.b32.xlu0 %v10903_v61, %s11592_s19  ;;  %10111 = vmatpush1.bf16.msra.mxu1 %v10110_v59  ;;  %v10923_v13 = vpack.i.bf16 %v1727_v9, %v1719_v6  ;;  %v10104_v14 = vpack.c.bf16 %v1727_v9, %v1719_v6 }
 0x197   : > { %9778 = vmatmul.mubr.msk.f32.gmra.mrb[10].mxu1 %vm1799_vm6, %v9774_v11  ;;  %1876 = vmatprep.mubr.f32.mxu0 %v14651_v0 }
 0x198   : > { %10105 = vmatprep.subr.bf16.mxu0 %v10104_v14  ;;  %2101 = vmatprep.mubr.f32.mxu1 %v14651_v0 }
 0x199   : > { %10914 = vrot.lane.b32.xlu1 %v10913_v58, %s11592_s19  ;;  %10107 = vmatpush1.bf16.msra.mxu0 %v10106_v12 }
 0x19a   : > { %10924 = vrot.lane.b32.xlu0 %v10923_v13, %s11592_s19  ;;  %9776 = vmatmul.mubr.msk.f32.gmra.mrb[10].mxu0 %vm1799_vm6, %v9774_v11  ;;  %s11599_s19 = smov [#allocation2]  }
 0x19b   : > { %9781 = vmatmul.mubr.msk.f32.vlgmr.msra.gmra.mrb[12].mxu1 %vm1799_vm6, %v9773_v47  ;;  %2024 = vmatprep.mubr.f32.mxu0 %v14651_v0 }
 0x19c   : > { %2107 = vmatprep.mubr.f32.mxu1 %v14651_v0 }
 0x19d   : > { %10919 = vrot.lane.b32.xlu1 %v11954_v31, %s11593_s18 }
 0x19e   : > { %10929 = vrot.lane.b32.xlu0 %v10913_v58, %s11593_s18  ;;  %9779 = vmatmul.mubr.msk.f32.vlgmr.msra.gmra.mrb[12].mxu0 %vm1799_vm6, %v9773_v47 }
 0x19f   : > { %9782 = vmatmul.mubr.msk.f32.gmra.mrb[14].mxu1 %vm1799_vm6, %v9774_v11  ;;  %2030 = vmatprep.mubr.f32.mxu0 %v14651_v0 }
 0x1a0   : > { %2261 = vmatprep.mubr.f32.mxu1 %v14651_v0 }
 0x1a1   : > { %10934 = vrot.lane.b32.xlu1 %v10898_v44, %s11593_s18 }
 0x1a2   : > { %10939 = vrot.lane.b32.xlu0 %v11952_v27, %s11593_s18  ;;  %9780 = vmatmul.mubr.msk.f32.gmra.mrb[14].mxu0 %vm1799_vm6, %v9774_v11 }
 0x1a3   : > { %2184 = vmatprep.mubr.f32.mxu0 %v14651_v0 }
 0x1a5   : > { %10944 = vrot.lane.b32.xlu1 %v10888_v41, %s11593_s18 }
 0x1a6   : > { %10949 = vrot.lane.b32.xlu0 %v10908_v55, %s11593_s18 }
 0x1a9   : > { %10954 = vrot.lane.b32.xlu1 %v10923_v13, %s11593_s18 }
 0x1aa   : > { %10959 = vrot.lane.b32.xlu0 %v10903_v61, %s11593_s18  ;;  %s11595_s18 = smov 2  }
 0x1ad   : > { %2829 = vperm.xlu1 %10882, %v2825_v16  }
 0x1ae   : > { %2834 = vperm.xlu0 %10881, %v2826_v17  }
 0x1b1   : > { %2875 = vperm.xlu1 %10882, %v2871_v18  }
 0x1b2   : > { %2880 = vperm.xlu0 %10881, %v2872_v19  }
 0x1fe   : > { %v10885_v20 = vpop.permute.xlu1 %10884 }
 0x1ff   : > { %v10887_v21 = vunpack.i.h.bf16 %v10885_v20  ;;  %v10886_v22 = vunpack.i.l.bf16 %v10885_v20  ;;  %v10895_v23 = vpop.permute.xlu0 %10894 }
 0x200   : > { %v10897_v24 = vunpack.i.h.bf16 %v10895_v23  ;;  %v10896_v25 = vunpack.i.l.bf16 %v10895_v23 }
 0x202   : > { %v10890_v26 = vpop.permute.xlu1 %10889  ;;  %v1770_v27 = vsel %vm581_vm2, %v10886_v22, %v10896_v25  ;;  %v1771_v28 = vsel %vm581_vm2, %v10887_v21, %v10897_v24 }
 0x203   : > { %v10892_v29 = vunpack.i.h.bf16 %v10890_v26  ;;  %v10891_v30 = vunpack.i.l.bf16 %v10890_v26  ;;  %v10900_v31 = vpop.permute.xlu0 %10899  ;;  %v10117_v32 = vpack.c.bf16 %v1771_v28, %v1770_v27 }
 0x204   : > { %v10902_v33 = vunpack.i.h.bf16 %v10900_v31  ;;  %v10901_v34 = vunpack.i.l.bf16 %v10900_v31 }
 0x205   : > { %10118 = vmatprep.subr.bf16.mxu1 %v10117_v32 }
 0x206   : > { %v1773_v35 = vsel %vm581_vm2, %v10902_v33, %v10887_v21  ;;  %v1772_v36 = vsel %vm581_vm2, %v10901_v34, %v10886_v22  ;;  %v1774_v37 = vsel %vm581_vm2, %v10891_v30, %v10901_v34  ;;  %v1775_v38 = vsel %vm581_vm2, %v10892_v29, %v10902_v33 }
 0x207   : > { %v10910_v39 = vpop.permute.xlu1 %10909  ;;  %v10112_v41 = vpack.c.bf16 %v1775_v38, %v1774_v37  ;;  %v10119_v42 = vpack.c.bf16 %v1773_v35, %v1772_v36 }
 0x208   : > { %v10912_v43 = vunpack.i.h.bf16 %v10910_v39  ;;  %v10911_v44 = vunpack.i.l.bf16 %v10910_v39  ;;  %v10905_v45 = vpop.permute.xlu0 %10904 }
 0x209   : > { %v10907_v46 = vunpack.i.h.bf16 %v10905_v45  ;;  %v10906_v47 = vunpack.i.l.bf16 %v10905_v45  ;;  %10113 = vmatprep.subr.bf16.mxu0 %v10112_v41  ;;  %10120 = vmatpush1.bf16.msra.mxu1 %v10119_v42 }
 0x20a   : > { %v1776_v49 = vsel %vm581_vm2, %v10911_v44, %v10891_v30  ;;  %v1777_v50 = vsel %vm581_vm2, %v10912_v43, %v10892_v29 }
 0x20b   : > { %v10114_v51 = vpack.c.bf16 %v1777_v50, %v1776_v49  ;;  %v10915_v52 = vpop.permute.xlu1 %10914  ;;  %v1762_v53 = vsel %vm581_vm2, %v10906_v47, %v10911_v44  ;;  %v1763_v54 = vsel %vm581_vm2, %v10907_v46, %v10912_v43 }
 0x20c   : > { %v10917_v56 = vunpack.i.h.bf16 %v10915_v52  ;;  %v10916_v57 = vunpack.i.l.bf16 %v10915_v52  ;;  %v10925_v59 = vpop.permute.xlu0 %10924  ;;  %9787 = vmatmul.mubr.msk.f32.vlgmr.msra.gmra.mrb[8].mxu1 %vm1799_vm6, %v12025_v48  ;;  %v10125_v60 = vpack.c.bf16 %v1763_v54, %v1762_v53 }
 0x20d   : > { %v10927_v61 = vunpack.i.h.bf16 %v10925_v59  ;;  %v10926_v62 = vunpack.i.l.bf16 %v10925_v59  ;;  %10116 = vmatpush1.bf16.msk.msra.mxu0 %vm10115_vm7, %v10114_v51  ;;  %2267 = vmatprep.mubr.f32.mxu1 %v14651_v0 }
 0x20e   : > { %v1769_v55 = vsel %vm581_vm2, %v10897_v24, %v10917_v56  ;;  %v1768_v6 = vsel %vm581_vm2, %v10896_v25, %v10916_v57  ;;  %10126 = vmatprep.subr.bf16.mxu1 %v10125_v60 }
 0x20f   : > { %v1765_v9 = vsel %vm581_vm2, %v10927_v61, %v10907_v46  ;;  %v1764_v11 = vsel %vm581_vm2, %v10926_v62, %v10906_v47  ;;  %v10920_v12 = vpop.permute.xlu1 %10919  ;;  %v1766_v58 = vsel %vm581_vm2, %v10916_v57, %v10926_v62  ;;  %v1767_v13 = vsel %vm581_vm2, %v10917_v56, %v10927_v61  ;;  %v9793_v47 = vld [vmem:[%s14672_s3 + $0x20] sm:$0xff]  ;;  %v9794_v62 = vld [vmem:[%s14672_s3 + $0x28] sm:$0xff]  ;;  %s14486_s3 = scalar_lea.vmem [#allocation2], %s9718_s22  ;;  %s11531_s22 = sshll.u32 %s11599_s19, 4  ;;  %s11532_s22 = int_to_ptr.vmem [resolvable:$false] %s11531_s22 }
 0x210   : > { %v10922_v14 = vunpack.i.h.bf16 %v10920_v12  ;;  %v10921_v16 = vunpack.i.l.bf16 %v10920_v12  ;;  %v12058_v17 = vpop.permute.xlu0 %10929  ;;  %9785 = vmatmul.mubr.msk.f32.vlgmr.msra.gmra.mrb[8].mxu0 %vm1799_vm6, %v12025_v48  ;;  %9788 = vmatmul.mubr.msk.f32.gmra.mrb[10].mxu1 %vm1799_vm6, %v12044_v63  ;;  %v10121_v18 = vpack.c.bf16 %v1767_v13, %v1766_v58  ;;  %v10127_v19 = vpack.c.bf16 %v1765_v9, %v1764_v11  ;;  %s11533_s29 = scalar_lea.vmem %s11532_s22, 8192 }
 0x211   : > { %v10932_v20 = vunpack.i.h.bf16 %v12058_v17  ;;  %v10931_v21 = vunpack.i.l.bf16 %v12058_v17  ;;  %v10123_v22 = vpack.c.bf16 %v1769_v55, %v1768_v6  ;;  %2415 = vmatprep.mubr.f32.mxu1 %v14651_v0  ;;  %2190 = vmatprep.mubr.f32.mxu0 %v14651_v0 }
 0x212   : > { %10122 = vmatprep.subr.bf16.mxu0 %v10121_v18  ;;  %10128 = vmatpush1.bf16.msra.mxu1 %v10127_v19 }
 0x213   : > { %10124 = vmatpush1.bf16.msra.mxu0 %v10123_v22  ;;  %v10935_v23 = vpop.permute.xlu1 %10934  ;;  %v2466_v24 = vsel %vm1304_vm4, %v10921_v16, %v10931_v21  ;;  %v2467_v25 = vsel %vm1304_vm4, %v10922_v14, %v10932_v20 }
 0x214   : > { %v10937_v26 = vunpack.i.h.bf16 %v10935_v23  ;;  %v10936_v27 = vunpack.i.l.bf16 %v10935_v23  ;;  %v10940_v28 = vpop.permute.xlu0 %10939  ;;  %9786 = vmatmul.mubr.msk.f32.gmra.mrb[10].mxu0 %vm1799_vm6, %v12044_v63  ;;  %v10133_v29 = vpack.c.bf16 %v2467_v25, %v2466_v24 }
 0x215   : > { %v10942_v30 = vunpack.i.h.bf16 %v10940_v28  ;;  %v10941_v31 = vunpack.i.l.bf16 %v10940_v28  ;;  %9791 = vmatmul.mubr.msk.f32.vlgmr.msra.gmra.mrb[12].mxu1 %vm1799_vm6, %v12025_v48  ;;  %2338 = vmatprep.mubr.f32.mxu0 %v14651_v0 }
 0x216   : > { %10134 = vmatprep.subr.bf16.mxu1 %v10133_v29  ;;  %2421 = vmatprep.mubr.f32.mxu1 %v14651_v0 }
 0x217   : > { %v2469_v32 = vsel %vm1304_vm4, %v10942_v30, %v10922_v14  ;;  %v2468_v33 = vsel %vm1304_vm4, %v10941_v31, %v10921_v16  ;;  %v10945_v34 = vpop.permute.xlu1 %10944  ;;  %v2470_v35 = vsel %vm1304_vm4, %v10936_v27, %v10941_v31  ;;  %v2471_v36 = vsel %vm1304_vm4, %v10937_v26, %v10942_v30 }
 0x218   : > { %v10947_v37 = vunpack.i.h.bf16 %v10945_v34  ;;  %v10946_v38 = vunpack.i.l.bf16 %v10945_v34  ;;  %v10950_v39 = vpop.permute.xlu0 %10949  ;;  %9789 = vmatmul.mubr.msk.f32.vlgmr.msra.gmra.mrb[12].mxu0 %vm1799_vm6, %v12025_v48  ;;  %v10129_v41 = vpack.c.bf16 %v2471_v36, %v2470_v35  ;;  %v10135_v42 = vpack.c.bf16 %v2469_v32, %v2468_v33 }
 0x219   : > { %v10952_v43 = vunpack.i.h.bf16 %v10950_v39  ;;  %v10951_v44 = vunpack.i.l.bf16 %v10950_v39  ;;  %9792 = vmatmul.mubr.msk.f32.gmra.mrb[14].mxu1 %vm1799_vm6, %v12044_v63  ;;  %2344 = vmatprep.mubr.f32.mxu0 %v14651_v0 }
 0x21a   : > { %v2472_v45 = vsel %vm1304_vm4, %v10946_v38, %v10936_v27  ;;  %v2473_v46 = vsel %vm1304_vm4, %v10947_v37, %v10937_v26  ;;  %10130 = vmatprep.subr.bf16.mxu0 %v10129_v41  ;;  %10136 = vmatpush1.bf16.msra.mxu1 %v10135_v42 }
 0x21b   : > { %v2475_v48 = vsel %vm1304_vm4, %v10952_v43, %v10947_v37  ;;  %v2474_v49 = vsel %vm1304_vm4, %v10951_v44, %v10946_v38  ;;  %v10955_v50 = vpop.permute.xlu1 %10954  ;;  %2642 = vmatprep.mubr.f32.mxu1 %v14651_v0  ;;  %v10131_v51 = vpack.c.bf16 %v2473_v46, %v2472_v45 }
 0x21c   : > { %v10957_v52 = vunpack.i.h.bf16 %v10955_v50  ;;  %v10956_v53 = vunpack.i.l.bf16 %v10955_v50  ;;  %v10960_v54 = vpop.permute.xlu0 %10959  ;;  %9790 = vmatmul.mubr.msk.f32.gmra.mrb[14].mxu0 %vm1799_vm6, %v12044_v63  ;;  %v10141_v56 = vpack.c.bf16 %v2475_v48, %v2474_v49 }
 0x21d   : > { %v10962_v57 = vunpack.i.h.bf16 %v10960_v54  ;;  %v10961_v59 = vunpack.i.l.bf16 %v10960_v54  ;;  %9797 = vmatmul.mubr.msk.f32.vlgmr.msra.gmra.mrb[8].mxu1 %vm1799_vm6, %v9793_v47  ;;  %10132 = vmatpush1.bf16.msra.mxu0 %v10131_v51 }
 0x21e   : > { %v2464_v60 = vsel %vm1304_vm4, %v10931_v21, %v10956_v53  ;;  %v2465_v61 = vsel %vm1304_vm4, %v10932_v20, %v10957_v52  ;;  %10143 = vmatprep.subr.msk.bf16.mxu1 %vm10142_vm8, %v10141_v56  ;;  %2565 = vmatprep.mubr.f32.mxu0 %v14651_v0 }
 0x21f   : > { %v2460_v63 = vsel %vm1304_vm4, %v10961_v59, %v10951_v44  ;;  %v2461_v55 = vsel %vm1304_vm4, %v10962_v57, %v10952_v43  ;;  %2648 = vmatprep.mubr.f32.mxu1 %v14651_v0  ;;  %v2462_v6 = vsel %vm1304_vm4, %v10956_v53, %v10961_v59  ;;  %v2463_v9 = vsel %vm1304_vm4, %v10957_v52, %v10962_v57 }
 0x220   : > { %9795 = vmatmul.mubr.msk.f32.vlgmr.msra.gmra.mrb[8].mxu0 %vm1799_vm6, %v9793_v47  ;;  %v10137_v11 = vpack.c.bf16 %v2463_v9, %v2462_v6  ;;  %v10144_v12 = vpack.c.bf16 %v2461_v55, %v2460_v63  ;;  %v10139_v58 = vpack.c.bf16 %v2465_v61, %v2464_v60  ;;  %vm7554_vm4 = vcmp.lt.s32.totalorder %v11903_v40, 1020 }
 0x221   : > { %9798 = vmatmul.mubr.msk.f32.gmra.mrb[10].mxu1 %vm1799_vm6, %v9794_v62  ;;  %2571 = vmatprep.mubr.f32.mxu0 %v14651_v0  ;;  %vm13815_vm5 = vmpackc.low %vm7554_vm4, %vm7554_vm4 }
 0x222   : > { %10138 = vmatprep.subr.bf16.mxu0 %v10137_v11  ;;  %10145 = vmatpush1.bf16.msra.mxu1 %v10144_v12 }
 0x223   : > { %10140 = vmatpush1.bf16.msra.mxu0 %v10139_v58  ;;  %2796 = vmatprep.mubr.f32.mxu1 %v14651_v0 }
 0x224   : > { %9796 = vmatmul.mubr.msk.f32.gmra.mrb[10].mxu0 %vm1799_vm6, %v9794_v62  ;;  %9809 = vmatprep.subr.msk.mxu1 %vm625_vm0, %v11759_v4  ;;  %v2869_v4 = vld [vmem:[%s14635_s5] sm:$0xff] }
 0x225   : > { %9803 = vmatmul.mubr.msk.f32.vlgmr.msra.gmra.mrb[12].mxu1 %vm1799_vm6, %v9793_v47  ;;  %2719 = vmatprep.mubr.f32.mxu0 %v14651_v0 }
 0x226   : > { %2802 = vmatprep.mubr.f32.mxu1 %v14651_v0  ;;  %9810 = vmatpush1.msk.msra.mxu1 %vm625_vm0, %v11747_v1  ;;  %v2870_v1 = vld [vmem:[%s14635_s5 + $0x8] sm:$0xff] }
 0x227   : > { %9805 = vmatprep.subr.msk.mxu0 %vm625_vm0, %v11755_v3  ;;  %9817 = vmatprep.subr.msk.mxu1 %vm625_vm0, %v11778_v7 }
 0x228   : > { %9799 = vmatmul.mubr.msk.f32.vlgmr.msra.gmra.mrb[12].mxu0 %vm1799_vm6, %v9793_v47 }
 0x229   : > { %9804 = vmatmul.mubr.msk.f32.gmra.mrb[14].mxu1 %vm1799_vm6, %v9794_v62  ;;  %2725 = vmatprep.mubr.f32.mxu0 %v14651_v0 }
 0x22a   : > { %3030 = vmatprep.mubr.f32.mxu1 %v14651_v0  ;;  %9806 = vmatpush1.msk.msra.mxu0 %vm625_vm0, %v11749_v2 }
 0x22b   : > { %9813 = vmatprep.subr.msk.mxu0 %vm625_vm0, %v11799_v10 }
 0x22c   : > { %9800 = vmatmul.mubr.msk.f32.gmra.mrb[14].mxu0 %vm1799_vm6, %v9794_v62  ;;  %v2830_v17 = vpop.permute.xlu1 %2829 }
 0x22d   : > { %9811 = vmatmul.mubr.msk.f32.vlgmr.msra.gmra.mrb[16].mxu1 %vm618_vm1, %v2869_v4  ;;  %2953 = vmatprep.mubr.f32.mxu0 %v14651_v0  ;;  %v2835_v19 = vpop.permute.xlu0 %2834 }
 0x22e   : > { %3036 = vmatprep.mubr.f32.mxu1 %v14651_v0  ;;  %9818 = vmatpush1.msk.msra.mxu1 %vm625_vm0, %v11761_v5 }
 0x230   : > { %9807 = vmatmul.mubr.msk.f32.vlgmr.msra.gmra.mrb[16].mxu0 %vm618_vm1, %v2869_v4  ;;  %v12178_v31 = vpop.permute.xlu1 %2875 }
 0x231   : > { %9812 = vmatmul.mubr.msk.f32.gmra.mrb[18].mxu1 %vm618_vm1, %v2870_v1  ;;  %2959 = vmatprep.mubr.f32.mxu0 %v14651_v0  ;;  %v12188_v52 = vpop.permute.xlu0 %2880 }
 0x232   : > { %3184 = vmatprep.mubr.f32.mxu1 %v14651_v0  ;;  %9814 = vmatpush1.msk.msra.mxu0 %vm625_vm0, %v11781_v8  ;;  %vm6632_vm0 = vcmp.lt.s32.totalorder %v11847_v15, 4 }
 0x234   : > { %9808 = vmatmul.mubr.msk.f32.gmra.mrb[18].mxu0 %vm618_vm1, %v2870_v1 }
 0x235   : > { %9819 = vmatmul.mubr.msk.f32.vlgmr.msra.gmra.mrb[20].mxu1 %vm618_vm1, %v2869_v4  ;;  %3107 = vmatprep.mubr.f32.mxu0 %v14651_v0 }
 0x236   : > { %3190 = vmatprep.mubr.f32.mxu1 %v14651_v0 }
 0x238   : > { %9815 = vmatmul.mubr.msk.f32.vlgmr.msra.gmra.mrb[20].mxu0 %vm618_vm1, %v2869_v4 }
 0x239   : > { %9820 = vmatmul.mubr.msk.f32.gmra.mrb[22].mxu1 %vm618_vm1, %v2870_v1  ;;  %3113 = vmatprep.mubr.f32.mxu0 %v14651_v0 }
 0x23a   : > { %3476 = vmatprep.mubr.f32.mxu1 %v14651_v0 }
 0x23c   : > { %9816 = vmatmul.mubr.msk.f32.gmra.mrb[22].mxu0 %vm618_vm1, %v2870_v1  ;;  %vm6665_vm1 = vcmp.ge.s32.totalorder %v11847_v15, 4 }
 0x23d   : > { %3387 = vmatprep.mubr.f32.mxu0 %v14651_v0  ;;  %vm13654_vm2 = vmpackc.low %vm6665_vm1, %vm6665_vm1 }
 0x2f0   : > { %v2644_v2 = vpop.f32.mrb[8].mxu1 }
 0x2f1   : > { %v2646_v3 = vpop.f32.mrb[9].mxu1  ;;  %v2839_v20 = vadd.f32 %v2830_v17, %v2644_v2 }
 0x2f2   : > { %v2840_v21 = vadd.f32 %v2830_v17, %v2646_v3 }
 0x2f3   : > { %v2567_v5 = vpop.f32.mrb[8].mxu0  ;;  %v2855_v32 = vmax.f32 %v2839_v20, 0.0 }
 0x2f4   : > { %v2650_v7 = vpop.f32.mrb[10].mxu1  ;;  %v2569_v8 = vpop.f32.mrb[9].mxu0  ;;  %v2837_v23 = vadd.f32 %v2830_v17, %v2567_v5  ;;  %v2856_v33 = vmax.f32 %v2840_v21, 0.0 }
 0x2f5   : > { %v2652_v10 = vpop.f32.mrb[11].mxu1  ;;  %v2847_v24 = vadd.f32 %v2835_v19, %v2650_v7  ;;  %v2838_v25 = vadd.f32 %v2830_v17, %v2569_v8 }
 0x2f6   : > { %v2848_v28 = vadd.f32 %v2835_v19, %v2652_v10  ;;  %v2853_v36 = vmax.f32 %v2837_v23, 0.0 }
 0x2f7   : > { %v2573_v13 = vpop.f32.mrb[10].mxu0  ;;  %v2863_v37 = vmax.f32 %v2847_v24, 0.0  ;;  %v2854_v38 = vmax.f32 %v2838_v25, 0.0 }
 0x2f8   : > { %v2798_v14 = vpop.f32.mrb[12].mxu1  ;;  %v2575_v16 = vpop.f32.mrb[11].mxu0  ;;  %v2845_v30 = vadd.f32 %v2835_v19, %v2573_v13  ;;  %v2864_v43 = vmax.f32 %v2848_v28, 0.0 }
 0x2f9   : > { %v2800_v18 = vpop.f32.mrb[13].mxu1  ;;  %v2843_v34 = vadd.f32 %v2830_v17, %v2798_v14  ;;  %v2846_v39 = vadd.f32 %v2835_v19, %v2575_v16 }
 0x2fa   : > { %v2844_v44 = vadd.f32 %v2830_v17, %v2800_v18  ;;  %v2861_v48 = vmax.f32 %v2845_v30, 0.0 }
 0x2fb   : > { %v2721_v22 = vpop.f32.mrb[12].mxu0  ;;  %v2859_v53 = vmax.f32 %v2843_v34, 0.0  ;;  %v2862_v60 = vmax.f32 %v2846_v39, 0.0 }
 0x2fc   : > { %v2804_v26 = vpop.f32.mrb[14].mxu1  ;;  %v2723_v27 = vpop.f32.mrb[13].mxu0  ;;  %v12180_v45 = vadd.f32 %v2830_v17, %v2721_v22  ;;  %v2860_v9 = vmax.f32 %v2844_v44, 0.0 }
 0x2fd   : > { %v2806_v29 = vpop.f32.mrb[15].mxu1  ;;  %v12183_v49 = vadd.f32 %v2835_v19, %v2804_v26  ;;  %v12185_v50 = vadd.f32 %v2830_v17, %v2723_v27 }
 0x2fe   : > { %v12190_v54 = vadd.f32 %v2835_v19, %v2806_v29  ;;  %v2857_v11 = vmax.f32 %v12180_v45, 0.0 }
 0x2ff   : > { %v2727_v35 = vpop.f32.mrb[14].mxu0  ;;  %v2867_v1 = vmax.f32 %v12183_v49, 0.0  ;;  %v2858_v2 = vmax.f32 %v12185_v50, 0.0 }
 0x300   : > { %v3032_v41 = vpop.f32.mrb[16].mxu1  ;;  %v2729_v42 = vpop.f32.mrb[15].mxu0  ;;  %v12192_v56 = vadd.f32 %v2835_v19, %v2727_v35  ;;  %v2868_v7 = vmax.f32 %v12190_v54, 0.0 }
 0x301   : > { %v3033_v46 = vadd.f32 %v3032_v41, %v12178_v31  ;;  %v3034_v47 = vpop.f32.mrb[17].mxu1  ;;  %v12194_v61 = vadd.f32 %v2835_v19, %v2729_v42 }
 0x302   : > { %v3035_v51 = vadd.f32 %v3034_v47, %v12178_v31  ;;  %v2865_v8 = vmax.f32 %v12192_v56, 0.0 }
 0x303   : > { %v3199_v57 = vadd.f32 %v3033_v46, %v2855_v32  ;;  %v2955_v59 = vpop.f32.mrb[16].mxu0  ;;  %v2866_v17 = vmax.f32 %v12194_v61, 0.0 }
 0x304   : > { %v3200_v62 = vadd.f32 %v3035_v51, %v2856_v33  ;;  %v2956_v63 = vadd.f32 %v2955_v59, %v12178_v31  ;;  %v3038_v55 = vpop.f32.mrb[18].mxu1  ;;  %v2957_v6 = vpop.f32.mrb[17].mxu0 }
 0x305   : > { %v3039_v12 = vadd.f32 %v3038_v55, %v12188_v52  ;;  %v2958_v58 = vadd.f32 %v2957_v6, %v12178_v31  ;;  %v3040_v4 = vpop.f32.mrb[19].mxu1  ;;  %v3215_v16 = vmax.f32 %v3199_v57, 0.0 }
 0x306   : > { %v3197_v3 = vadd.f32 %v2956_v63, %v2853_v36  ;;  %v3041_v5 = vadd.f32 %v3040_v4, %v12188_v52  ;;  %v3216_v22 = vmax.f32 %v3200_v62, 0.0 }
 0x307   : > { %v3207_v10 = vadd.f32 %v3039_v12, %v2863_v37  ;;  %v3198_v13 = vadd.f32 %v2958_v58, %v2854_v38  ;;  %v2961_v14 = vpop.f32.mrb[18].mxu0  ;;  %v9821_v58 = vld [vmem:[%s14637_s7 + $0x20] sm:$0xff] }
 0x308   : > { %v3208_v18 = vadd.f32 %v3041_v5, %v2864_v43  ;;  %v2962_v19 = vadd.f32 %v2961_v14, %v12188_v52  ;;  %v3186_v20 = vpop.f32.mrb[20].mxu1  ;;  %v2963_v21 = vpop.f32.mrb[19].mxu0  ;;  %v3213_v27 = vmax.f32 %v3197_v3, 0.0 }
 0x309   : > { %v3223_v23 = vmax.f32 %v3207_v10, 0.0  ;;  %v3187_v24 = vadd.f32 %v3186_v20, %v12178_v31  ;;  %v2964_v25 = vadd.f32 %v2963_v21, %v12188_v52  ;;  %v3188_v26 = vpop.f32.mrb[21].mxu1  ;;  %v3214_v44 = vmax.f32 %v3198_v13, 0.0  ;;  %v9823_v20 = vld [vmem:[%s14637_s7 + $0x30] sm:$0xff]  ;;  %v9824_v21 = vld [vmem:[%s14637_s7 + $0x38] sm:$0xff] }
 0x30a   : > { %v3224_v28 = vmax.f32 %v3208_v18, 0.0  ;;  %v3205_v29 = vadd.f32 %v2962_v19, %v2861_v48  ;;  %v3189_v30 = vadd.f32 %v3188_v26, %v12178_v31 }
 0x30b   : > { %v3203_v32 = vadd.f32 %v3187_v24, %v2859_v53  ;;  %v3206_v33 = vadd.f32 %v2964_v25, %v2862_v60  ;;  %v3109_v34 = vpop.f32.mrb[20].mxu0  ;;  %v12210_v35 = vpack.i.bf16 %v3223_v23, %v3215_v16  ;;  %v12212_v36 = vpack.c.bf16 %v3223_v23, %v3215_v16  ;;  %v4526_v23 = vld [vmem:[%s14638_s8 + $0x8] sm:$0xff]  ;;  %v4527_v24 = vld [vmem:[%s14638_s8 + $0x10] sm:$0xff]  ;;  %v4528_v25 = vld [vmem:[%s14638_s8 + $0x18] sm:$0xff] }
 0x30c   : > { %v3221_v37 = vmax.f32 %v3205_v29, 0.0  ;;  %v3204_v38 = vadd.f32 %v3189_v30, %v2860_v9  ;;  %v3110_v39 = vadd.f32 %v3109_v34, %v12178_v31  ;;  %v3192_v41 = vpop.f32.mrb[22].mxu1  ;;  %v3111_v42 = vpop.f32.mrb[21].mxu0  ;;  %v12215_v43 = vpack.i.bf16 %v3224_v28, %v3216_v22 }
 0x30d   : > { %v3222_v45 = vmax.f32 %v3206_v33, 0.0  ;;  %v3193_v46 = vadd.f32 %v3192_v41, %v12188_v52  ;;  %v3194_v47 = vpop.f32.mrb[23].mxu1  ;;  %10964 = vrot.lane.b32.xlu1 %v12210_v35, %s11595_s18  ;;  %v3112_v48 = vadd.f32 %v3111_v42, %v12178_v31  ;;  %v3219_v49 = vmax.f32 %v3203_v32, 0.0 }
 0x30e   : > { %v3201_v50 = vadd.f32 %v3110_v39, %v2857_v11  ;;  %v3195_v51 = vadd.f32 %v3194_v47, %v12188_v52  ;;  %10969 = vrot.lane.b32.xlu0 %v12215_v43, %s11595_s18  ;;  %v12224_v53 = vpack.c.bf16 %v3224_v28, %v3216_v22  ;;  %v3220_v61 = vmax.f32 %v3204_v38, 0.0  ;;  %v4525_v22 = vld [vmem:[%s14638_s8] sm:$0xff] }
 0x30f   : > { %v3211_v54 = vadd.f32 %v3193_v46, %v2867_v1  ;;  %v3202_v56 = vadd.f32 %v3112_v48, %v2858_v2  ;;  %v3115_v57 = vpop.f32.mrb[22].mxu0  ;;  %v10973_v59 = vpack.i.bf16 %v3222_v45, %v3214_v44  ;;  %v12226_v60 = vpack.c.bf16 %v3222_v45, %v3214_v44 }
 0x310   : > { %v3212_v62 = vadd.f32 %v3195_v51, %v2868_v7  ;;  %10151 = vmatprep.subr.bf16.mxu1 %v12224_v53  ;;  %v3116_v31 = vadd.f32 %v3115_v57, %v12188_v52  ;;  %v3117_v63 = vpop.f32.mrb[23].mxu0  ;;  %v10978_v55 = vpack.i.bf16 %v3221_v37, %v3213_v27  ;;  %v3217_v6 = vmax.f32 %v3201_v50, 0.0 }
 0x311   : > { %v3227_v9 = vmax.f32 %v3211_v54, 0.0  ;;  %10153 = vmatpush1.bf16.msra.mxu1 %v12212_v36  ;;  %v3118_v11 = vadd.f32 %v3117_v63, %v12188_v52  ;;  %10974 = vrot.lane.b32.xlu1 %v10973_v59, %s11595_s18  ;;  %v12233_v12 = vpack.c.bf16 %v3221_v37, %v3213_v27  ;;  %v3218_v13 = vmax.f32 %v3202_v56, 0.0 }
 0x312   : > { %v3228_v4 = vmax.f32 %v3212_v62, 0.0  ;;  %v3209_v1 = vadd.f32 %v3116_v31, %v2865_v8  ;;  %10147 = vmatprep.subr.bf16.mxu0 %v12226_v60  ;;  %10979 = vrot.lane.b32.xlu0 %v10978_v55, %s11595_s18  ;;  %v9822_v8 = vld [vmem:[%s14637_s7 + $0x28] sm:$0xff] }
 0x313   : > { %v3210_v2 = vadd.f32 %v3118_v11, %v2866_v17  ;;  %10149 = vmatpush1.bf16.msra.mxu0 %v12233_v12  ;;  %v10983_v3 = vpack.i.bf16 %v3227_v9, %v3219_v49  ;;  %v12241_v5 = vpack.c.bf16 %v3227_v9, %v3219_v49 }
 0x314   : > { %v3225_v52 = vmax.f32 %v3209_v1, 0.0  ;;  %v12243_v7 = vpack.c.bf16 %v3228_v4, %v3220_v61  ;;  %v10988_v10 = vpack.i.bf16 %v3228_v4, %v3220_v61  ;;  %9829 = vmatmul.mubr.msk.f32.vlgmr.msra.gmra.mrb[24].mxu1 %vm1799_vm6, %v9821_v58  ;;  %v12337_v61 = vld [vmem:[%s14637_s7] sm:$0xff] }
 0x315   : > { %v3226_v14 = vmax.f32 %v3210_v2, 0.0  ;;  %10984 = vrot.lane.b32.xlu1 %v10983_v3, %s11595_s18  ;;  %3482 = vmatprep.mubr.f32.mxu1 %v14651_v0 }
 0x316   : > { %10159 = vmatprep.subr.bf16.mxu1 %v12243_v7  ;;  %10989 = vrot.lane.b32.xlu0 %v10988_v10, %s11595_s18  ;;  %v10998_v16 = vpack.i.bf16 %v3225_v52, %v3217_v6  ;;  %v12253_v17 = vpack.c.bf16 %v3225_v52, %v3217_v6 }
 0x317   : > { %10161 = vmatpush1.bf16.msra.mxu1 %v12241_v5  ;;  %v10993_v18 = vpack.i.bf16 %v3226_v14, %v3218_v13  ;;  %v12256_v19 = vpack.c.bf16 %v3226_v14, %v3218_v13  ;;  %9825 = vmatmul.mubr.msk.f32.vlgmr.msra.gmra.mrb[24].mxu0 %vm1799_vm6, %v9821_v58 }
 0x318   : > { %9830 = vmatmul.mubr.msk.f32.gmra.mrb[26].mxu1 %vm1799_vm6, %v9822_v8  ;;  %3393 = vmatprep.mubr.f32.mxu0 %v14651_v0 }
 0x319   : > { %10994 = vrot.lane.b32.xlu1 %v10993_v18, %s11595_s18  ;;  %10155 = vmatprep.subr.bf16.mxu0 %v12256_v19 }
 0x31a   : > { %10999 = vrot.lane.b32.xlu0 %v10998_v16, %s11595_s18  ;;  %10157 = vmatpush1.bf16.msra.mxu0 %v12253_v17 }
 0x31b   : > { %3488 = vmatprep.mubr.f32.mxu1 %v14651_v0  ;;  %9826 = vmatmul.mubr.msk.f32.gmra.mrb[26].mxu0 %vm1799_vm6, %v9822_v8 }
 0x31c   : > { %9831 = vmatmul.mubr.msk.f32.gmra.mrb[28].mxu1 %vm1799_vm6, %v9823_v20  ;;  %3399 = vmatprep.mubr.f32.mxu0 %v14651_v0 }
 0x31d   : > { %11004 = vrot.lane.b32.xlu1 %v12215_v43, %s11596_s26  ;;  %3494 = vmatprep.mubr.f32.mxu1 %v14651_v0 }
 0x31e   : > { %11009 = vrot.lane.b32.xlu0 %v10998_v16, %s11596_s26 }
 0x31f   : > { %9827 = vmatmul.mubr.msk.f32.gmra.mrb[28].mxu0 %vm1799_vm6, %v9823_v20 }
 0x320   : > { %9832 = vmatmul.mubr.msk.f32.gmra.mrb[30].mxu1 %vm1799_vm6, %v9824_v21  ;;  %3405 = vmatprep.mubr.f32.mxu0 %v14651_v0 }
 0x321   : > { %11014 = vrot.lane.b32.xlu1 %v12210_v35, %s11596_s26  ;;  %3654 = vmatprep.mubr.f32.mxu1 %v14651_v0 }
 0x322   : > { %11019 = vrot.lane.b32.xlu0 %v10973_v59, %s11596_s26 }
 0x323   : > { %9828 = vmatmul.mubr.msk.f32.gmra.mrb[30].mxu0 %vm1799_vm6, %v9824_v21 }
 0x324   : > { %9837 = vmatmul.mubr.msk.f32.vlgmr.msra.gmra.mrb[32].mxu1 %vm1799_vm6, %v9821_v58  ;;  %3565 = vmatprep.mubr.f32.mxu0 %v14651_v0 }
 0x325   : > { %11024 = vrot.lane.b32.xlu1 %v10978_v55, %s11596_s26  ;;  %3660 = vmatprep.mubr.f32.mxu1 %v14651_v0 }
 0x326   : > { %11029 = vrot.lane.b32.xlu0 %v10988_v10, %s11596_s26  ;;  %v12357_v10 = vld [vmem:[%s14637_s7 + $0x8] sm:$0xff] }
 0x327   : > { %9833 = vmatmul.mubr.msk.f32.vlgmr.msra.gmra.mrb[32].mxu0 %vm1799_vm6, %v9821_v58 }
 0x328   : > { %9838 = vmatmul.mubr.msk.f32.gmra.mrb[34].mxu1 %vm1799_vm6, %v9822_v8  ;;  %3571 = vmatprep.mubr.f32.mxu0 %v14651_v0 }
 0x329   : > { %11034 = vrot.lane.b32.xlu1 %v10983_v3, %s11596_s26  ;;  %3666 = vmatprep.mubr.f32.mxu1 %v14651_v0 }
 0x32a   : > { %11039 = vrot.lane.b32.xlu0 %v10993_v18, %s11596_s26 }
 0x32b   : > { %9834 = vmatmul.mubr.msk.f32.gmra.mrb[34].mxu0 %vm1799_vm6, %v9822_v8 }
 0x32c   : > { %9839 = vmatmul.mubr.msk.f32.gmra.mrb[36].mxu1 %vm1799_vm6, %v9823_v20  ;;  %3577 = vmatprep.mubr.f32.mxu0 %v14651_v0 }
 0x32d   : > { %4531 = vperm.xlu1 %10882, %v4525_v22   ;;  %3672 = vmatprep.mubr.f32.mxu1 %v14651_v0 }
 0x32e   : > { %4536 = vperm.xlu0 %10881, %v4526_v23  }
 0x32f   : > { %9835 = vmatmul.mubr.msk.f32.gmra.mrb[36].mxu0 %vm1799_vm6, %v9823_v20 }
 0x330   : > { %9840 = vmatmul.mubr.msk.f32.gmra.mrb[38].mxu1 %vm1799_vm6, %v9824_v21  ;;  %3583 = vmatprep.mubr.f32.mxu0 %v14651_v0 }
 0x331   : > { %4541 = vperm.xlu1 %10882, %v4527_v24   ;;  %3844 = vmatprep.mubr.f32.mxu1 %v14651_v0 }
 0x332   : > { %4546 = vperm.xlu0 %10881, %v4528_v25  }
 0x333   : > { %9836 = vmatmul.mubr.msk.f32.gmra.mrb[38].mxu0 %vm1799_vm6, %v9824_v21 }
 0x334   : > { %3755 = vmatprep.mubr.f32.mxu0 %v14651_v0 }
 0x37f   : > { %v10965_v26 = vpop.permute.xlu1 %10964 }
 0x380   : > { %v10967_v27 = vunpack.i.h.bf16 %v10965_v26  ;;  %v10966_v28 = vunpack.i.l.bf16 %v10965_v26  ;;  %v10970_v29 = vpop.permute.xlu0 %10969 }
 0x381   : > { %v10972_v30 = vunpack.i.h.bf16 %v10970_v29  ;;  %v10971_v32 = vunpack.i.l.bf16 %v10970_v29 }
 0x383   : > { %v10975_v33 = vpop.permute.xlu1 %10974  ;;  %v3270_v34 = vsel %vm3261_vm9, %v10966_v28, %v10971_v32  ;;  %v3271_v35 = vsel %vm3261_vm9, %v10967_v27, %v10972_v30 }
 0x384   : > { %v10977_v37 = vunpack.i.h.bf16 %v10975_v33  ;;  %v10976_v38 = vunpack.i.l.bf16 %v10975_v33  ;;  %v10980_v39 = vpop.permute.xlu0 %10979  ;;  %v10167_v41 = vpack.c.bf16 %v3271_v35, %v3270_v34 }
 0x385   : > { %v10982_v42 = vunpack.i.h.bf16 %v10980_v39  ;;  %v10981_v43 = vunpack.i.l.bf16 %v10980_v39 }
 0x386   : > { %v3273_v44 = vsel %vm3261_vm9, %v10977_v37, %v10967_v27  ;;  %v3272_v45 = vsel %vm3261_vm9, %v10976_v38, %v10966_v28  ;;  %10168 = vmatprep.subr.bf16.mxu1 %v10167_v41 }
 0x387   : > { %v10985_v46 = vpop.permute.xlu1 %10984  ;;  %v3274_v47 = vsel %vm3261_vm9, %v10981_v43, %v10976_v38  ;;  %v3275_v48 = vsel %vm3261_vm9, %v10982_v42, %v10977_v37  ;;  %v10169_v49 = vpack.c.bf16 %v3273_v44, %v3272_v45 }
 0x388   : > { %v10987_v50 = vunpack.i.h.bf16 %v10985_v46  ;;  %v10986_v51 = vunpack.i.l.bf16 %v10985_v46  ;;  %v10990_v54 = vpop.permute.xlu0 %10989  ;;  %v10162_v56 = vpack.c.bf16 %v3275_v48, %v3274_v47 }
 0x389   : > { %v10992_v57 = vunpack.i.h.bf16 %v10990_v54  ;;  %v10991_v59 = vunpack.i.l.bf16 %v10990_v54  ;;  %10170 = vmatpush1.bf16.msra.mxu1 %v10169_v49 }
 0x38a   : > { %10163 = vmatprep.subr.bf16.mxu0 %v10162_v56 }
 0x38b   : > { %v3276_v62 = vsel %vm3261_vm9, %v10991_v59, %v10981_v43  ;;  %v3277_v31 = vsel %vm3261_vm9, %v10992_v57, %v10982_v42  ;;  %v10995_v63 = vpop.permute.xlu1 %10994  ;;  %v3262_v6 = vsel %vm3261_vm9, %v10986_v51, %v10991_v59  ;;  %v3263_v9 = vsel %vm3261_vm9, %v10987_v50, %v10992_v57  ;;  %v12405_v43 = vld [vmem:[%s14637_s7 + $0x18] sm:$0xff] }
 0x38c   : > { %v10164_v11 = vpack.c.bf16 %v3277_v31, %v3276_v62  ;;  %v11000_v58 = vpop.permute.xlu0 %10999  ;;  %v10997_v4 = vunpack.i.h.bf16 %v10995_v63  ;;  %v10996_v1 = vunpack.i.l.bf16 %v10995_v63  ;;  %9847 = vmatmul.mubr.msk.f32.vlgmr.msra.gmra.mrb[24].mxu1 %vm1799_vm6, %v12337_v61  ;;  %v10175_v2 = vpack.c.bf16 %v3263_v9, %v3262_v6 }
 0x38d   : > { %v11002_v3 = vunpack.i.h.bf16 %v11000_v58  ;;  %v11001_v52 = vunpack.i.l.bf16 %v11000_v58  ;;  %3850 = vmatprep.mubr.f32.mxu1 %v14651_v0 }
 0x38e   : > { %v3265_v13 = vsel %vm3261_vm9, %v10997_v4, %v10987_v50  ;;  %v3264_v14 = vsel %vm3261_vm9, %v10996_v1, %v10986_v51  ;;  %10166 = vmatpush1.bf16.msk.msra.mxu0 %vm12343_vm11, %v10164_v11  ;;  %10176 = vmatprep.subr.bf16.mxu1 %v10175_v2 }
 0x38f   : > { %v3269_v8 = vsel %vm3261_vm9, %v10972_v30, %v11002_v3  ;;  %v3268_v16 = vsel %vm3261_vm9, %v10971_v32, %v11001_v52  ;;  %v11005_v18 = vpop.permute.xlu1 %11004  ;;  %v3266_v20 = vsel %vm3261_vm9, %v11001_v52, %v10996_v1  ;;  %v3267_v21 = vsel %vm3261_vm9, %v11002_v3, %v10997_v4  ;;  %v12386_v30 = vld [vmem:[%s14637_s7 + $0x10] sm:$0xff] }
 0x390   : > { %v12374_v22 = vpop.permute.xlu0 %11009  ;;  %v11007_v23 = vunpack.i.h.bf16 %v11005_v18  ;;  %v11006_v24 = vunpack.i.l.bf16 %v11005_v18  ;;  %9848 = vmatmul.mubr.msk.f32.gmra.mrb[26].mxu1 %vm1799_vm6, %v12357_v10  ;;  %v10171_v25 = vpack.c.bf16 %v3267_v21, %v3266_v20  ;;  %v10177_v26 = vpack.c.bf16 %v3265_v13, %v3264_v14 }
 0x391   : > { %v11012_v27 = vunpack.i.h.bf16 %v12374_v22  ;;  %v11011_v28 = vunpack.i.l.bf16 %v12374_v22  ;;  %9843 = vmatmul.mubr.msk.f32.vlgmr.msra.gmra.mrb[24].mxu0 %vm1799_vm6, %v12337_v61  ;;  %v10173_v29 = vpack.c.bf16 %v3269_v8, %v3268_v16  ;;  %3856 = vmatprep.mubr.f32.mxu1 %v14651_v0  ;;  %v9861_v22 = vld [vmem:[%s14637_s7 + $0x50] sm:$0xff] }
 0x392   : > { %10172 = vmatprep.subr.bf16.mxu0 %v10171_v25  ;;  %10178 = vmatpush1.bf16.msra.mxu1 %v10177_v26  ;;  %v9862_v26 = vld [vmem:[%s14637_s7 + $0x58] sm:$0xff] }
 0x393   : > { %10174 = vmatpush1.bf16.msra.mxu0 %v10173_v29  ;;  %v11015_v32 = vpop.permute.xlu1 %11014  ;;  %3761 = vmatprep.mubr.f32.mxu0 %v14651_v0  ;;  %v4086_v33 = vsel %vm4079_vm12, %v11006_v24, %v11011_v28  ;;  %v4087_v34 = vsel %vm4079_vm12, %v11007_v23, %v11012_v27 }
 0x394   : > { %v11020_v35 = vpop.permute.xlu0 %11019  ;;  %v11017_v37 = vunpack.i.h.bf16 %v11015_v32  ;;  %v11016_v38 = vunpack.i.l.bf16 %v11015_v32  ;;  %9849 = vmatmul.mubr.msk.f32.gmra.mrb[28].mxu1 %vm1799_vm6, %v12386_v30  ;;  %v10183_v39 = vpack.c.bf16 %v4087_v34, %v4086_v33 }
 0x395   : > { %v11022_v41 = vunpack.i.h.bf16 %v11020_v35  ;;  %v11021_v42 = vunpack.i.l.bf16 %v11020_v35  ;;  %9844 = vmatmul.mubr.msk.f32.gmra.mrb[26].mxu0 %vm1799_vm6, %v12357_v10  ;;  %3862 = vmatprep.mubr.f32.mxu1 %v14651_v0 }
 0x396   : > { %10184 = vmatprep.subr.bf16.mxu1 %v10183_v39  ;;  %3767 = vmatprep.mubr.f32.mxu0 %v14651_v0  ;;  %v4088_v44 = vsel %vm4079_vm12, %v11016_v38, %v11006_v24  ;;  %v4089_v48 = vsel %vm4079_vm12, %v11017_v37, %v11007_v23  ;;  %v9860_v24 = vld [vmem:[%s14637_s7 + $0x48] sm:$0xff] }
 0x397   : > { %v11025_v45 = vpop.permute.xlu1 %11024  ;;  %v4090_v46 = vsel %vm4079_vm12, %v11021_v42, %v11016_v38  ;;  %v4091_v47 = vsel %vm4079_vm12, %v11022_v41, %v11017_v37  ;;  %v10185_v63 = vpack.c.bf16 %v4089_v48, %v4088_v44 }
 0x398   : > { %v11030_v49 = vpop.permute.xlu0 %11029  ;;  %v11027_v50 = vunpack.i.h.bf16 %v11025_v45  ;;  %v11026_v51 = vunpack.i.l.bf16 %v11025_v45  ;;  %9850 = vmatmul.mubr.msk.f32.gmra.mrb[30].mxu1 %vm1799_vm6, %v12405_v43  ;;  %v10179_v54 = vpack.c.bf16 %v4091_v47, %v4090_v46 }
 0x399   : > { %v11032_v56 = vunpack.i.h.bf16 %v11030_v49  ;;  %v11031_v57 = vunpack.i.l.bf16 %v11030_v49  ;;  %9845 = vmatmul.mubr.msk.f32.gmra.mrb[28].mxu0 %vm1799_vm6, %v12386_v30  ;;  %4022 = vmatprep.mubr.f32.mxu1 %v14651_v0 }
 0x39a   : > { %10180 = vmatprep.subr.bf16.mxu0 %v10179_v54  ;;  %3773 = vmatprep.mubr.f32.mxu0 %v14651_v0  ;;  %v4093_v1 = vsel %vm4079_vm12, %v11027_v50, %v11022_v41  ;;  %v4092_v2 = vsel %vm4079_vm12, %v11026_v51, %v11021_v42 }
 0x39b   : > { %v4095_v59 = vsel %vm4079_vm12, %v11032_v56, %v11027_v50  ;;  %v4094_v62 = vsel %vm4079_vm12, %v11031_v57, %v11026_v51  ;;  %v11035_v31 = vpop.permute.xlu1 %11034  ;;  %v10181_v8 = vpack.c.bf16 %v4093_v1, %v4092_v2 }
 0x39c   : > { %v11040_v9 = vpop.permute.xlu0 %11039  ;;  %v11037_v11 = vunpack.i.h.bf16 %v11035_v31  ;;  %v11036_v58 = vunpack.i.l.bf16 %v11035_v31  ;;  %9855 = vmatmul.mubr.msk.f32.vlgmr.msra.gmra.mrb[32].mxu1 %vm1799_vm6, %v12337_v61  ;;  %v10191_v4 = vpack.c.bf16 %v4095_v59, %v4094_v62 }
 0x39d   : > { %v11042_v3 = vunpack.i.h.bf16 %v11040_v9  ;;  %v11041_v52 = vunpack.i.l.bf16 %v11040_v9  ;;  %9846 = vmatmul.mubr.msk.f32.gmra.mrb[30].mxu0 %vm1799_vm6, %v12405_v43  ;;  %10186 = vmatpush1.bf16.msra.mxu1 %v10185_v63 }
 0x39e   : > { %10193 = vmatprep.subr.msk.bf16.mxu1 %vm12430_vm14, %v10191_v4  ;;  %3933 = vmatprep.mubr.f32.mxu0 %v14651_v0  ;;  %v4081_v18 = vsel %vm4079_vm12, %v11037_v11, %v11032_v56 }
 0x39f   : > { %4028 = vmatprep.mubr.f32.mxu1 %v14651_v0  ;;  %v4082_v13 = vsel %vm4079_vm12, %v11041_v52, %v11036_v58  ;;  %v4083_v14 = vsel %vm4079_vm12, %v11042_v3, %v11037_v11  ;;  %v4085_v21 = vsel %vm4079_vm12, %v11012_v27, %v11042_v3  ;;  %v4084_v23 = vsel %vm4079_vm12, %v11011_v28, %v11041_v52 }
 0x3a0   : > { %9856 = vmatmul.mubr.msk.f32.gmra.mrb[34].mxu1 %vm1799_vm6, %v12357_v10  ;;  %v10187_v16 = vpack.c.bf16 %v4083_v14, %v4082_v13  ;;  %v10189_v25 = vpack.c.bf16 %v4085_v21, %v4084_v23 }
 0x3a1   : > { %9851 = vmatmul.mubr.msk.f32.vlgmr.msra.gmra.mrb[32].mxu0 %vm1799_vm6, %v12337_v61  ;;  %4034 = vmatprep.mubr.f32.mxu1 %v14651_v0  ;;  %v4080_v61 = vsel %vm4079_vm12, %v11036_v58, %v11031_v57 }
 0x3a2   : > { %10182 = vmatpush1.bf16.msra.mxu0 %v10181_v8  ;;  %3939 = vmatprep.mubr.f32.mxu0 %v14651_v0  ;;  %v10194_v20 = vpack.c.bf16 %v4081_v18, %v4080_v61 }
 0x3a3   : > { %10188 = vmatprep.subr.bf16.mxu0 %v10187_v16 }
 0x3a4   : > { %9857 = vmatmul.mubr.msk.f32.gmra.mrb[36].mxu1 %vm1799_vm6, %v12386_v30 }
 0x3a5   : > { %9852 = vmatmul.mubr.msk.f32.gmra.mrb[34].mxu0 %vm1799_vm6, %v12357_v10  ;;  %4040 = vmatprep.mubr.f32.mxu1 %v14651_v0  ;;  %v9859_v10 = vld [vmem:[%s14637_s7 + $0x40] sm:$0xff] }
 0x3a6   : > { %3945 = vmatprep.mubr.f32.mxu0 %v14651_v0 }
 0x3a8   : > { %9858 = vmatmul.mubr.msk.f32.gmra.mrb[38].mxu1 %vm1799_vm6, %v12405_v43 }
 0x3a9   : > { %9853 = vmatmul.mubr.msk.f32.gmra.mrb[36].mxu0 %vm1799_vm6, %v12386_v30  ;;  %4290 = vmatprep.mubr.f32.mxu1 %v14651_v0 }
 0x3aa   : > { %3951 = vmatprep.mubr.f32.mxu0 %v14651_v0 }
 0x3ac   : > { %9867 = vmatmul.mubr.msk.f32.vlgmr.msra.gmra.mrb[24].mxu1 %vm1799_vm6, %v9859_v10  ;;  %v12527_v29 = vpop.permute.xlu1 %4531 }
 0x3ad   : > { %9854 = vmatmul.mubr.msk.f32.gmra.mrb[38].mxu0 %vm1799_vm6, %v12405_v43  ;;  %10195 = vmatpush1.bf16.msra.mxu1 %v10194_v20  ;;  %v12530_v32 = vpop.permute.xlu0 %4536 }
 0x3ae   : > { %4201 = vmatprep.mubr.f32.mxu0 %v14651_v0  ;;  %4296 = vmatprep.mubr.f32.mxu1 %v14651_v0 }
 0x3b0   : > { %9868 = vmatmul.mubr.msk.f32.gmra.mrb[26].mxu1 %vm1799_vm6, %v9860_v24  ;;  %v12535_v44 = vpop.permute.xlu1 %4541 }
 0x3b1   : > { %9863 = vmatmul.mubr.msk.f32.vlgmr.msra.gmra.mrb[24].mxu0 %vm1799_vm6, %v9859_v10  ;;  %4302 = vmatprep.mubr.f32.mxu1 %v14651_v0  ;;  %v12549_v58 = vpop.permute.xlu0 %4546 }
 0x3b2   : > { %10190 = vmatpush1.bf16.msra.mxu0 %v10189_v25  ;;  %4207 = vmatprep.mubr.f32.mxu0 %v14651_v0 }
 0x3b4   : > { %9869 = vmatmul.mubr.msk.f32.gmra.mrb[28].mxu1 %vm1799_vm6, %v9861_v22 }
 0x3b5   : > { %9864 = vmatmul.mubr.msk.f32.gmra.mrb[26].mxu0 %vm1799_vm6, %v9860_v24  ;;  %4308 = vmatprep.mubr.f32.mxu1 %v14651_v0 }
 0x3b6   : > { %4213 = vmatprep.mubr.f32.mxu0 %v14651_v0 }
 0x3b8   : > { %9870 = vmatmul.mubr.msk.f32.gmra.mrb[30].mxu1 %vm1799_vm6, %v9862_v26 }
 0x3b9   : > { %9865 = vmatmul.mubr.msk.f32.gmra.mrb[28].mxu0 %vm1799_vm6, %v9861_v22  ;;  %4468 = vmatprep.mubr.f32.mxu1 %v14651_v0 }
 0x3ba   : > { %4219 = vmatprep.mubr.f32.mxu0 %v14651_v0 }
 0x3bc   : > { %9877 = vmatmul.mubr.msk.f32.vlgmr.msra.gmra.mrb[32].mxu1 %vm1799_vm6, %v9859_v10 }
 0x3bd   : > { %9866 = vmatmul.mubr.msk.f32.gmra.mrb[30].mxu0 %vm1799_vm6, %v9862_v26  ;;  %4474 = vmatprep.mubr.f32.mxu1 %v14651_v0 }
 0x3be   : > { %4379 = vmatprep.mubr.f32.mxu0 %v14651_v0 }
 0x3c0   : > { %9878 = vmatmul.mubr.msk.f32.gmra.mrb[34].mxu1 %vm1799_vm6, %v9860_v24 }
 0x3c1   : > { %9871 = vmatmul.mubr.msk.f32.vlgmr.msra.gmra.mrb[32].mxu0 %vm1799_vm6, %v9859_v10  ;;  %4480 = vmatprep.mubr.f32.mxu1 %v14651_v0 }
 0x3c2   : > { %4385 = vmatprep.mubr.f32.mxu0 %v14651_v0 }
 0x3c4   : > { %9879 = vmatmul.mubr.msk.f32.gmra.mrb[36].mxu1 %vm1799_vm6, %v9861_v22 }
 0x3c5   : > { %9872 = vmatmul.mubr.msk.f32.gmra.mrb[34].mxu0 %vm1799_vm6, %v9860_v24  ;;  %4486 = vmatprep.mubr.f32.mxu1 %v14651_v0 }
 0x3c6   : > { %4391 = vmatprep.mubr.f32.mxu0 %v14651_v0 }
 0x3c8   : > { %9880 = vmatmul.mubr.msk.f32.gmra.mrb[38].mxu1 %vm1799_vm6, %v9862_v26 }
 0x3c9   : > { %9873 = vmatmul.mubr.msk.f32.gmra.mrb[36].mxu0 %vm1799_vm6, %v9861_v22  ;;  %4916 = vmatprep.mubr.f32.mxu1 %v14651_v0 }
 0x3ca   : > { %4397 = vmatprep.mubr.f32.mxu0 %v14651_v0 }
 0x3cd   : > { %9874 = vmatmul.mubr.msk.f32.gmra.mrb[38].mxu0 %vm1799_vm6, %v9862_v26 }
 0x3ce   : > { %4827 = vmatprep.mubr.f32.mxu0 %v14651_v0 }
 0x47f   : > { %v4292_v27 = vpop.f32.mrb[24].mxu1 }
 0x480   : > { %v4294_v28 = vpop.f32.mrb[25].mxu1  ;;  %v4551_v30 = vadd.f32 %v12527_v29, %v4292_v27 }
 0x481   : > { %v4552_v33 = vadd.f32 %v12527_v29, %v4294_v28 }
 0x482   : > { %v4583_v42 = vmax.f32 %v4551_v30, 0.0 }
 0x483   : > { %v4298_v34 = vpop.f32.mrb[26].mxu1  ;;  %v4584_v45 = vmax.f32 %v4552_v33, 0.0 }
 0x484   : > { %v4203_v35 = vpop.f32.mrb[24].mxu0  ;;  %v4559_v37 = vadd.f32 %v12530_v32, %v4298_v34  ;;  %v4300_v38 = vpop.f32.mrb[27].mxu1 }
 0x485   : > { %v4205_v39 = vpop.f32.mrb[25].mxu0  ;;  %v4560_v41 = vadd.f32 %v12530_v32, %v4300_v38  ;;  %v4549_v46 = vadd.f32 %v12527_v29, %v4203_v35 }
 0x486   : > { %v4591_v43 = vmax.f32 %v4559_v37, 0.0  ;;  %v4550_v50 = vadd.f32 %v12527_v29, %v4205_v39 }
 0x487   : > { %v4592_v47 = vmax.f32 %v4560_v41, 0.0  ;;  %v4304_v48 = vpop.f32.mrb[28].mxu1  ;;  %v4581_v4 = vmax.f32 %v4549_v46, 0.0 }
 0x488   : > { %v10206_v49 = vpack.c.bf16 %v4591_v43, %v4583_v42  ;;  %v4209_v51 = vpop.f32.mrb[26].mxu0  ;;  %v4567_v54 = vadd.f32 %v12535_v44, %v4304_v48  ;;  %v4306_v56 = vpop.f32.mrb[29].mxu1  ;;  %v12540_v57 = vpack.i.bf16 %v4591_v43, %v4583_v42  ;;  %v4582_v3 = vmax.f32 %v4550_v50, 0.0 }
 0x489   : > { %v4557_v59 = vadd.f32 %v12530_v32, %v4209_v51  ;;  %v4211_v62 = vpop.f32.mrb[27].mxu0  ;;  %v4568_v31 = vadd.f32 %v12535_v44, %v4306_v56  ;;  %v12544_v63 = vpack.i.bf16 %v4592_v47, %v4584_v45  ;;  %v10204_v9 = vpack.c.bf16 %v4592_v47, %v4584_v45 }
 0x48a   : > { %v4558_v11 = vadd.f32 %v12530_v32, %v4211_v62  ;;  %11044 = vrot.lane.b32.xlu1 %v12540_v57, %s11595_s18  ;;  %v4599_v52 = vmax.f32 %v4567_v54, 0.0  ;;  %v12581_v62 = vld [vmem:[%s14639_s9 + $0x20] sm:$0xff] }
 0x48b   : > { %v4589_v1 = vmax.f32 %v4557_v59, 0.0  ;;  %11049 = vrot.lane.b32.xlu0 %v12544_v63, %s11595_s18  ;;  %v4310_v2 = vpop.f32.mrb[30].mxu1  ;;  %10205 = vmatprep.subr.bf16.mxu1 %v10204_v9  ;;  %v4600_v61 = vmax.f32 %v4568_v31, 0.0 }
 0x48c   : > { %v4590_v13 = vmax.f32 %v4558_v11, 0.0  ;;  %v4215_v14 = vpop.f32.mrb[28].mxu0  ;;  %v4575_v8 = vadd.f32 %v12549_v58, %v4310_v2  ;;  %v4312_v16 = vpop.f32.mrb[31].mxu1  ;;  %10207 = vmatpush1.bf16.msra.mxu1 %v10206_v49 }
 0x48d   : > { %v10198_v18 = vpack.c.bf16 %v4589_v1, %v4581_v4  ;;  %v4217_v10 = vpop.f32.mrb[29].mxu0  ;;  %v4576_v20 = vadd.f32 %v12549_v58, %v4312_v16  ;;  %v12555_v21 = vpack.i.bf16 %v4589_v1, %v4581_v4  ;;  %v4565_v23 = vadd.f32 %v12535_v44, %v4215_v14 }
 0x48e   : > { %v4607_v24 = vmax.f32 %v4575_v8, 0.0  ;;  %v12558_v25 = vpack.i.bf16 %v4590_v13, %v4582_v3  ;;  %v10196_v22 = vpack.c.bf16 %v4590_v13, %v4582_v3  ;;  %v4566_v26 = vadd.f32 %v12535_v44, %v4217_v10 }
 0x48f   : > { %v4608_v27 = vmax.f32 %v4576_v20, 0.0  ;;  %11054 = vrot.lane.b32.xlu1 %v12555_v21, %s11595_s18  ;;  %v4470_v28 = vpop.f32.mrb[32].mxu1  ;;  %v4597_v46 = vmax.f32 %v4565_v23, 0.0 }
 0x490   : > { %v10210_v30 = vpack.c.bf16 %v4607_v24, %v4599_v52  ;;  %v4555_v33 = vadd.f32 %v12527_v29, %v4470_v28  ;;  %11059 = vrot.lane.b32.xlu0 %v12558_v25, %s11595_s18  ;;  %v4221_v34 = vpop.f32.mrb[30].mxu0  ;;  %10197 = vmatprep.subr.bf16.mxu0 %v10196_v22  ;;  %v4472_v35 = vpop.f32.mrb[33].mxu1  ;;  %v12566_v37 = vpack.i.bf16 %v4607_v24, %v4599_v52  ;;  %v4598_v49 = vmax.f32 %v4566_v26, 0.0 }
 0x491   : > { %v4573_v38 = vadd.f32 %v12549_v58, %v4221_v34  ;;  %v4223_v39 = vpop.f32.mrb[31].mxu0  ;;  %v4556_v41 = vadd.f32 %v12527_v29, %v4472_v35  ;;  %10199 = vmatpush1.bf16.msra.mxu0 %v10198_v18  ;;  %v10208_v42 = vpack.c.bf16 %v4608_v27, %v4600_v61  ;;  %v12570_v43 = vpack.i.bf16 %v4608_v27, %v4600_v61 }
 0x492   : > { %v4574_v45 = vadd.f32 %v12549_v58, %v4223_v39  ;;  %v4587_v50 = vmax.f32 %v4555_v33, 0.0 }
 0x493   : > { %v4605_v47 = vmax.f32 %v4573_v38, 0.0  ;;  %v4476_v48 = vpop.f32.mrb[34].mxu1  ;;  %10209 = vmatprep.subr.bf16.mxu1 %v10208_v42  ;;  %11069 = vrot.lane.b32.xlu1 %v12570_v43, %s11595_s18  ;;  %v4588_v9 = vmax.f32 %v4556_v41, 0.0 }
 0x494   : > { %v4606_v51 = vmax.f32 %v4574_v45, 0.0  ;;  %v4563_v54 = vadd.f32 %v12530_v32, %v4476_v48  ;;  %11064 = vrot.lane.b32.xlu0 %v12566_v37, %s11595_s18  ;;  %v4381_v56 = vpop.f32.mrb[32].mxu0  ;;  %v4478_v59 = vpop.f32.mrb[35].mxu1  ;;  %10211 = vmatpush1.bf16.msra.mxu1 %v10210_v30  ;;  %v12606_v30 = vld [vmem:[%s14639_s9 + $0x28] sm:$0xff] }
 0x495   : > { %v10202_v31 = vpack.c.bf16 %v4605_v47, %v4597_v46  ;;  %v4383_v11 = vpop.f32.mrb[33].mxu0  ;;  %v4564_v4 = vadd.f32 %v12530_v32, %v4478_v59  ;;  %v12584_v1 = vpack.i.bf16 %v4605_v47, %v4597_v46  ;;  %v4553_v3 = vadd.f32 %v12527_v29, %v4381_v56 }
 0x496   : > { %v4595_v2 = vmax.f32 %v4563_v54, 0.0  ;;  %v10200_v52 = vpack.c.bf16 %v4606_v51, %v4598_v49  ;;  %v12587_v13 = vpack.i.bf16 %v4606_v51, %v4598_v49  ;;  %v4554_v14 = vadd.f32 %v12527_v29, %v4383_v11  ;;  %v9883_v11 = vld [vmem:[%s14639_s9 + $0x30] sm:$0xff] }
 0x497   : > { %v4596_v8 = vmax.f32 %v4564_v4, 0.0  ;;  %v4482_v16 = vpop.f32.mrb[36].mxu1  ;;  %9889 = vmatmul.mubr.msk.f32.vlgmr.msra.gmra.mrb[40].mxu1 %vm4750_vm15, %v12581_v62  ;;  %v4585_v33 = vmax.f32 %v4553_v3, 0.0 }
 0x498   : > { %v10222_v18 = vpack.c.bf16 %v4595_v2, %v4587_v50  ;;  %v4571_v61 = vadd.f32 %v12535_v44, %v4482_v16  ;;  %11074 = vrot.lane.b32.xlu0 %v12584_v1, %s11595_s18  ;;  %v4387_v10 = vpop.f32.mrb[34].mxu0  ;;  %10201 = vmatprep.subr.bf16.mxu0 %v10200_v52  ;;  %v4484_v20 = vpop.f32.mrb[37].mxu1  ;;  %v12595_v23 = vpack.i.bf16 %v4595_v2, %v4587_v50  ;;  %v4586_v38 = vmax.f32 %v4554_v14, 0.0 }
 0x499   : > { %v4561_v24 = vadd.f32 %v12530_v32, %v4387_v10  ;;  %v4389_v22 = vpop.f32.mrb[35].mxu0  ;;  %v4572_v29 = vadd.f32 %v12535_v44, %v4484_v20  ;;  %10203 = vmatpush1.bf16.msra.mxu0 %v10202_v31  ;;  %v10220_v26 = vpack.c.bf16 %v4596_v8, %v4588_v9  ;;  %v12599_v27 = vpack.i.bf16 %v4596_v8, %v4588_v9  ;;  %v9884_v10 = vld [vmem:[%s14639_s9 + $0x38] sm:$0xff] }
 0x49a   : > { %v4562_v28 = vadd.f32 %v12530_v32, %v4389_v22  ;;  %4922 = vmatprep.mubr.f32.mxu1 %v14651_v0  ;;  %v4603_v39 = vmax.f32 %v4571_v61, 0.0 }
 0x49b   : > { %v4593_v34 = vmax.f32 %v4561_v24, 0.0  ;;  %v4488_v35 = vpop.f32.mrb[38].mxu1  ;;  %10221 = vmatprep.subr.bf16.mxu1 %v10220_v26  ;;  %11079 = vrot.lane.b32.xlu1 %v12599_v27, %s11595_s18  ;;  %v4604_v47 = vmax.f32 %v4572_v29, 0.0 }
 0x49c   : > { %v4594_v41 = vmax.f32 %v4562_v28, 0.0  ;;  %v4579_v42 = vadd.f32 %v12549_v58, %v4488_v35  ;;  %v4393_v32 = vpop.f32.mrb[36].mxu0  ;;  %v4490_v45 = vpop.f32.mrb[39].mxu1  ;;  %10223 = vmatpush1.bf16.msra.mxu1 %v10222_v18  ;;  %9885 = vmatmul.mubr.msk.f32.vlgmr.msra.gmra.mrb[40].mxu0 %vm4750_vm15, %v12581_v62 }
 0x49d   : > { %v10214_v46 = vpack.c.bf16 %v4593_v34, %v4585_v33  ;;  %v4395_v48 = vpop.f32.mrb[37].mxu0  ;;  %v4580_v49 = vadd.f32 %v12549_v58, %v4490_v45  ;;  %v11098_v50 = vpack.i.bf16 %v4593_v34, %v4585_v33  ;;  %9890 = vmatmul.mubr.msk.f32.gmra.mrb[42].mxu1 %vm4750_vm15, %v12606_v30  ;;  %v4569_v54 = vadd.f32 %v12535_v44, %v4393_v32 }
 0x49e   : > { %v4611_v51 = vmax.f32 %v4579_v42, 0.0  ;;  %v10212_v56 = vpack.c.bf16 %v4594_v41, %v4586_v38  ;;  %v12617_v59 = vpack.i.bf16 %v4594_v41, %v4586_v38  ;;  %4928 = vmatprep.mubr.f32.mxu1 %v14651_v0  ;;  %4833 = vmatprep.mubr.f32.mxu0 %v14651_v0  ;;  %v4570_v31 = vadd.f32 %v12535_v44, %v4395_v48 }
 0x49f   : > { %v4612_v9 = vmax.f32 %v4580_v49, 0.0  ;;  %11084 = vrot.lane.b32.xlu1 %v12587_v13, %s11595_s18  ;;  %v4601_v18 = vmax.f32 %v4569_v54, 0.0 }
 0x4a0   : > { %v10226_v4 = vpack.c.bf16 %v4611_v51, %v4603_v39  ;;  %v4399_v2 = vpop.f32.mrb[38].mxu0  ;;  %10213 = vmatprep.subr.bf16.mxu0 %v10212_v56  ;;  %v12627_v3 = vpack.i.bf16 %v4611_v51, %v4603_v39  ;;  %9886 = vmatmul.mubr.msk.f32.gmra.mrb[42].mxu0 %vm4750_vm15, %v12606_v30  ;;  %v4602_v20 = vmax.f32 %v4570_v31, 0.0 }
 0x4a1   : > { %v4577_v52 = vadd.f32 %v12549_v58, %v4399_v2  ;;  %v4401_v14 = vpop.f32.mrb[39].mxu0  ;;  %10215 = vmatpush1.bf16.msra.mxu0 %v10214_v46  ;;  %v10224_v44 = vpack.c.bf16 %v4612_v9, %v4604_v47  ;;  %v11093_v8 = vpack.i.bf16 %v4612_v9, %v4604_v47  ;;  %9891 = vmatmul.mubr.msk.f32.gmra.mrb[44].mxu1 %vm4750_vm15, %v9883_v11 }
 0x4a2   : > { %v4578_v16 = vadd.f32 %v12549_v58, %v4401_v14  ;;  %4839 = vmatprep.mubr.f32.mxu0 %v14651_v0  ;;  %4934 = vmatprep.mubr.f32.mxu1 %v14651_v0 }
 0x4a3   : > { %v4609_v61 = vmax.f32 %v4577_v52, 0.0  ;;  %10225 = vmatprep.subr.bf16.mxu1 %v10224_v44  ;;  %11094 = vrot.lane.b32.xlu0 %v11093_v8, %s11595_s18 }
 0x4a4   : > { %v4610_v24 = vmax.f32 %v4578_v16, 0.0  ;;  %11089 = vrot.lane.b32.xlu1 %v12595_v23, %s11595_s18  ;;  %10227 = vmatpush1.bf16.msra.mxu1 %v10226_v4 }
 0x4a5   : > { %v10218_v58 = vpack.c.bf16 %v4609_v61, %v4601_v18  ;;  %v11118_v22 = vpack.i.bf16 %v4609_v61, %v4601_v18  ;;  %9887 = vmatmul.mubr.msk.f32.gmra.mrb[44].mxu0 %vm4750_vm15, %v9883_v11  ;;  %9892 = vmatmul.mubr.msk.f32.gmra.mrb[46].mxu1 %vm4750_vm15, %v9884_v10 }
 0x4a6   : > { %v10216_v29 = vpack.c.bf16 %v4610_v24, %v4602_v20  ;;  %v11123_v26 = vpack.i.bf16 %v4610_v24, %v4602_v20  ;;  %4845 = vmatprep.mubr.f32.mxu0 %v14651_v0  ;;  %5094 = vmatprep.mubr.f32.mxu1 %v14651_v0 }
 0x4a7   : > { %11099 = vrot.lane.b32.xlu0 %v11098_v50, %s11595_s18 }
 0x4a8   : > { %11104 = vrot.lane.b32.xlu1 %v12617_v59, %s11595_s18  ;;  %10217 = vmatprep.subr.bf16.mxu0 %v10216_v29 }
 0x4a9   : > { %10219 = vmatpush1.bf16.msra.mxu0 %v10218_v58  ;;  %9897 = vmatmul.mubr.msk.f32.vlgmr.msra.gmra.mrb[48].mxu1 %vm4750_vm15, %v12581_v62 }
 0x4aa   : > { %9888 = vmatmul.mubr.msk.f32.gmra.mrb[46].mxu0 %vm4750_vm15, %v9884_v10  ;;  %5100 = vmatprep.mubr.f32.mxu1 %v14651_v0 }
 0x4ab   : > { %11109 = vrot.lane.b32.xlu0 %v12627_v3, %s11595_s18  ;;  %5005 = vmatprep.mubr.f32.mxu0 %v14651_v0 }
 0x4ac   : > { %11114 = vrot.lane.b32.xlu1 %v12544_v63, %s11596_s26  ;;  %v6021_v63 = vld [vmem:[%s14640_s10 + $0x8] sm:$0xff] }
 0x4ad   : > { %9898 = vmatmul.mubr.msk.f32.gmra.mrb[50].mxu1 %vm4750_vm15, %v12606_v30 }
 0x4ae   : > { %9893 = vmatmul.mubr.msk.f32.vlgmr.msra.gmra.mrb[48].mxu0 %vm4750_vm15, %v12581_v62  ;;  %5106 = vmatprep.mubr.f32.mxu1 %v14651_v0  ;;  %v6114_v62 = vld [vmem:[%s14642_s12 + $0x10] sm:$0xff] }
 0x4af   : > { %11124 = vrot.lane.b32.xlu0 %v11123_v26, %s11595_s18  ;;  %5011 = vmatprep.mubr.f32.mxu0 %v14651_v0 }
 0x4b0   : > { %11119 = vrot.lane.b32.xlu1 %v11118_v22, %s11595_s18  ;;  %s11598_s18 = smov 124  }
 0x4b1   : > { %9899 = vmatmul.mubr.msk.f32.gmra.mrb[52].mxu1 %vm4750_vm15, %v9883_v11 }
 0x4b2   : > { %9894 = vmatmul.mubr.msk.f32.gmra.mrb[50].mxu0 %vm4750_vm15, %v12606_v30  ;;  %5112 = vmatprep.mubr.f32.mxu1 %v14651_v0 }
 0x4b3   : > { %11129 = vrot.lane.b32.xlu0 %v11098_v50, %s11596_s26  ;;  %5017 = vmatprep.mubr.f32.mxu0 %v14651_v0 }
 0x4b4   : > { %11134 = vrot.lane.b32.xlu1 %v12558_v25, %s11596_s26  ;;  %v6113_v25 = vld [vmem:[%s14642_s12 + $0x8] sm:$0xff] }
 0x4b5   : > { %9900 = vmatmul.mubr.msk.f32.gmra.mrb[54].mxu1 %vm4750_vm15, %v9884_v10 }
 0x4b6   : > { %9895 = vmatmul.mubr.msk.f32.gmra.mrb[52].mxu0 %vm4750_vm15, %v9883_v11  ;;  %5284 = vmatprep.mubr.f32.mxu1 %v14651_v0 }
 0x4b7   : > { %11139 = vrot.lane.b32.xlu0 %v12540_v57, %s11596_s26  ;;  %5023 = vmatprep.mubr.f32.mxu0 %v14651_v0  ;;  %v6020_v57 = vld [vmem:[%s14640_s10] sm:$0xff] }
 0x4b8   : > { %11144 = vrot.lane.b32.xlu1 %v12555_v21, %s11596_s26  ;;  %v6112_v21 = vld [vmem:[%s14642_s12] sm:$0xff] }
 0x4ba   : > { %9896 = vmatmul.mubr.msk.f32.gmra.mrb[54].mxu0 %vm4750_vm15, %v9884_v10 }
 0x4bb   : > { %11149 = vrot.lane.b32.xlu0 %v12570_v43, %s11596_s26  ;;  %5195 = vmatprep.mubr.f32.mxu0 %v14651_v0  ;;  %v6023_v43 = vld [vmem:[%s14640_s10 + $0x18] sm:$0xff] }
 0x4bc   : > { %11154 = vrot.lane.b32.xlu1 %v11118_v22, %s11596_s26 }
 0x4bf   : > { %11159 = vrot.lane.b32.xlu0 %v12587_v13, %s11596_s26 }
 0x4c0   : > { %11164 = vrot.lane.b32.xlu1 %v12566_v37, %s11596_s26  ;;  %v6022_v37 = vld [vmem:[%s14640_s10 + $0x10] sm:$0xff] }
 0x4c3   : > { %11169 = vrot.lane.b32.xlu0 %v12584_v1, %s11596_s26  ;;  %v6115_v1 = vld [vmem:[%s14642_s12 + $0x18] sm:$0xff] }
 0x4c4   : > { %11174 = vrot.lane.b32.xlu1 %v12599_v27, %s11596_s26 }
 0x4c7   : > { %11179 = vrot.lane.b32.xlu0 %v12617_v59, %s11596_s26 }
 0x4c8   : > { %11184 = vrot.lane.b32.xlu1 %v12595_v23, %s11596_s26 }
 0x4cb   : > { %11189 = vrot.lane.b32.xlu0 %v11093_v8, %s11596_s26 }
 0x4cc   : > { %11194 = vrot.lane.b32.xlu1 %v11123_v26, %s11596_s26 }
 0x4cf   : > { %11199 = vrot.lane.b32.xlu0 %v12627_v3, %s11596_s26  ;;  %s14589_s26 = scalar_lea.sflag [#allocation3], %s539_s21 }
 0x4d0   : > { %6026 = vperm.xlu1 %10882, %v6020_v57  }
 0x4d3   : > { %6031 = vperm.xlu0 %10881, %v6021_v63  }
 0x4d4   : > { %6118 = vperm.xlu1 %10882, %v6112_v21  }
 0x4d7   : > { %6123 = vperm.xlu0 %10881, %v6113_v25  }
 0x4d8   : > { %6036 = vperm.xlu1 %10882, %v6022_v37  }
 0x4db   : > { %6041 = vperm.xlu0 %10881, %v6023_v43  }
 0x4dc   : > { %6128 = vperm.xlu1 %10882, %v6114_v62  }
 0x4df   : > { %6133 = vperm.xlu0 %10881, %v6115_v1  }
 0x4fc   : > { %v11045_v13 = vpop.permute.xlu1 %11044 }
 0x4fd   : > { %v11047_v23 = vunpack.i.h.bf16 %v11045_v13  ;;  %v11046_v27 = vunpack.i.l.bf16 %v11045_v13  ;;  %v12727_v28 = vpop.permute.xlu0 %11049 }
 0x4fe   : > { %v11052_v30 = vunpack.i.h.bf16 %v12727_v28  ;;  %v11051_v33 = vunpack.i.l.bf16 %v12727_v28 }
 0x500   : > { %v4693_v34 = vsel %vm3261_vm9, %v11046_v27, %v11051_v33  ;;  %v4694_v35 = vsel %vm3261_vm9, %v11047_v23, %v11052_v30 }
 0x501   : > { %v11055_v38 = vpop.permute.xlu1 %11054  ;;  %v10238_v39 = vpack.c.bf16 %v4694_v35, %v4693_v34  ;;  %v12776_v34 = vld [vmem:[%s14639_s9] sm:$0xff] }
 0x502   : > { %v11057_v41 = vunpack.i.h.bf16 %v11055_v38  ;;  %v11056_v42 = vunpack.i.l.bf16 %v11055_v38  ;;  %v11060_v32 = vpop.permute.xlu0 %11059 }
 0x503   : > { %v11062_v45 = vunpack.i.h.bf16 %v11060_v32  ;;  %v11061_v46 = vunpack.i.l.bf16 %v11060_v32  ;;  %10239 = vmatprep.subr.bf16.mxu1 %v10238_v39 }
 0x505   : > { %v4698_v47 = vsel %vm3261_vm9, %v11062_v45, %v11047_v23  ;;  %v4697_v48 = vsel %vm3261_vm9, %v11061_v46, %v11046_v27  ;;  %v12743_v49 = vpop.permute.xlu1 %11069  ;;  %v4701_v50 = vsel %vm3261_vm9, %v11056_v42, %v11061_v46  ;;  %v4702_v51 = vsel %vm3261_vm9, %v11057_v41, %v11062_v45 }
 0x506   : > { %v11072_v54 = vunpack.i.h.bf16 %v12743_v49  ;;  %v11071_v56 = vunpack.i.l.bf16 %v12743_v49  ;;  %v11065_v59 = vpop.permute.xlu0 %11064  ;;  %v10228_v31 = vpack.c.bf16 %v4702_v51, %v4701_v50  ;;  %v10240_v9 = vpack.c.bf16 %v4698_v47, %v4697_v48 }
 0x507   : > { %v11067_v11 = vunpack.i.h.bf16 %v11065_v59  ;;  %v11066_v4 = vunpack.i.l.bf16 %v11065_v59  ;;  %v12794_v59 = vld [vmem:[%s14639_s9 + $0x8] sm:$0xff] }
 0x508   : > { %10229 = vmatprep.subr.bf16.mxu0 %v10228_v31  ;;  %10241 = vmatpush1.bf16.msra.mxu1 %v10240_v9 }
 0x509   : > { %v4695_v2 = vsel %vm3261_vm9, %v11066_v4, %v11071_v56  ;;  %v4696_v3 = vsel %vm3261_vm9, %v11067_v11, %v11072_v54 }
 0x50a   : > { %v10242_v52 = vpack.c.bf16 %v4696_v3, %v4695_v2  ;;  %v11075_v16 = vpop.permute.xlu0 %11074 }
 0x50b   : > { %v11077_v24 = vunpack.i.h.bf16 %v11075_v16  ;;  %v11076_v58 = vunpack.i.l.bf16 %v11075_v16 }
 0x50c   : > { %10243 = vmatprep.subr.bf16.mxu1 %v10242_v52 }
 0x50d   : > { %v11080_v14 = vpop.permute.xlu1 %11079 }
 0x50e   : > { %v11082_v44 = vunpack.i.h.bf16 %v11080_v14  ;;  %v11081_v8 = vunpack.i.l.bf16 %v11080_v14 }
 0x510   : > { %v4705_v18 = vsel %vm3261_vm9, %v11081_v8, %v11056_v42  ;;  %v4706_v61 = vsel %vm3261_vm9, %v11082_v44, %v11057_v41 }
 0x511   : > { %v10230_v10 = vpack.c.bf16 %v4706_v61, %v4705_v18  ;;  %v11085_v20 = vpop.permute.xlu1 %11084 }
 0x512   : > { %v11087_v22 = vunpack.i.h.bf16 %v11085_v20  ;;  %v11086_v29 = vunpack.i.l.bf16 %v11085_v20 }
 0x513   : > { %10232 = vmatpush1.bf16.msk.msra.mxu0 %vm12343_vm11, %v10230_v10 }
 0x514   : > { %v4700_v26 = vsel %vm3261_vm9, %v11087_v22, %v11067_v11  ;;  %v4699_v57 = vsel %vm3261_vm9, %v11086_v29, %v11066_v4  ;;  %v4703_v63 = vsel %vm3261_vm9, %v11076_v58, %v11086_v29  ;;  %v4704_v21 = vsel %vm3261_vm9, %v11077_v24, %v11087_v22 }
 0x515   : > { %v11095_v25 = vpop.permute.xlu0 %11094  ;;  %v10233_v37 = vpack.c.bf16 %v4704_v21, %v4703_v63  ;;  %v10244_v43 = vpack.c.bf16 %v4700_v26, %v4699_v57  ;;  %v12837_v26 = vld [vmem:[%s14639_s9 + $0x18] sm:$0xff] }
 0x516   : > { %v11097_v62 = vunpack.i.h.bf16 %v11095_v25  ;;  %v11096_v1 = vunpack.i.l.bf16 %v11095_v25  ;;  %v11090_v13 = vpop.permute.xlu1 %11089 }
 0x517   : > { %v11092_v23 = vunpack.i.h.bf16 %v11090_v13  ;;  %v11091_v27 = vunpack.i.l.bf16 %v11090_v13  ;;  %10234 = vmatprep.subr.bf16.mxu0 %v10233_v37  ;;  %10245 = vmatpush1.bf16.msra.mxu1 %v10244_v43 }
 0x518   : > { %v4707_v35 = vsel %vm3261_vm9, %v11096_v1, %v11076_v58  ;;  %v4708_v38 = vsel %vm3261_vm9, %v11097_v62, %v11077_v24 }
 0x519   : > { %v10235_v39 = vpack.c.bf16 %v4708_v38, %v4707_v35  ;;  %v11100_v41 = vpop.permute.xlu0 %11099  ;;  %v4677_v42 = vsel %vm3261_vm9, %v11091_v27, %v11081_v8  ;;  %v4678_v32 = vsel %vm3261_vm9, %v11092_v23, %v11082_v44  ;;  %v12823_v8 = vld [vmem:[%s14639_s9 + $0x10] sm:$0xff] }
 0x51a   : > { %v11102_v45 = vunpack.i.h.bf16 %v11100_v41  ;;  %v11101_v46 = vunpack.i.l.bf16 %v11100_v41  ;;  %v11105_v47 = vpop.permute.xlu1 %11104  ;;  %9909 = vmatmul.mubr.msk.f32.vlgmr.msra.gmra.mrb[40].mxu1 %vm4750_vm15, %v12776_v34  ;;  %v10254_v48 = vpack.c.bf16 %v4678_v32, %v4677_v42 }
 0x51b   : > { %v11107_v50 = vunpack.i.h.bf16 %v11105_v47  ;;  %v11106_v51 = vunpack.i.l.bf16 %v11105_v47  ;;  %10237 = vmatpush1.bf16.msk.msra.mxu0 %vm12343_vm11, %v10235_v39  ;;  %5290 = vmatprep.mubr.f32.mxu1 %v14651_v0 }
 0x51c   : > { %v4690_v31 = vsel %vm3261_vm9, %v11052_v30, %v11102_v45  ;;  %v4689_v9 = vsel %vm3261_vm9, %v11051_v33, %v11101_v46  ;;  %10255 = vmatprep.subr.bf16.mxu1 %v10254_v48 }
 0x51d   : > { %v4682_v55 = vsel %vm3261_vm9, %v11107_v50, %v11092_v23  ;;  %v4681_v11 = vsel %vm3261_vm9, %v11106_v51, %v11091_v27  ;;  %v11110_v4 = vpop.permute.xlu0 %11109  ;;  %v4685_v2 = vsel %vm3261_vm9, %v11101_v46, %v11106_v51  ;;  %v4686_v3 = vsel %vm3261_vm9, %v11102_v45, %v11107_v50 }
 0x51e   : > { %v11112_v30 = vunpack.i.h.bf16 %v11110_v4  ;;  %v11111_v52 = vunpack.i.l.bf16 %v11110_v4  ;;  %v12812_v28 = vpop.permute.xlu1 %11114  ;;  %9905 = vmatmul.mubr.msk.f32.vlgmr.msra.gmra.mrb[40].mxu0 %vm4750_vm15, %v12776_v34  ;;  %9910 = vmatmul.mubr.msk.f32.gmra.mrb[42].mxu1 %vm4750_vm15, %v12794_v59  ;;  %v10246_v33 = vpack.c.bf16 %v4686_v3, %v4685_v2  ;;  %v10256_v14 = vpack.c.bf16 %v4682_v55, %v4681_v11 }
 0x51f   : > { %v10248_v44 = vpack.c.bf16 %v4690_v31, %v4689_v9  ;;  %5296 = vmatprep.mubr.f32.mxu1 %v14651_v0  ;;  %5201 = vmatprep.mubr.f32.mxu0 %v14651_v0  ;;  %v11117_v57 = vunpack.i.h.bf16 %v12812_v28  ;;  %v11116_v63 = vunpack.i.l.bf16 %v12812_v28 }
 0x520   : > { %10247 = vmatprep.subr.bf16.mxu0 %v10246_v33  ;;  %10257 = vmatpush1.bf16.msra.mxu1 %v10256_v14  ;;  %v4679_v16 = vsel %vm3261_vm9, %v11111_v52, %v11096_v1  ;;  %v4680_v18 = vsel %vm3261_vm9, %v11112_v30, %v11097_v62 }
 0x521   : > { %10249 = vmatpush1.bf16.msra.mxu0 %v10248_v44  ;;  %v11125_v61 = vpop.permute.xlu0 %11124  ;;  %v10258_v10 = vpack.c.bf16 %v4680_v18, %v4679_v16 }
 0x522   : > { %v11120_v20 = vpop.permute.xlu1 %11119  ;;  %v11127_v24 = vunpack.i.h.bf16 %v11125_v61  ;;  %v11126_v58 = vunpack.i.l.bf16 %v11125_v61  ;;  %9906 = vmatmul.mubr.msk.f32.gmra.mrb[42].mxu0 %vm4750_vm15, %v12794_v59  ;;  %9911 = vmatmul.mubr.msk.f32.gmra.mrb[44].mxu1 %vm4750_vm15, %v12823_v8 }
 0x523   : > { %v11122_v22 = vunpack.i.h.bf16 %v11120_v20  ;;  %v11121_v29 = vunpack.i.l.bf16 %v11120_v20  ;;  %10259 = vmatprep.subr.bf16.mxu1 %v10258_v10  ;;  %5302 = vmatprep.mubr.f32.mxu1 %v14651_v0 }
 0x524   : > { %v4684_v21 = vsel %vm3261_vm9, %v11127_v24, %v11112_v30  ;;  %v4683_v25 = vsel %vm3261_vm9, %v11126_v58, %v11111_v52  ;;  %5207 = vmatprep.mubr.f32.mxu0 %v14651_v0 }
 0x525   : > { %v4692_v37 = vsel %vm3261_vm9, %v11072_v54, %v11122_v22  ;;  %v4691_v43 = vsel %vm3261_vm9, %v11071_v56, %v11121_v29  ;;  %v10260_v62 = vpack.c.bf16 %v4684_v21, %v4683_v25  ;;  %v12854_v1 = vpop.permute.xlu0 %11129  ;;  %v4687_v13 = vsel %vm3261_vm9, %v11121_v29, %v11126_v58 }
 0x526   : > { %v10252_v23 = vpack.c.bf16 %v4692_v37, %v4691_v43  ;;  %v11135_v27 = vpop.permute.xlu1 %11134  ;;  %v11132_v35 = vunpack.i.h.bf16 %v12854_v1  ;;  %v11131_v38 = vunpack.i.l.bf16 %v12854_v1  ;;  %9907 = vmatmul.mubr.msk.f32.gmra.mrb[44].mxu0 %vm4750_vm15, %v12823_v8  ;;  %9912 = vmatmul.mubr.msk.f32.gmra.mrb[46].mxu1 %vm4750_vm15, %v12837_v26  ;;  %v4688_v49 = vsel %vm3261_vm9, %v11122_v22, %v11127_v24 }
 0x527   : > { %v10250_v54 = vpack.c.bf16 %v4688_v49, %v4687_v13  ;;  %10261 = vmatpush1.bf16.msra.mxu1 %v10260_v62  ;;  %5462 = vmatprep.mubr.f32.mxu1 %v14651_v0  ;;  %v11136_v32 = vunpack.i.l.bf16 %v11135_v27  ;;  %v11137_v48 = vunpack.i.h.bf16 %v11135_v27 }
 0x528   : > { %5213 = vmatprep.mubr.f32.mxu0 %v14651_v0  ;;  %v5563_v56 = vsel %vm4079_vm12, %v11116_v63, %v11131_v38  ;;  %v5564_v39 = vsel %vm4079_vm12, %v11117_v57, %v11132_v35 }
 0x529   : > { %10251 = vmatprep.subr.bf16.mxu0 %v10250_v54  ;;  %v11140_v41 = vpop.permute.xlu0 %11139  ;;  %v10270_v42 = vpack.c.bf16 %v5564_v39, %v5563_v56 }
 0x52a   : > { %10253 = vmatpush1.bf16.msra.mxu0 %v10252_v23  ;;  %v12876_v45 = vpop.permute.xlu1 %11144  ;;  %v11142_v46 = vunpack.i.h.bf16 %v11140_v41  ;;  %v11141_v47 = vunpack.i.l.bf16 %v11140_v41  ;;  %9917 = vmatmul.mubr.msk.f32.vlgmr.msra.gmra.mrb[48].mxu1 %vm4750_vm15, %v12776_v34  ;;  %v12944_v41 = vld [vmem:[%s14639_s9 + $0x40] sm:$0xff] }
 0x52b   : > { %v11147_v50 = vunpack.i.h.bf16 %v12876_v45  ;;  %v11146_v51 = vunpack.i.l.bf16 %v12876_v45  ;;  %9908 = vmatmul.mubr.msk.f32.gmra.mrb[46].mxu0 %vm4750_vm15, %v12837_v26  ;;  %10271 = vmatprep.subr.bf16.mxu1 %v10270_v42 }
 0x52c   : > { %v5568_v31 = vsel %vm4079_vm12, %v11142_v46, %v11117_v57  ;;  %v5567_v9 = vsel %vm4079_vm12, %v11141_v47, %v11116_v63  ;;  %5373 = vmatprep.mubr.f32.mxu0 %v14651_v0  ;;  %5468 = vmatprep.mubr.f32.mxu1 %v14651_v0  ;;  %v5571_v55 = vsel %vm4079_vm12, %v11136_v32, %v11141_v47 }
 0x52d   : > { %v5575_v11 = vsel %vm4079_vm12, %v11146_v51, %v11136_v32  ;;  %v5576_v4 = vsel %vm4079_vm12, %v11147_v50, %v11137_v48  ;;  %v10272_v2 = vpack.c.bf16 %v5568_v31, %v5567_v9  ;;  %v11150_v3 = vpop.permute.xlu0 %11149  ;;  %v5572_v30 = vsel %vm4079_vm12, %v11137_v48, %v11142_v46 }
 0x52e   : > { %v10264_v52 = vpack.c.bf16 %v5576_v4, %v5575_v11  ;;  %v12900_v28 = vpop.permute.xlu1 %11154  ;;  %v11152_v33 = vunpack.i.h.bf16 %v11150_v3  ;;  %v11151_v14 = vunpack.i.l.bf16 %v11150_v3  ;;  %9918 = vmatmul.mubr.msk.f32.gmra.mrb[50].mxu1 %vm4750_vm15, %v12794_v59  ;;  %v10262_v44 = vpack.c.bf16 %v5572_v30, %v5571_v55 }
 0x52f   : > { %v11157_v16 = vunpack.i.h.bf16 %v12900_v28  ;;  %v11156_v18 = vunpack.i.l.bf16 %v12900_v28  ;;  %9913 = vmatmul.mubr.msk.f32.vlgmr.msra.gmra.mrb[48].mxu0 %vm4750_vm15, %v12776_v34  ;;  %10273 = vmatpush1.bf16.msra.mxu1 %v10272_v2  ;;  %v9924_v28 = vld [vmem:[%s14639_s9 + $0x58] sm:$0xff] }
 0x530   : > { %10263 = vmatprep.subr.bf16.mxu0 %v10262_v44  ;;  %5379 = vmatprep.mubr.f32.mxu0 %v14651_v0 }
 0x531   : > { %10265 = vmatpush1.bf16.msra.mxu0 %v10264_v52  ;;  %v11160_v61 = vpop.permute.xlu0 %11159  ;;  %5474 = vmatprep.mubr.f32.mxu1 %v14651_v0  ;;  %v5565_v10 = vsel %vm4079_vm12, %v11151_v14, %v11156_v18  ;;  %v5566_v20 = vsel %vm4079_vm12, %v11152_v33, %v11157_v16 }
 0x532   : > { %v11165_v24 = vpop.permute.xlu1 %11164  ;;  %v11162_v34 = vunpack.i.h.bf16 %v11160_v61  ;;  %v11161_v58 = vunpack.i.l.bf16 %v11160_v61  ;;  %9919 = vmatmul.mubr.msk.f32.gmra.mrb[52].mxu1 %vm4750_vm15, %v12823_v8  ;;  %v10274_v22 = vpack.c.bf16 %v5566_v20, %v5565_v10 }
 0x533   : > { %v11167_v29 = vunpack.i.h.bf16 %v11165_v24  ;;  %v11166_v57 = vunpack.i.l.bf16 %v11165_v24  ;;  %9914 = vmatmul.mubr.msk.f32.gmra.mrb[50].mxu0 %vm4750_vm15, %v12794_v59  ;;  %5480 = vmatprep.mubr.f32.mxu1 %v14651_v0  ;;  %v9923_v24 = vld [vmem:[%s14639_s9 + $0x50] sm:$0xff] }
 0x534   : > { %10275 = vmatprep.subr.bf16.mxu1 %v10274_v22  ;;  %5385 = vmatprep.mubr.f32.mxu0 %v14651_v0 }
 0x535   : > { %v5569_v63 = vsel %vm4079_vm12, %v11166_v57, %v11151_v14  ;;  %v5570_v21 = vsel %vm4079_vm12, %v11167_v29, %v11152_v33  ;;  %v11170_v25 = vpop.permute.xlu0 %11169  ;;  %v5573_v37 = vsel %vm4079_vm12, %v11161_v58, %v11166_v57  ;;  %v5574_v43 = vsel %vm4079_vm12, %v11162_v34, %v11167_v29 }
 0x536   : > { %v10276_v62 = vpack.c.bf16 %v5570_v21, %v5569_v63  ;;  %v11175_v59 = vpop.permute.xlu1 %11174  ;;  %v11172_v13 = vunpack.i.h.bf16 %v11170_v25  ;;  %v11171_v23 = vunpack.i.l.bf16 %v11170_v25  ;;  %9920 = vmatmul.mubr.msk.f32.gmra.mrb[54].mxu1 %vm4750_vm15, %v12837_v26  ;;  %v10266_v27 = vpack.c.bf16 %v5574_v43, %v5573_v37 }
 0x537   : > { %v11177_v49 = vunpack.i.h.bf16 %v11175_v59  ;;  %v11176_v54 = vunpack.i.l.bf16 %v11175_v59  ;;  %9915 = vmatmul.mubr.msk.f32.gmra.mrb[52].mxu0 %vm4750_vm15, %v12823_v8  ;;  %5785 = vmatprep.mubr.f32.mxu1 %v14651_v0 }
 0x538   : > { %v5577_v56 = vsel %vm4079_vm12, %v11171_v23, %v11161_v58  ;;  %v5578_v39 = vsel %vm4079_vm12, %v11172_v13, %v11162_v34  ;;  %10267 = vmatprep.subr.bf16.mxu0 %v10266_v27  ;;  %10277 = vmatpush1.bf16.msra.mxu1 %v10276_v62 }
 0x539   : > { %v5579_v42 = vsel %vm4079_vm12, %v11176_v54, %v11146_v51  ;;  %v5580_v8 = vsel %vm4079_vm12, %v11177_v49, %v11147_v50  ;;  %v10268_v32 = vpack.c.bf16 %v5578_v39, %v5577_v56  ;;  %v11180_v46 = vpop.permute.xlu0 %11179  ;;  %5391 = vmatprep.mubr.f32.mxu0 %v14651_v0 }
 0x53a   : > { %v10286_v47 = vpack.c.bf16 %v5580_v8, %v5579_v42  ;;  %v11185_v48 = vpop.permute.xlu1 %11184  ;;  %v11182_v31 = vunpack.i.h.bf16 %v11180_v46  ;;  %v11181_v9 = vunpack.i.l.bf16 %v11180_v46 }
 0x53b   : > { %v11187_v55 = vunpack.i.h.bf16 %v11185_v48  ;;  %v11186_v11 = vunpack.i.l.bf16 %v11185_v48  ;;  %9916 = vmatmul.mubr.msk.f32.gmra.mrb[54].mxu0 %vm4750_vm15, %v12837_v26  ;;  %9929 = vmatmul.mubr.msk.f32.vlgmr.msra.gmra.mrb[40].mxu1 %vm4750_vm15, %v12944_v41  ;;  %v12970_v26 = vld [vmem:[%s14639_s9 + $0x48] sm:$0xff] }
 0x53c   : > { %v5559_v45 = vsel %vm4079_vm12, %v11131_v38, %v11181_v9  ;;  %v5560_v50 = vsel %vm4079_vm12, %v11132_v35, %v11182_v31  ;;  %10269 = vmatpush1.bf16.msra.mxu0 %v10268_v32  ;;  %10288 = vmatprep.subr.msk.bf16.mxu1 %vm12430_vm14, %v10286_v47 }
 0x53d   : > { %v5551_v51 = vsel %vm4079_vm12, %v11186_v11, %v11176_v54  ;;  %v5552_v38 = vsel %vm4079_vm12, %v11187_v55, %v11177_v49  ;;  %v11190_v4 = vpop.permute.xlu0 %11189  ;;  %5696 = vmatprep.mubr.f32.mxu0 %v14651_v0  ;;  %5791 = vmatprep.mubr.f32.mxu1 %v14651_v0  ;;  %v5555_v30 = vsel %vm4079_vm12, %v11181_v9, %v11186_v11 }
 0x53e   : > { %v10289_v1 = vpack.c.bf16 %v5552_v38, %v5551_v51  ;;  %v11195_v35 = vpop.permute.xlu1 %11194  ;;  %v11192_v2 = vunpack.i.h.bf16 %v11190_v4  ;;  %v11191_v3 = vunpack.i.l.bf16 %v11190_v4  ;;  %v10280_v52 = vpack.c.bf16 %v5560_v50, %v5559_v45 }
 0x53f   : > { %v11197_v33 = vunpack.i.h.bf16 %v11195_v35  ;;  %v11196_v14 = vunpack.i.l.bf16 %v11195_v35  ;;  %9925 = vmatmul.mubr.msk.f32.vlgmr.msra.gmra.mrb[40].mxu0 %vm4750_vm15, %v12944_v41  ;;  %9930 = vmatmul.mubr.msk.f32.gmra.mrb[42].mxu1 %vm4750_vm15, %v12970_v26  ;;  %v5556_v44 = vsel %vm4079_vm12, %v11182_v31, %v11187_v55 }
 0x540   : > { %v5581_v61 = vsel %vm4079_vm12, %v11191_v3, %v11171_v23  ;;  %v5582_v10 = vsel %vm4079_vm12, %v11192_v2, %v11172_v13  ;;  %v10278_v20 = vpack.c.bf16 %v5556_v44, %v5555_v30  ;;  %10290 = vmatpush1.bf16.msra.mxu1 %v10289_v1  ;;  %5702 = vmatprep.mubr.f32.mxu0 %v14651_v0 }
 0x541   : > { %v10291_v34 = vpack.c.bf16 %v5582_v10, %v5581_v61  ;;  %v11200_v58 = vpop.permute.xlu0 %11199  ;;  %5797 = vmatprep.mubr.f32.mxu1 %v14651_v0  ;;  %v5562_v57 = vsel %vm4079_vm12, %v11157_v16, %v11197_v33  ;;  %v5561_v63 = vsel %vm4079_vm12, %v11156_v18, %v11196_v14 }
 0x542   : > { %10279 = vmatprep.subr.bf16.mxu0 %v10278_v20  ;;  %v11202_v22 = vunpack.i.h.bf16 %v11200_v58  ;;  %v11201_v29 = vunpack.i.l.bf16 %v11200_v58  ;;  %v10284_v62 = vpack.c.bf16 %v5562_v57, %v5561_v63 }
 0x543   : > { %10281 = vmatpush1.bf16.msra.mxu0 %v10280_v52  ;;  %9931 = vmatmul.mubr.msk.f32.gmra.mrb[44].mxu1 %vm4750_vm15, %v9923_v24 }
 0x544   : > { %v5553_v21 = vsel %vm4079_vm12, %v11201_v29, %v11191_v3  ;;  %v5554_v25 = vsel %vm4079_vm12, %v11202_v22, %v11192_v2  ;;  %9926 = vmatmul.mubr.msk.f32.gmra.mrb[42].mxu0 %vm4750_vm15, %v12970_v26  ;;  %10293 = vmatprep.subr.msk.bf16.mxu1 %vm12430_vm14, %v10291_v34  ;;  %v5557_v16 = vsel %vm4079_vm12, %v11196_v14, %v11201_v29 }
 0x545   : > { %v10294_v18 = vpack.c.bf16 %v5554_v25, %v5553_v21  ;;  %5708 = vmatprep.mubr.f32.mxu0 %v14651_v0  ;;  %5803 = vmatprep.mubr.f32.mxu1 %v14651_v0  ;;  %v5558_v37 = vsel %vm4079_vm12, %v11197_v33, %v11202_v22 }
 0x546   : > { %v10282_v43 = vpack.c.bf16 %v5558_v37, %v5557_v16 }
 0x547   : > { %9932 = vmatmul.mubr.msk.f32.gmra.mrb[46].mxu1 %vm4750_vm15, %v9924_v28 }
 0x548   : > { %9927 = vmatmul.mubr.msk.f32.gmra.mrb[44].mxu0 %vm4750_vm15, %v9923_v24  ;;  %10283 = vmatprep.subr.bf16.mxu0 %v10282_v43 }
 0x549   : > { %10295 = vmatpush1.bf16.msra.mxu1 %v10294_v18  ;;  %10285 = vmatpush1.bf16.msra.mxu0 %v10284_v62 }
 0x54a   : > { %10301 = vmatprep.subr.bf16.mxu1 %v12224_v53  ;;  %5714 = vmatprep.mubr.f32.mxu0 %v14651_v0  ;;  %v6109_v53 = vld [vmem:[%s14641_s11 + $0x8] sm:$0xff] }
 0x54b   : > { %5963 = vmatprep.mubr.f32.mxu1 %v14651_v0  ;;  %10297 = vmatprep.subr.bf16.mxu0 %v12226_v60  ;;  %v6110_v60 = vld [vmem:[%s14641_s11 + $0x10] sm:$0xff] }
 0x54c   : > { %9928 = vmatmul.mubr.msk.f32.gmra.mrb[46].mxu0 %vm4750_vm15, %v9924_v28  ;;  %9941 = vmatmul.mubr.msk.f32.vlgmr.msra.gmra.mrb[48].mxu1 %vm4750_vm15, %v12944_v41 }
 0x54d   : > { %10303 = vmatpush1.bf16.msra.mxu1 %v12212_v36  ;;  %5874 = vmatprep.mubr.f32.mxu0 %v14651_v0  ;;  %v6108_v36 = vld [vmem:[%s14641_s11] sm:$0xff] }
 0x54e   : > { %10309 = vmatprep.subr.bf16.mxu1 %v12243_v7  ;;  %5969 = vmatprep.mubr.f32.mxu1 %v14651_v0 }
 0x54f   : > { %v13099_v13 = vpop.permute.xlu1 %6026 }
 0x550   : > { %9933 = vmatmul.mubr.msk.f32.vlgmr.msra.gmra.mrb[48].mxu0 %vm4750_vm15, %v12944_v41  ;;  %9942 = vmatmul.mubr.msk.f32.gmra.mrb[50].mxu1 %vm4750_vm15, %v12970_v26 }
 0x551   : > { %10299 = vmatpush1.bf16.msra.mxu0 %v12233_v12  ;;  %5880 = vmatprep.mubr.f32.mxu0 %v14651_v0  ;;  %v6111_v12 = vld [vmem:[%s14641_s11 + $0x18] sm:$0xff] }
 0x552   : > { %10305 = vmatprep.subr.bf16.mxu0 %v12256_v19  ;;  %5975 = vmatprep.mubr.f32.mxu1 %v14651_v0  ;;  %v13101_v54 = vpop.permute.xlu0 %6031 }
 0x553   : > { %v13103_v32 = vpop.permute.xlu1 %6118 }
 0x554   : > { %9934 = vmatmul.mubr.msk.f32.gmra.mrb[50].mxu0 %vm4750_vm15, %v12970_v26  ;;  %9943 = vmatmul.mubr.msk.f32.gmra.mrb[52].mxu1 %vm4750_vm15, %v9923_v24 }
 0x555   : > { %5886 = vmatprep.mubr.f32.mxu0 %v14651_v0  ;;  %5981 = vmatprep.mubr.f32.mxu1 %v14651_v0 }
 0x556   : > { %v13105_v46 = vpop.permute.xlu0 %6123 }
 0x557   : > { %v13119_v1 = vpop.permute.xlu1 %6036 }
 0x558   : > { %9935 = vmatmul.mubr.msk.f32.gmra.mrb[52].mxu0 %vm4750_vm15, %v9923_v24  ;;  %9944 = vmatmul.mubr.msk.f32.gmra.mrb[54].mxu1 %vm4750_vm15, %v9924_v28 }
 0x559   : > { %5892 = vmatprep.mubr.f32.mxu0 %v14651_v0  ;;  %6301 = vmatprep.mubr.f32.mxu1 %v14651_v0 }
 0x55a   : > { %v13121_v35 = vpop.permute.xlu0 %6041 }
 0x55c   : > { %9936 = vmatmul.mubr.msk.f32.gmra.mrb[54].mxu0 %vm4750_vm15, %v9924_v28  ;;  %9949 = vmatmul.mubr.msk.f32.vlgmr.msra.gmra.mrb[56].mxu1 %vm1799_vm6, %v6108_v36 }
 0x55d   : > { %10311 = vmatpush1.bf16.msra.mxu1 %v12241_v5  ;;  %6212 = vmatprep.mubr.f32.mxu0 %v14651_v0 }
 0x55e   : > { %6307 = vmatprep.mubr.f32.mxu1 %v14651_v0 }
 0x560   : > { %9945 = vmatmul.mubr.msk.f32.vlgmr.msra.gmra.mrb[56].mxu0 %vm1799_vm6, %v6108_v36  ;;  %9950 = vmatmul.mubr.msk.f32.gmra.mrb[58].mxu1 %vm1799_vm6, %v6109_v53 }
 0x561   : > { %10307 = vmatpush1.bf16.msra.mxu0 %v12253_v17  ;;  %6218 = vmatprep.mubr.f32.mxu0 %v14651_v0 }
 0x562   : > { %6313 = vmatprep.mubr.f32.mxu1 %v14651_v0 }
 0x564   : > { %9946 = vmatmul.mubr.msk.f32.gmra.mrb[58].mxu0 %vm1799_vm6, %v6109_v53  ;;  %9951 = vmatmul.mubr.msk.f32.gmra.mrb[60].mxu1 %vm1799_vm6, %v6110_v60 }
 0x565   : > { %6224 = vmatprep.mubr.f32.mxu0 %v14651_v0  ;;  %6319 = vmatprep.mubr.f32.mxu1 %v14651_v0 }
 0x568   : > { %9947 = vmatmul.mubr.msk.f32.gmra.mrb[60].mxu0 %vm1799_vm6, %v6110_v60  ;;  %9952 = vmatmul.mubr.msk.f32.gmra.mrb[62].mxu1 %vm1799_vm6, %v6111_v12 }
 0x569   : > { %6230 = vmatprep.mubr.f32.mxu0 %v14651_v0  ;;  %6479 = vmatprep.mubr.f32.mxu1 %v14651_v0 }
 0x56c   : > { %9948 = vmatmul.mubr.msk.f32.gmra.mrb[62].mxu0 %vm1799_vm6, %v6111_v12  ;;  %9957 = vmatmul.mubr.msk.f32.vlgmr.msra.gmra.mrb[64].mxu1 %vm1799_vm6, %v6108_v36 }
 0x56d   : > { %6390 = vmatprep.mubr.f32.mxu0 %v14651_v0  ;;  %6485 = vmatprep.mubr.f32.mxu1 %v14651_v0 }
 0x570   : > { %9953 = vmatmul.mubr.msk.f32.vlgmr.msra.gmra.mrb[64].mxu0 %vm1799_vm6, %v6108_v36  ;;  %9958 = vmatmul.mubr.msk.f32.gmra.mrb[66].mxu1 %vm1799_vm6, %v6109_v53 }
 0x571   : > { %6396 = vmatprep.mubr.f32.mxu0 %v14651_v0  ;;  %6491 = vmatprep.mubr.f32.mxu1 %v14651_v0 }
 0x574   : > { %9954 = vmatmul.mubr.msk.f32.gmra.mrb[66].mxu0 %vm1799_vm6, %v6109_v53  ;;  %9959 = vmatmul.mubr.msk.f32.gmra.mrb[68].mxu1 %vm1799_vm6, %v6110_v60 }
 0x575   : > { %6402 = vmatprep.mubr.f32.mxu0 %v14651_v0  ;;  %6497 = vmatprep.mubr.f32.mxu1 %v14651_v0 }
 0x578   : > { %9955 = vmatmul.mubr.msk.f32.gmra.mrb[68].mxu0 %vm1799_vm6, %v6110_v60  ;;  %9960 = vmatmul.mubr.msk.f32.gmra.mrb[70].mxu1 %vm1799_vm6, %v6111_v12 }
 0x579   : > { %6408 = vmatprep.mubr.f32.mxu0 %v14651_v0  ;;  %6879 = vmatprep.mubr.f32.mxu1 %v14651_v0 }
 0x57c   : > { %9956 = vmatmul.mubr.msk.f32.gmra.mrb[70].mxu0 %vm1799_vm6, %v6111_v12 }
 0x57d   : > { %6790 = vmatprep.mubr.f32.mxu0 %v14651_v0 }
 0x60e   : > { %v5787_v5 = vpop.f32.mrb[40].mxu1 }
 0x60f   : > { %v5789_v7 = vpop.f32.mrb[41].mxu1  ;;  %v13108_v55 = vadd.f32 %v13099_v13, %v5787_v5 }
 0x610   : > { %v13111_v50 = vadd.f32 %v13099_v13, %v5789_v7 }
 0x611   : > { %v6078_v3 = vmax.f32 %v13108_v55, 0.0 }
 0x612   : > { %v5698_v17 = vpop.f32.mrb[40].mxu0  ;;  %v5793_v19 = vpop.f32.mrb[42].mxu1  ;;  %v6079_v44 = vmax.f32 %v13111_v50, 0.0 }
 0x613   : > { %v5700_v6 = vpop.f32.mrb[41].mxu0  ;;  %v5795_v59 = vpop.f32.mrb[43].mxu1  ;;  %v13114_v38 = vadd.f32 %v13099_v13, %v5698_v17  ;;  %v13117_v4 = vadd.f32 %v13101_v54, %v5793_v19 }
 0x614   : > { %v13124_v2 = vadd.f32 %v13099_v13, %v5700_v6  ;;  %v13128_v30 = vadd.f32 %v13101_v54, %v5795_v59 }
 0x615   : > { %v6076_v58 = vmax.f32 %v13114_v38, 0.0  ;;  %v6086_v22 = vmax.f32 %v13117_v4, 0.0 }
 0x616   : > { %v5799_v23 = vpop.f32.mrb[44].mxu1  ;;  %v6077_v63 = vmax.f32 %v13124_v2, 0.0  ;;  %v6087_v16 = vmax.f32 %v13128_v30, 0.0 }
 0x617   : > { %v5704_v27 = vpop.f32.mrb[42].mxu0  ;;  %v5801_v49 = vpop.f32.mrb[45].mxu1  ;;  %v13131_v52 = vadd.f32 %v13119_v1, %v5799_v23 }
 0x618   : > { %v5706_v56 = vpop.f32.mrb[43].mxu0  ;;  %v13135_v61 = vadd.f32 %v13101_v54, %v5704_v27  ;;  %v13141_v20 = vadd.f32 %v13119_v1, %v5801_v49 }
 0x619   : > { %v13138_v10 = vadd.f32 %v13101_v54, %v5706_v56  ;;  %v6094_v18 = vmax.f32 %v13131_v52, 0.0 }
 0x61a   : > { %v5805_v39 = vpop.f32.mrb[46].mxu1  ;;  %v6084_v53 = vmax.f32 %v13135_v61, 0.0  ;;  %v6095_v12 = vmax.f32 %v13141_v20, 0.0 }
 0x61b   : > { %v5710_v41 = vpop.f32.mrb[44].mxu0  ;;  %v5807_v42 = vpop.f32.mrb[47].mxu1  ;;  %v13149_v57 = vadd.f32 %v13121_v35, %v5805_v39  ;;  %v6085_v60 = vmax.f32 %v13138_v10, 0.0 }
 0x61c   : > { %v5712_v8 = vpop.f32.mrb[45].mxu0  ;;  %v13146_v29 = vadd.f32 %v13119_v1, %v5710_v41  ;;  %v13156_v25 = vadd.f32 %v13121_v35, %v5807_v42 }
 0x61d   : > { %v13153_v21 = vadd.f32 %v13119_v1, %v5712_v8  ;;  %v6102_v6 = vmax.f32 %v13149_v57, 0.0 }
 0x61e   : > { %v6092_v19 = vmax.f32 %v13146_v29, 0.0  ;;  %v6103_v49 = vmax.f32 %v13156_v25, 0.0 }
 0x61f   : > { %v5716_v47 = vpop.f32.mrb[46].mxu0  ;;  %v5965_v48 = vpop.f32.mrb[48].mxu1  ;;  %v6093_v27 = vmax.f32 %v13153_v21, 0.0 }
 0x620   : > { %v5718_v31 = vpop.f32.mrb[47].mxu0  ;;  %v5967_v9 = vpop.f32.mrb[49].mxu1  ;;  %v13159_v28 = vadd.f32 %v13121_v35, %v5716_v47  ;;  %v13164_v37 = vadd.f32 %v13099_v13, %v5965_v48 }
 0x621   : > { %v13167_v43 = vadd.f32 %v13121_v35, %v5718_v31  ;;  %v13173_v5 = vadd.f32 %v13099_v13, %v5967_v9 }
 0x623   : > { %v5876_v11 = vpop.f32.mrb[48].mxu0  ;;  %v5971_v45 = vpop.f32.mrb[50].mxu1 }
 0x624   : > { %v5878_v26 = vpop.f32.mrb[49].mxu0  ;;  %v5973_v51 = vpop.f32.mrb[51].mxu1  ;;  %v13178_v59 = vadd.f32 %v13099_v13, %v5876_v11  ;;  %v13181_v23 = vadd.f32 %v13101_v54, %v5971_v45 }
 0x625   : > { %v13187_v39 = vadd.f32 %v13099_v13, %v5878_v26  ;;  %v13192_v8 = vadd.f32 %v13101_v54, %v5973_v51 }
 0x627   : > { %v5882_v33 = vpop.f32.mrb[50].mxu0  ;;  %v5977_v14 = vpop.f32.mrb[52].mxu1 }
 0x628   : > { %v5884_v24 = vpop.f32.mrb[51].mxu0  ;;  %v5979_v34 = vpop.f32.mrb[53].mxu1  ;;  %v13195_v47 = vadd.f32 %v13101_v54, %v5882_v33  ;;  %v13199_v55 = vadd.f32 %v13119_v1, %v5977_v14 }
 0x629   : > { %v13202_v13 = vadd.f32 %v13101_v54, %v5884_v24  ;;  %v13208_v33 = vadd.f32 %v13119_v1, %v5979_v34 }
 0x62b   : > { %v5888_v62 = vpop.f32.mrb[52].mxu0  ;;  %v5983_v36 = vpop.f32.mrb[54].mxu1 }
 0x62c   : > { %v5890_v7 = vpop.f32.mrb[53].mxu0  ;;  %v5985_v17 = vpop.f32.mrb[55].mxu1  ;;  %v13213_v14 = vadd.f32 %v13119_v1, %v5888_v62  ;;  %v13216_v54 = vadd.f32 %v13121_v35, %v5983_v36 }
 0x62d   : > { %v13221_v51 = vadd.f32 %v13119_v1, %v5890_v7  ;;  %v13229_v26 = vadd.f32 %v13121_v35, %v5985_v17 }
 0x62f   : > { %v5894_v48 = vpop.f32.mrb[54].mxu0  ;;  %v6303_v31 = vpop.f32.mrb[56].mxu1 }
 0x630   : > { %v6304_v11 = vadd.f32 %v6303_v31, %v13103_v32  ;;  %v5896_v45 = vpop.f32.mrb[55].mxu0  ;;  %v6305_v50 = vpop.f32.mrb[57].mxu1  ;;  %v6091_v31 = vmax.f32 %v13192_v8, 0.0  ;;  %v13243_v17 = vadd.f32 %v13121_v35, %v5894_v48 }
 0x631   : > { %v6306_v0 = vadd.f32 %v6305_v50, %v13103_v32 }
 0x632   : > { %v6506_v24 = vadd.f32 %v6304_v11, %v6078_v3  ;;  %v6097_v11 = vmax.f32 %v13221_v51, 0.0 }
 0x633   : > { %v6507_v34 = vadd.f32 %v6306_v0, %v6079_v44  ;;  %v6214_v42 = vpop.f32.mrb[56].mxu0  ;;  %v6309_v41 = vpop.f32.mrb[58].mxu1 }
 0x634   : > { %v6215_v62 = vadd.f32 %v6214_v42, %v13103_v32  ;;  %v6310_v36 = vadd.f32 %v6309_v41, %v13105_v46  ;;  %v6216_v56 = vpop.f32.mrb[57].mxu0  ;;  %v6311_v3 = vpop.f32.mrb[59].mxu1  ;;  %v13249_v9 = vmax.f32 %v6506_v24, 0.0 }
 0x635   : > { %v6217_v1 = vadd.f32 %v6216_v56, %v13103_v32  ;;  %v6312_v0 = vadd.f32 %v6311_v3, %v13105_v46  ;;  %v13233_v44 = vpop.permute.xlu1 %6128  ;;  %v13255_v48 = vmax.f32 %v6507_v34, 0.0 }
 0x636   : > { %v6504_v41 = vadd.f32 %v6215_v62, %v6076_v58  ;;  %v6514_v42 = vadd.f32 %v6310_v36, %v6086_v22 }
 0x637   : > { %v6505_v56 = vadd.f32 %v6217_v1, %v6077_v63  ;;  %v6515_v3 = vadd.f32 %v6312_v0, %v6087_v16  ;;  %v6220_v7 = vpop.f32.mrb[58].mxu0  ;;  %v6315_v50 = vpop.f32.mrb[60].mxu1  ;;  %v13264_v16 = vadd.f32 %v13121_v35, %v5896_v45 }
 0x638   : > { %v13251_v38 = vmax.f32 %v6514_v42, 0.0  ;;  %v6221_v4 = vadd.f32 %v6220_v7, %v13105_v46  ;;  %v6316_v58 = vadd.f32 %v6315_v50, %v13233_v44  ;;  %v6222_v22 = vpop.f32.mrb[59].mxu0  ;;  %v6317_v62 = vpop.f32.mrb[61].mxu1 }
 0x639   : > { %v13257_v36 = vmax.f32 %v6515_v3, 0.0  ;;  %v6223_v2 = vadd.f32 %v6222_v22, %v13105_v46  ;;  %v6318_v30 = vadd.f32 %v6317_v62, %v13233_v44  ;;  %v13261_v63 = vpop.permute.xlu0 %6133 }
 0x63a   : > { %v6512_v24 = vadd.f32 %v6221_v4, %v6084_v53  ;;  %v6522_v50 = vadd.f32 %v6316_v58, %v6094_v18  ;;  %v13272_v34 = vpack.i.bf16 %v13251_v38, %v13249_v9  ;;  %v13300_v58 = vmax.f32 %v6504_v41, 0.0 }
 0x63b   : > { %v6513_v1 = vadd.f32 %v6223_v2, %v6085_v60  ;;  %v6523_v0 = vadd.f32 %v6318_v30, %v6095_v12  ;;  %v6226_v7 = vpop.f32.mrb[60].mxu0  ;;  %v6321_v42 = vpop.f32.mrb[62].mxu1  ;;  %v13280_v35 = vpack.i.bf16 %v13257_v36, %v13255_v48  ;;  %v10320_v52 = vpack.c.bf16 %v13257_v36, %v13255_v48 }
 0x63c   : > { %v13284_v61 = vmax.f32 %v6512_v24, 0.0  ;;  %v6227_v18 = vadd.f32 %v6226_v7, %v13233_v44  ;;  %v6322_v53 = vadd.f32 %v6321_v42, %v13261_v63  ;;  %v6323_v10 = vpop.f32.mrb[63].mxu1  ;;  %11204 = vrot.lane.b32.xlu1 %v13272_v34, %s11597_s2  ;;  %v6228_v20 = vpop.f32.mrb[61].mxu0  ;;  %v10322_v60 = vpack.c.bf16 %v13251_v38, %v13249_v9 }
 0x63d   : > { %v13292_v12 = vmax.f32 %v6505_v56, 0.0  ;;  %v13294_v45 = vmax.f32 %v6513_v1, 0.0  ;;  %v6324_v3 = vadd.f32 %v6323_v10, %v13261_v63  ;;  %v6229_v4 = vadd.f32 %v6228_v20, %v13233_v44  ;;  %11209 = vrot.lane.b32.xlu0 %v13280_v35, %s11597_s2  ;;  %10321 = vmatprep.subr.bf16.mxu1 %v10320_v52 }
 0x63e   : > { %v13302_v22 = vmax.f32 %v6522_v50, 0.0  ;;  %v6520_v62 = vadd.f32 %v6227_v18, %v6092_v19  ;;  %v6530_v56 = vadd.f32 %v6322_v53, %v6102_v6  ;;  %10323 = vmatpush1.bf16.msra.mxu1 %v10322_v60  ;;  %v10314_v21 = vpack.c.bf16 %v13284_v61, %v13300_v58 }
 0x63f   : > { %v6531_v2 = vadd.f32 %v6324_v3, %v6103_v49  ;;  %v6521_v30 = vadd.f32 %v6229_v4, %v6093_v27  ;;  %v6232_v24 = vpop.f32.mrb[62].mxu0  ;;  %v6481_v1 = vpop.f32.mrb[64].mxu1  ;;  %v13314_v41 = vpack.i.bf16 %v13294_v45, %v13292_v12  ;;  %v10312_v29 = vpack.c.bf16 %v13294_v45, %v13292_v12 }
 0x640   : > { %v13318_v19 = vmax.f32 %v6530_v56, 0.0  ;;  %v6233_v57 = vadd.f32 %v6232_v24, %v13261_v63  ;;  %v6482_v6 = vadd.f32 %v6481_v1, %v13103_v32  ;;  %v6234_v25 = vpop.f32.mrb[63].mxu0  ;;  %v6483_v49 = vpop.f32.mrb[65].mxu1  ;;  %v13324_v27 = vmax.f32 %v6523_v0, 0.0 }
 0x641   : > { %v13326_v50 = vmax.f32 %v6531_v2, 0.0  ;;  %v6235_v7 = vadd.f32 %v6234_v25, %v13261_v63  ;;  %v6484_v42 = vadd.f32 %v6483_v49, %v13103_v32  ;;  %11219 = vrot.lane.b32.xlu1 %v13314_v41, %s11597_s2  ;;  %10313 = vmatprep.subr.bf16.mxu0 %v10312_v29  ;;  %v14677_v52 = vmax.f32 %v13159_v28, 0.0 }
 0x642   : > { %v14678_v53 = vmax.f32 %v13164_v37, 0.0  ;;  %10315 = vmatpush1.bf16.msra.mxu0 %v10314_v21  ;;  %v13338_v0 = vpack.i.bf16 %v13318_v19, %v13302_v22  ;;  %v13342_v20 = vpack.i.bf16 %v13284_v61, %v13300_v58  ;;  %v14679_v60 = vmax.f32 %v13167_v43, 0.0 }
 0x643   : > { %v6528_v18 = vadd.f32 %v6233_v57, %v14677_v52  ;;  %v14680_v4 = vmax.f32 %v13173_v5, 0.0  ;;  %v6392_v28 = vpop.f32.mrb[64].mxu0  ;;  %v6487_v2 = vpop.f32.mrb[66].mxu1  ;;  %v10324_v37 = vpack.c.bf16 %v13326_v50, %v13324_v27  ;;  %v13352_v24 = vpack.i.bf16 %v13326_v50, %v13324_v27 }
 0x644   : > { %v6510_v10 = vadd.f32 %v6482_v6, %v14678_v53  ;;  %v6529_v3 = vadd.f32 %v6235_v7, %v14679_v60  ;;  %v13354_v1 = vmax.f32 %v6521_v30, 0.0  ;;  %v6393_v29 = vadd.f32 %v6392_v28, %v13103_v32  ;;  %v6489_v43 = vpop.f32.mrb[67].mxu1  ;;  %11214 = vrot.lane.b32.xlu0 %v13338_v0, %s11597_s2  ;;  %v6394_v5 = vpop.f32.mrb[65].mxu0 }
 0x645   : > { %v6511_v56 = vadd.f32 %v6484_v42, %v14680_v4  ;;  %v6488_v57 = vadd.f32 %v6487_v2, %v13105_v46  ;;  %v10326_v6 = vpack.c.bf16 %v13318_v19, %v13302_v22  ;;  %v13362_v25 = vmax.f32 %v6528_v18, 0.0  ;;  %10325 = vmatprep.subr.bf16.mxu1 %v10324_v37  ;;  %11224 = vrot.lane.b32.xlu1 %v13352_v24, %s11597_s2 }
 0x646   : > { %v13364_v49 = vmax.f32 %v6529_v3, 0.0  ;;  %v6490_v21 = vadd.f32 %v6489_v43, %v13105_v46  ;;  %v6395_v30 = vadd.f32 %v6394_v5, %v13103_v32  ;;  %v13370_v7 = vmax.f32 %v6520_v62, 0.0 }
 0x647   : > { %v13372_v42 = vmax.f32 %v6510_v10, 0.0  ;;  %v14681_v52 = vmax.f32 %v13178_v59, 0.0  ;;  %v14682_v18 = vmax.f32 %v13181_v23, 0.0  ;;  %10327 = vmatpush1.bf16.msra.mxu1 %v10326_v6  ;;  %v14683_v32 = vmax.f32 %v13187_v39, 0.0  ;;  %v6398_v28 = vpop.f32.mrb[66].mxu0  ;;  %v6493_v2 = vpop.f32.mrb[68].mxu1 }
 0x648   : > { %v6519_v3 = vadd.f32 %v6490_v21, %v6091_v31  ;;  %v13384_v62 = vpack.i.bf16 %v13364_v49, %v13354_v1  ;;  %v10316_v59 = vpack.c.bf16 %v13364_v49, %v13354_v1  ;;  %v13391_v23 = vld [vmem:[%s14643_s13 + $0x20] sm:$0xff]  ;;  %v13393_v10 = vmax.f32 %v6511_v56, 0.0  ;;  %v6400_v37 = vpop.f32.mrb[67].mxu0 }
 0x649   : > { %v6508_v53 = vadd.f32 %v6393_v29, %v14681_v52  ;;  %v6518_v60 = vadd.f32 %v6488_v57, %v14682_v18  ;;  %v6509_v4 = vadd.f32 %v6395_v30, %v14683_v32  ;;  %v6399_v39 = vadd.f32 %v6398_v28, %v13105_v46  ;;  %v6495_v29 = vpop.f32.mrb[69].mxu1  ;;  %11229 = vrot.lane.b32.xlu1 %v13342_v20, %s11597_s2 }
 0x64a   : > { %v6494_v31 = vadd.f32 %v6493_v2, %v13233_v44  ;;  %v13399_v57 = vmax.f32 %v6519_v3, 0.0  ;;  %v6401_v43 = vadd.f32 %v6400_v37, %v13105_v46  ;;  %v6496_v5 = vadd.f32 %v6495_v29, %v13233_v44  ;;  %11234 = vrot.lane.b32.xlu0 %v13384_v62, %s11597_s2  ;;  %10317 = vmatprep.subr.bf16.mxu0 %v10316_v59 }
 0x64b   : > { %v13395_v8 = vmax.f32 %v6518_v60, 0.0  ;;  %v10318_v56 = vpack.c.bf16 %v13362_v25, %v13370_v7  ;;  %v6107_v6 = vmax.f32 %v13229_v26, 0.0  ;;  %v14684_v21 = vmax.f32 %v13195_v47, 0.0  ;;  %9969 = vmatmul.mubr.msk.f32.vlgmr.msra.gmra.mrb[72].mxu1 %vm4750_vm15, %v13391_v23  ;;  %v6404_v47 = vpop.f32.mrb[68].mxu0  ;;  %v6499_v28 = vpop.f32.mrb[70].mxu1 }
 0x64c   : > { %v14685_v52 = vmax.f32 %v13199_v55, 0.0  ;;  %v14686_v60 = vmax.f32 %v13202_v13, 0.0  ;;  %v14687_v32 = vmax.f32 %v13208_v33, 0.0  ;;  %v10336_v55 = vpack.c.bf16 %v13399_v57, %v13393_v10  ;;  %v6406_v33 = vpop.f32.mrb[69].mxu0  ;;  %v6501_v37 = vpop.f32.mrb[71].mxu1 }
 0x64d   : > { %v6516_v30 = vadd.f32 %v6399_v39, %v14684_v21  ;;  %v13416_v46 = vpack.i.bf16 %v13395_v8, %v13372_v42  ;;  %10319 = vmatpush1.bf16.msra.mxu0 %v10318_v56  ;;  %v13428_v2 = vpack.i.bf16 %v13399_v57, %v13393_v10  ;;  %v6104_v59 = vmax.f32 %v13243_v17, 0.0 }
 0x64e   : > { %v6526_v18 = vadd.f32 %v6494_v31, %v14685_v52  ;;  %v6517_v3 = vadd.f32 %v6401_v43, %v14686_v60  ;;  %v6527_v26 = vadd.f32 %v6496_v5, %v14687_v32  ;;  %v6405_v13 = vadd.f32 %v6404_v47, %v13233_v44  ;;  %v13439_v43 = vld [vmem:[%s14643_s13 + $0x28] sm:$0xff]  ;;  %10337 = vmatprep.subr.bf16.mxu1 %v10336_v55 }
 0x64f   : > { %v13431_v39 = vmax.f32 %v6516_v30, 0.0  ;;  %v6500_v31 = vadd.f32 %v6499_v28, %v13261_v63  ;;  %v14688_v29 = vmov 0.0   ;;  %v13441_v5 = vmax.f32 %v6509_v4, 0.0  ;;  %11239 = vrot.lane.b32.xlu0 %v13416_v46, %s11597_s2  ;;  %11244 = vrot.lane.b32.xlu1 %v13428_v2, %s11597_s2 }
 0x650   : > { %6885 = vmatprep.mubr.f32.mxu1 %v14688_v29  ;;  %v13443_v56 = vmax.f32 %v6517_v3, 0.0  ;;  %v6407_v17 = vadd.f32 %v6406_v33, %v13233_v44  ;;  %v6502_v21 = vadd.f32 %v6501_v37, %v13261_v63  ;;  %v13449_v30 = vmax.f32 %v6508_v53, 0.0  ;;  %9965 = vmatmul.mubr.msk.f32.vlgmr.msra.gmra.mrb[72].mxu0 %vm4750_vm15, %v13391_v23  ;;  %v6410_v3 = vpop.f32.mrb[70].mxu0 }
 0x651   : > { %v14689_v52 = vmax.f32 %v13213_v14, 0.0  ;;  %v14690_v32 = vmax.f32 %v13216_v54, 0.0  ;;  %v10338_v44 = vpack.c.bf16 %v13395_v8, %v13372_v42  ;;  %v13465_v14 = vpack.i.bf16 %v13362_v25, %v13370_v7  ;;  %9970 = vmatmul.mubr.msk.f32.gmra.mrb[74].mxu1 %vm4750_vm15, %v13439_v43  ;;  %6796 = vmatprep.mubr.f32.mxu0 %v14688_v29 }
 0x652   : > { %v6525_v4 = vadd.f32 %v6407_v17, %v6097_v11  ;;  %v6535_v53 = vadd.f32 %v6502_v21, %v6107_v6  ;;  %v10328_v54 = vpack.c.bf16 %v13443_v56, %v13441_v5  ;;  %v13471_v28 = vmax.f32 %v6526_v18, 0.0  ;;  %v6412_v11 = vpop.f32.mrb[71].mxu0  ;;  %6891 = vmatprep.mubr.f32.mxu1 %v14688_v29 }
 0x653   : > { %v6524_v60 = vadd.f32 %v6405_v13, %v14689_v52  ;;  %v6534_v47 = vadd.f32 %v6500_v31, %v14690_v32  ;;  %10339 = vmatpush1.bf16.msra.mxu1 %v10338_v44  ;;  %v6411_v51 = vadd.f32 %v6410_v3, %v13261_v63  ;;  %v10330_v6 = vpack.c.bf16 %v13431_v39, %v13449_v30  ;;  %v13482_v13 = vld [vmem:[%s14643_s13 + $0x30] sm:$0xff]  ;;  %v9964_v32 = vld [vmem:[%s14643_s13 + $0x38] sm:$0xff] }
 0x654   : > { %v6105_v31 = vmax.f32 %v13264_v16, 0.0  ;;  %v13485_v18 = vmax.f32 %v6527_v26, 0.0  ;;  %v13487_v33 = vmax.f32 %v6535_v53, 0.0  ;;  %v6413_v37 = vadd.f32 %v6412_v11, %v13261_v63  ;;  %10329 = vmatprep.subr.bf16.mxu0 %v10328_v54  ;;  %11249 = vrot.lane.b32.xlu1 %v13465_v14, %s11597_s2 }
 0x655   : > { %v13473_v55 = vmax.f32 %v6534_v47, 0.0  ;;  %v6532_v17 = vadd.f32 %v6411_v51, %v6104_v59  ;;  %10331 = vmatpush1.bf16.msra.mxu0 %v10330_v6  ;;  %9971 = vmatmul.mubr.msk.f32.gmra.mrb[76].mxu1 %vm4750_vm15, %v13482_v13  ;;  %v13513_v47 = vmax.f32 %v6525_v4, 0.0  ;;  %v13519_v53 = vmax.f32 %v6524_v60, 0.0 }
 0x656   : > { %14692 = vst [vmem:[#allocation8_spill] sm:$0xff] %v13485_v18  ;;  %14693 = vst [vmem:[#allocation9_spill] sm:$0xff] %v13487_v33  ;;  %v6533_v52 = vadd.f32 %v6413_v37, %v6105_v31  ;;  %v10340_v16 = vpack.c.bf16 %v13487_v33, %v13485_v18  ;;  %v11258_v26 = vpack.i.bf16 %v13487_v33, %v13485_v18  ;;  %6897 = vmatprep.mubr.f32.mxu1 %v14688_v29 }
 0x657   : > { %14691 = vst [vmem:[#allocation7_spill] sm:$0xff] %v13473_v55  ;;  %v13495_v21 = vpack.i.bf16 %v13473_v55, %v13471_v28  ;;  %v13503_v63 = vmax.f32 %v6532_v17, 0.0  ;;  %v10342_v59 = vpack.c.bf16 %v13473_v55, %v13471_v28  ;;  %14695 = vst [vmem:[#allocation11_spill] sm:$0xff] %v13513_v47  ;;  %9966 = vmatmul.mubr.msk.f32.gmra.mrb[74].mxu0 %vm4750_vm15, %v13439_v43 }
 0x658   : > { %v13515_v44 = vmax.f32 %v6533_v52, 0.0  ;;  %10341 = vmatprep.subr.bf16.mxu1 %v10340_v16  ;;  %14697 = vst [vmem:[#allocation13_spill] sm:$0xff] %v13519_v53  ;;  %11259 = vrot.lane.b32.xlu1 %v11258_v26, %s11597_s2  ;;  %v11268_v3 = vpack.i.bf16 %v13443_v56, %v13441_v5  ;;  %v11263_v4 = vpack.i.bf16 %v13431_v39, %v13449_v30 }
 0x659   : > { %14694 = vst [vmem:[#allocation10_spill] sm:$0xff] %v13503_v63  ;;  %11254 = vrot.lane.b32.xlu0 %v13495_v21, %s11597_s2  ;;  %10343 = vmatpush1.bf16.msra.mxu1 %v10342_v59  ;;  %v10334_v60 = vpack.c.bf16 %v13503_v63, %v13519_v53  ;;  %v11293_v11 = vpack.i.bf16 %v13503_v63, %v13519_v53 }
 0x65a   : > { %14696 = vst [vmem:[#allocation12_spill] sm:$0xff] %v13515_v44  ;;  %v10332_v54 = vpack.c.bf16 %v13515_v44, %v13513_v47  ;;  %9972 = vmatmul.mubr.msk.f32.gmra.mrb[78].mxu1 %vm4750_vm15, %v9964_v32  ;;  %v11273_v51 = vpack.i.bf16 %v13515_v44, %v13513_v47  ;;  %6802 = vmatprep.mubr.f32.mxu0 %v14688_v29 }
 0x65b   : > { %7057 = vmatprep.mubr.f32.mxu1 %v14688_v29  ;;  %9967 = vmatmul.mubr.msk.f32.gmra.mrb[76].mxu0 %vm4750_vm15, %v13482_v13 }
 0x65c   : > { %10333 = vmatprep.subr.bf16.mxu0 %v10332_v54  ;;  %11264 = vrot.lane.b32.xlu1 %v11263_v4, %s11597_s2 }
 0x65d   : > { %11269 = vrot.lane.b32.xlu0 %v11268_v3, %s11597_s2  ;;  %10335 = vmatpush1.bf16.msra.mxu0 %v10334_v60 }
 0x65e   : > { %9977 = vmatmul.mubr.msk.f32.vlgmr.msra.gmra.mrb[80].mxu1 %vm4750_vm15, %v13391_v23  ;;  %6808 = vmatprep.mubr.f32.mxu0 %v14688_v29 }
 0x65f   : > { %7063 = vmatprep.mubr.f32.mxu1 %v14688_v29  ;;  %9968 = vmatmul.mubr.msk.f32.gmra.mrb[78].mxu0 %vm4750_vm15, %v9964_v32 }
 0x660   : > { %11284 = vrot.lane.b32.xlu1 %v11263_v4, %s11598_s18  ;;  %6968 = vmatprep.mubr.f32.mxu0 %v14688_v29 }
 0x661   : > { %11274 = vrot.lane.b32.xlu0 %v11273_v51, %s11597_s2 }
 0x662   : > { %9978 = vmatmul.mubr.msk.f32.gmra.mrb[82].mxu1 %vm4750_vm15, %v13439_v43 }
 0x663   : > { %7069 = vmatprep.mubr.f32.mxu1 %v14688_v29  ;;  %9973 = vmatmul.mubr.msk.f32.vlgmr.msra.gmra.mrb[80].mxu0 %vm4750_vm15, %v13391_v23 }
 0x664   : > { %11294 = vrot.lane.b32.xlu1 %v11293_v11, %s11597_s2  ;;  %6974 = vmatprep.mubr.f32.mxu0 %v14688_v29 }
 0x665   : > { %11279 = vrot.lane.b32.xlu0 %v13280_v35, %s11598_s18  ;;  %v7994_v35 = vld [vmem:[%s14644_s14 + $0x10] sm:$0xff] }
 0x666   : > { %9979 = vmatmul.mubr.msk.f32.gmra.mrb[84].mxu1 %vm4750_vm15, %v13482_v13 }
 0x667   : > { %7075 = vmatprep.mubr.f32.mxu1 %v14688_v29  ;;  %9974 = vmatmul.mubr.msk.f32.gmra.mrb[82].mxu0 %vm4750_vm15, %v13439_v43 }
 0x668   : > { %11304 = vrot.lane.b32.xlu1 %v11293_v11, %s11598_s18  ;;  %6980 = vmatprep.mubr.f32.mxu0 %v14688_v29 }
 0x669   : > { %11289 = vrot.lane.b32.xlu0 %v13272_v34, %s11598_s18  ;;  %v7992_v34 = vld [vmem:[%s14644_s14] sm:$0xff] }
 0x66a   : > { %9980 = vmatmul.mubr.msk.f32.gmra.mrb[86].mxu1 %vm4750_vm15, %v9964_v32 }
 0x66b   : > { %7247 = vmatprep.mubr.f32.mxu1 %v14688_v29  ;;  %9975 = vmatmul.mubr.msk.f32.gmra.mrb[84].mxu0 %vm4750_vm15, %v13482_v13 }
 0x66c   : > { %11314 = vrot.lane.b32.xlu1 %v13314_v41, %s11598_s18  ;;  %6986 = vmatprep.mubr.f32.mxu0 %v14688_v29  ;;  %v7993_v41 = vld [vmem:[%s14644_s14 + $0x8] sm:$0xff] }
 0x66d   : > { %11299 = vrot.lane.b32.xlu0 %v13352_v24, %s11598_s18 }
 0x66f   : > { %9976 = vmatmul.mubr.msk.f32.gmra.mrb[86].mxu0 %vm4750_vm15, %v9964_v32 }
 0x670   : > { %11324 = vrot.lane.b32.xlu1 %v13428_v2, %s11598_s18  ;;  %7158 = vmatprep.mubr.f32.mxu0 %v14688_v29 }
 0x671   : > { %11309 = vrot.lane.b32.xlu0 %v13338_v0, %s11598_s18  ;;  %v7995_v0 = vld [vmem:[%s14644_s14 + $0x18] sm:$0xff] }
 0x674   : > { %11334 = vrot.lane.b32.xlu1 %v13384_v62, %s11598_s18 }
 0x675   : > { %11319 = vrot.lane.b32.xlu0 %v13342_v20, %s11598_s18 }
 0x678   : > { %11344 = vrot.lane.b32.xlu1 %v11258_v26, %s11598_s18 }
 0x679   : > { %11329 = vrot.lane.b32.xlu0 %v13416_v46, %s11598_s18 }
 0x67c   : > { %11354 = vrot.lane.b32.xlu1 %v11268_v3, %s11598_s18 }
 0x67d   : > { %11339 = vrot.lane.b32.xlu0 %v13465_v14, %s11598_s18 }
 0x680   : > { %7998 = vperm.xlu1 %10882, %v7992_v34  }
 0x681   : > { %11349 = vrot.lane.b32.xlu0 %v13495_v21, %s11598_s18 }
 0x684   : > { %8008 = vperm.xlu1 %10882, %v7994_v35  }
 0x685   : > { %11359 = vrot.lane.b32.xlu0 %v11273_v51, %s11598_s18 }
 0x689   : > { %8003 = vperm.xlu0 %10881, %v7993_v41  }
 0x68d   : > { %8013 = vperm.xlu0 %10881, %v7995_v0  }
 0x6ae   : > { %v11205_v20 = vpop.permute.xlu1 %11204 }
 0x6af   : > { %v11207_v24 = vunpack.i.h.bf16 %v11205_v20  ;;  %v11206_v62 = vunpack.i.l.bf16 %v11205_v20  ;;  %v13608_v23 = vpop.permute.xlu0 %11209 }
 0x6b0   : > { %v11212_v46 = vunpack.i.h.bf16 %v13608_v23  ;;  %v11211_v2 = vunpack.i.l.bf16 %v13608_v23 }
 0x6b2   : > { %v6649_v43 = vsel %vm6632_vm0, %v11206_v62, %v11211_v2  ;;  %v6650_v14 = vsel %vm6632_vm0, %v11207_v24, %v11212_v46 }
 0x6b3   : > { %v11220_v6 = vpop.permute.xlu1 %11219  ;;  %v10354_v13 = vpack.c.bf16 %v6650_v14, %v6649_v43 }
 0x6b4   : > { %v11222_v31 = vunpack.i.h.bf16 %v11220_v6  ;;  %v11221_v37 = vunpack.i.l.bf16 %v11220_v6 }
 0x6b5   : > { %10355 = vmatprep.subr.bf16.mxu1 %v10354_v13 }
 0x6b6   : > { %v6654_v17 = vsel %vm6632_vm0, %v11222_v31, %v11207_v24  ;;  %v6653_v21 = vsel %vm6632_vm0, %v11221_v37, %v11206_v62  ;;  %v11215_v52 = vpop.permute.xlu0 %11214 }
 0x6b7   : > { %v10356_v16 = vpack.c.bf16 %v6654_v17, %v6653_v21  ;;  %v11217_v26 = vunpack.i.h.bf16 %v11215_v52  ;;  %v11216_v59 = vunpack.i.l.bf16 %v11215_v52  ;;  %v13624_v32 = vpop.permute.xlu1 %11224 }
 0x6b8   : > { %v11227_v3 = vunpack.i.h.bf16 %v13624_v32  ;;  %v11226_v54 = vunpack.i.l.bf16 %v13624_v32 }
 0x6b9   : > { %10357 = vmatpush1.bf16.msra.mxu1 %v10356_v16 }
 0x6ba   : > { %v6651_v4 = vsel %vm6632_vm0, %v11216_v59, %v11226_v54  ;;  %v6652_v60 = vsel %vm6632_vm0, %v11217_v26, %v11227_v3 }
 0x6bb   : > { %v11230_v11 = vpop.permute.xlu1 %11229  ;;  %v10358_v34 = vpack.c.bf16 %v6652_v60, %v6651_v4 }
 0x6bc   : > { %v11235_v51 = vpop.permute.xlu0 %11234  ;;  %v11232_v0 = vunpack.i.h.bf16 %v11230_v11  ;;  %v11231_v20 = vunpack.i.l.bf16 %v11230_v11 }
 0x6bd   : > { %v11237_v35 = vunpack.i.h.bf16 %v11235_v51  ;;  %v11236_v41 = vunpack.i.l.bf16 %v11235_v51  ;;  %10359 = vmatprep.subr.bf16.mxu1 %v10358_v34 }
 0x6be   : > { %v6657_v43 = vsel %vm6632_vm0, %v11231_v20, %v11221_v37  ;;  %v6658_v14 = vsel %vm6632_vm0, %v11232_v0, %v11222_v31 }
 0x6bf   : > { %v6656_v24 = vsel %vm6632_vm0, %v11237_v35, %v11217_v26  ;;  %v6655_v62 = vsel %vm6632_vm0, %v11236_v41, %v11216_v59  ;;  %v10344_v17 = vpack.c.bf16 %v6658_v14, %v6657_v43  ;;  %v13648_v26 = vld [vmem:[%s14643_s13] sm:$0xff] }
 0x6c0   : > { %v10360_v6 = vpack.c.bf16 %v6656_v24, %v6655_v62 }
 0x6c1   : > { %v11240_v13 = vpop.permute.xlu0 %11239  ;;  %v11245_v16 = vpop.permute.xlu1 %11244  ;;  %10345 = vmatprep.subr.bf16.mxu0 %v10344_v17 }
 0x6c2   : > { %v11242_v21 = vunpack.i.h.bf16 %v11240_v13  ;;  %v11241_v52 = vunpack.i.l.bf16 %v11240_v13  ;;  %v11247_v4 = vunpack.i.h.bf16 %v11245_v16  ;;  %v11246_v60 = vunpack.i.l.bf16 %v11245_v16  ;;  %10361 = vmatpush1.bf16.msra.mxu1 %v10360_v6 }
 0x6c4   : > { %v6661_v31 = vsel %vm6632_vm0, %v11246_v60, %v11231_v20  ;;  %v6662_v37 = vsel %vm6632_vm0, %v11247_v4, %v11232_v0  ;;  %v6633_v51 = vsel %vm6632_vm0, %v11241_v52, %v11246_v60  ;;  %v6634_v11 = vsel %vm6632_vm0, %v11242_v21, %v11247_v4  ;;  %v13668_v0 = vld [vmem:[%s14643_s13 + $0x8] sm:$0xff] }
 0x6c5   : > { %v10346_v34 = vpack.c.bf16 %v6662_v37, %v6661_v31  ;;  %v10370_v62 = vpack.c.bf16 %v6634_v11, %v6633_v51  ;;  %9989 = vmatmul.mubr.msk.f32.vlgmr.msra.gmra.mrb[72].mxu1 %vm4750_vm15, %v13648_v26  ;;  %v13682_v51 = vld [vmem:[%s14643_s13 + $0x10] sm:$0xff] }
 0x6c6   : > { %v11250_v24 = vpop.permute.xlu1 %11249  ;;  %7253 = vmatprep.mubr.f32.mxu1 %v14688_v29 }
 0x6c7   : > { %v11252_v20 = vunpack.i.h.bf16 %v11250_v24  ;;  %v11251_v43 = vunpack.i.l.bf16 %v11250_v24  ;;  %10348 = vmatpush1.bf16.msk.msra.mxu0 %vm13654_vm2, %v10346_v34  ;;  %10371 = vmatprep.subr.bf16.mxu1 %v10370_v62 }
 0x6c9   : > { %v6659_v6 = vsel %vm6632_vm0, %v11251_v43, %v11236_v41  ;;  %v6660_v13 = vsel %vm6632_vm0, %v11252_v20, %v11237_v35  ;;  %9990 = vmatmul.mubr.msk.f32.gmra.mrb[74].mxu1 %vm4750_vm15, %v13668_v0 }
 0x6ca   : > { %v11260_v4 = vpop.permute.xlu1 %11259  ;;  %v10349_v60 = vpack.c.bf16 %v6660_v13, %v6659_v6  ;;  %7259 = vmatprep.mubr.f32.mxu1 %v14688_v29 }
 0x6cb   : > { %v11255_v14 = vpop.permute.xlu0 %11254  ;;  %v11262_v31 = vunpack.i.h.bf16 %v11260_v4  ;;  %v11261_v37 = vunpack.i.l.bf16 %v11260_v4 }
 0x6cc   : > { %v11257_v17 = vunpack.i.h.bf16 %v11255_v14  ;;  %v11256_v16 = vunpack.i.l.bf16 %v11255_v14  ;;  %10350 = vmatprep.subr.bf16.mxu0 %v10349_v60 }
 0x6cd   : > { %v6663_v35 = vsel %vm6632_vm0, %v11261_v37, %v11251_v43  ;;  %v6664_v11 = vsel %vm6632_vm0, %v11262_v31, %v11252_v20  ;;  %9991 = vmatmul.mubr.msk.f32.gmra.mrb[76].mxu1 %vm4750_vm15, %v13682_v51 }
 0x6ce   : > { %v10351_v62 = vpack.c.bf16 %v6664_v11, %v6663_v35  ;;  %v11265_v14 = vpop.permute.xlu1 %11264  ;;  %v6635_v6 = vsel %vm6632_vm0, %v11256_v16, %v11261_v37  ;;  %v6636_v13 = vsel %vm6632_vm0, %v11257_v17, %v11262_v31  ;;  %7265 = vmatprep.mubr.f32.mxu1 %v14688_v29 }
 0x6cf   : > { %v11270_v41 = vpop.permute.xlu0 %11269  ;;  %v11267_v20 = vunpack.i.h.bf16 %v11265_v14  ;;  %v11266_v60 = vunpack.i.l.bf16 %v11265_v14  ;;  %v10374_v11 = vpack.c.bf16 %v6636_v13, %v6635_v6  ;;  %v13712_v14 = vld [vmem:[%s14643_s13 + $0x18] sm:$0xff] }
 0x6d0   : > { %v11272_v34 = vunpack.i.h.bf16 %v11270_v41  ;;  %v11271_v24 = vunpack.i.l.bf16 %v11270_v41  ;;  %10353 = vmatpush1.bf16.msk.msra.mxu0 %vm13654_vm2, %v10351_v62 }
 0x6d1   : > { %v6646_v31 = vsel %vm6632_vm0, %v11212_v46, %v11267_v20  ;;  %9992 = vmatmul.mubr.msk.f32.gmra.mrb[78].mxu1 %vm4750_vm15, %v13712_v14 }
 0x6d2   : > { %v6637_v4 = vsel %vm6632_vm0, %v11271_v24, %v11241_v52  ;;  %v6638_v43 = vsel %vm6632_vm0, %v11272_v34, %v11242_v21  ;;  %v6645_v21 = vsel %vm6632_vm0, %v11211_v2, %v11266_v60  ;;  %v13714_v62 = vpop.permute.xlu1 %11284  ;;  %v6641_v6 = vsel %vm6632_vm0, %v11266_v60, %v11271_v24  ;;  %7425 = vmatprep.mubr.f32.mxu1 %v14688_v29 }
 0x6d3   : > { %v10372_v41 = vpack.c.bf16 %v6638_v43, %v6637_v4  ;;  %v11275_v35 = vpop.permute.xlu0 %11274  ;;  %v6642_v46 = vsel %vm6632_vm0, %v11267_v20, %v11272_v34  ;;  %v10364_v23 = vpack.c.bf16 %v6646_v31, %v6645_v21  ;;  %9985 = vmatmul.mubr.msk.f32.vlgmr.msra.gmra.mrb[72].mxu0 %vm4750_vm15, %v13648_v26  ;;  %v11287_v34 = vunpack.i.h.bf16 %v13714_v62 }
 0x6d4   : > { %v11277_v52 = vunpack.i.h.bf16 %v11275_v35  ;;  %v11276_v37 = vunpack.i.l.bf16 %v11275_v35  ;;  %v10362_v43 = vpack.c.bf16 %v6642_v46, %v6641_v6  ;;  %7164 = vmatprep.mubr.f32.mxu0 %v14688_v29 }
 0x6d5   : > { %10373 = vmatpush1.bf16.msra.mxu1 %v10372_v41 }
 0x6d6   : > { %v6640_v2 = vsel %vm6632_vm0, %v11277_v52, %v11257_v17  ;;  %v6639_v13 = vsel %vm6632_vm0, %v11276_v37, %v11256_v16  ;;  %10375 = vmatprep.subr.bf16.mxu1 %v10374_v11  ;;  %v11286_v17 = vunpack.i.l.bf16 %v13714_v62  ;;  %10363 = vmatprep.subr.bf16.mxu0 %v10362_v43  ;;  %v11295_v20 = vpop.permute.xlu1 %11294 }
 0x6d7   : > { %v10376_v4 = vpack.c.bf16 %v6640_v2, %v6639_v13  ;;  %v11280_v41 = vpop.permute.xlu0 %11279  ;;  %10365 = vmatpush1.bf16.msra.mxu0 %v10364_v23  ;;  %v11297_v60 = vunpack.i.h.bf16 %v11295_v20  ;;  %v11296_v35 = vunpack.i.l.bf16 %v11295_v20 }
 0x6d8   : > { %v11282_v24 = vunpack.i.h.bf16 %v11280_v41  ;;  %v11281_v16 = vunpack.i.l.bf16 %v11280_v41  ;;  %9986 = vmatmul.mubr.msk.f32.gmra.mrb[74].mxu0 %vm4750_vm15, %v13668_v0 }
 0x6d9   : > { %10377 = vmatpush1.bf16.msra.mxu1 %v10376_v4  ;;  %v6648_v46 = vsel %vm6632_vm0, %v11227_v3, %v11297_v60  ;;  %v6647_v23 = vsel %vm6632_vm0, %v11226_v54, %v11296_v35  ;;  %7170 = vmatprep.mubr.f32.mxu0 %v14688_v29  ;;  %v6643_v43 = vsel %vm6632_vm0, %v11296_v35, %v11276_v37 }
 0x6da   : > { %v7527_v11 = vsel %vm7514_vm3, %v11281_v16, %v11286_v17  ;;  %v7528_v31 = vsel %vm7514_vm3, %v11282_v24, %v11287_v34  ;;  %v13754_v4 = vpop.permute.xlu1 %11304  ;;  %v6644_v3 = vsel %vm6632_vm0, %v11297_v60, %v11277_v52  ;;  %v10368_v32 = vpack.c.bf16 %v6648_v46, %v6647_v23 }
 0x6db   : > { %v11290_v21 = vpop.permute.xlu0 %11289  ;;  %v10386_v6 = vpack.c.bf16 %v7528_v31, %v7527_v11  ;;  %v10366_v11 = vpack.c.bf16 %v6644_v3, %v6643_v43  ;;  %v11307_v37 = vunpack.i.h.bf16 %v13754_v4  ;;  %v14653_v35 = vunpack.i.l.bf16 %v13754_v4 }
 0x6dc   : > { %v11292_v2 = vunpack.i.h.bf16 %v11290_v21  ;;  %v11291_v13 = vunpack.i.l.bf16 %v11290_v21  ;;  %9997 = vmatmul.mubr.msk.f32.vlgmr.msra.gmra.mrb[80].mxu1 %vm4750_vm15, %v13648_v26  ;;  %9987 = vmatmul.mubr.msk.f32.gmra.mrb[76].mxu0 %vm4750_vm15, %v13682_v51 }
 0x6dd   : > { %10387 = vmatprep.subr.bf16.mxu1 %v10386_v6  ;;  %7431 = vmatprep.mubr.f32.mxu1 %v14688_v29 }
 0x6de   : > { %v7531_v54 = vsel %vm7514_vm3, %v11291_v13, %v11281_v16  ;;  %v7532_v41 = vsel %vm7514_vm3, %v11292_v2, %v11282_v24  ;;  %7176 = vmatprep.mubr.f32.mxu0 %v14688_v29  ;;  %10367 = vmatprep.subr.bf16.mxu0 %v10366_v11  ;;  %v11315_v16 = vpop.permute.xlu1 %11314 }
 0x6df   : > { %v10388_v20 = vpack.c.bf16 %v7532_v41, %v7531_v54  ;;  %v11300_v31 = vpop.permute.xlu0 %11299  ;;  %10369 = vmatpush1.bf16.msra.mxu0 %v10368_v32  ;;  %v11317_v24 = vunpack.i.h.bf16 %v11315_v16  ;;  %v11316_v21 = vunpack.i.l.bf16 %v11315_v16 }
 0x6e0   : > { %v11302_v52 = vunpack.i.h.bf16 %v11300_v31  ;;  %v11301_v60 = vunpack.i.l.bf16 %v11300_v31  ;;  %9998 = vmatmul.mubr.msk.f32.gmra.mrb[82].mxu1 %vm4750_vm15, %v13668_v0  ;;  %9988 = vmatmul.mubr.msk.f32.gmra.mrb[78].mxu0 %vm4750_vm15, %v13712_v14 }
 0x6e1   : > { %10389 = vmatpush1.bf16.msra.mxu1 %v10388_v20  ;;  %7437 = vmatprep.mubr.f32.mxu1 %v14688_v29  ;;  %v7535_v54 = vsel %vm7514_vm3, %v11316_v21, %v11291_v13  ;;  %v7536_v41 = vsel %vm7514_vm3, %v11317_v24, %v11292_v2 }
 0x6e2   : > { %v7529_v6 = vsel %vm7514_vm3, %v11301_v60, %v14653_v35  ;;  %v7530_v46 = vsel %vm7514_vm3, %v11302_v52, %v11307_v37  ;;  %7336 = vmatprep.mubr.f32.mxu0 %v14688_v29  ;;  %v11325_v20 = vpop.permute.xlu1 %11324  ;;  %v10378_v11 = vpack.c.bf16 %v7536_v41, %v7535_v54 }
 0x6e3   : > { %v11310_v23 = vpop.permute.xlu0 %11309  ;;  %v10390_v43 = vpack.c.bf16 %v7530_v46, %v7529_v6  ;;  %v11327_v2 = vunpack.i.h.bf16 %v11325_v20  ;;  %v11326_v13 = vunpack.i.l.bf16 %v11325_v20 }
 0x6e4   : > { %v11312_v3 = vunpack.i.h.bf16 %v11310_v23  ;;  %v11311_v32 = vunpack.i.l.bf16 %v11310_v23  ;;  %9999 = vmatmul.mubr.msk.f32.gmra.mrb[84].mxu1 %vm4750_vm15, %v13682_v51  ;;  %10379 = vmatprep.subr.bf16.mxu0 %v10378_v11 }
 0x6e5   : > { %10391 = vmatprep.subr.bf16.mxu1 %v10390_v43  ;;  %7443 = vmatprep.mubr.f32.mxu1 %v14688_v29 }
 0x6e6   : > { %v7533_v31 = vsel %vm7514_vm3, %v11311_v32, %v11301_v60  ;;  %v7534_v16 = vsel %vm7514_vm3, %v11312_v3, %v11302_v52  ;;  %9993 = vmatmul.mubr.msk.f32.vlgmr.msra.gmra.mrb[80].mxu0 %vm4750_vm15, %v13648_v26  ;;  %v11335_v60 = vpop.permute.xlu1 %11334  ;;  %v13805_v52 = vld [vmem:[%s14643_s13 + $0x40] sm:$0xff] }
 0x6e7   : > { %v10392_v6 = vpack.c.bf16 %v7534_v16, %v7533_v31  ;;  %v11320_v46 = vpop.permute.xlu0 %11319  ;;  %7342 = vmatprep.mubr.f32.mxu0 %v14688_v29  ;;  %v11337_v16 = vunpack.i.h.bf16 %v11335_v60 }
 0x6e8   : > { %v11322_v23 = vunpack.i.h.bf16 %v11320_v46  ;;  %v11321_v43 = vunpack.i.l.bf16 %v11320_v46  ;;  %10000 = vmatmul.mubr.msk.f32.gmra.mrb[86].mxu1 %vm4750_vm15, %v13712_v14 }
 0x6e9   : > { %10393 = vmatpush1.bf16.msra.mxu1 %v10392_v6  ;;  %7757 = vmatprep.mubr.f32.mxu1 %v14688_v29  ;;  %v11336_v6 = vunpack.i.l.bf16 %v11335_v60  ;;  %v7538_v60 = vsel %vm7514_vm3, %v11337_v16, %v11312_v3 }
 0x6ea   : > { %v7540_v40 = vsel %vm7514_vm3, %v11322_v23, %v11317_v24  ;;  %v7544_v26 = vsel %vm7514_vm3, %v11327_v2, %v11322_v23  ;;  %v7539_v54 = vsel %vm7514_vm3, %v11321_v43, %v11316_v21  ;;  %v7543_v41 = vsel %vm7514_vm3, %v11326_v13, %v11321_v43  ;;  %9994 = vmatmul.mubr.msk.f32.gmra.mrb[82].mxu0 %vm4750_vm15, %v13668_v0  ;;  %v11345_v21 = vpop.permute.xlu1 %11344  ;;  %v13833_v0 = vld [vmem:[%s14643_s13 + $0x48] sm:$0xff] }
 0x6eb   : > { %v10380_v11 = vpack.c.bf16 %v7540_v40, %v7539_v54  ;;  %v10402_v31 = vpack.c.bf16 %v7544_v26, %v7543_v41  ;;  %v11330_v46 = vpop.permute.xlu0 %11329  ;;  %7348 = vmatprep.mubr.f32.mxu0 %v14688_v29  ;;  %v7537_v43 = vsel %vm7514_vm3, %v11336_v6, %v11311_v32  ;;  %v11347_v3 = vunpack.i.h.bf16 %v11345_v21 }
 0x6ec   : > { %v11332_v24 = vunpack.i.h.bf16 %v11330_v46  ;;  %v11331_v23 = vunpack.i.l.bf16 %v11330_v46  ;;  %10009 = vmatmul.mubr.msk.f32.vlgmr.msra.gmra.mrb[72].mxu1 %vm4750_vm15, %v13805_v52  ;;  %v10382_v41 = vpack.c.bf16 %v7538_v60, %v7537_v43  ;;  %v11346_v32 = vunpack.i.l.bf16 %v11345_v21 }
 0x6ed   : > { %10381 = vmatpush1.bf16.msra.mxu0 %v10380_v11  ;;  %10404 = vmatprep.subr.msk.bf16.mxu1 %vm13815_vm5, %v10402_v31 }
 0x6ee   : > { %v7516_v40 = vsel %vm7514_vm3, %v11332_v24, %v11327_v2  ;;  %v7515_v26 = vsel %vm7514_vm3, %v11331_v23, %v11326_v13  ;;  %7763 = vmatprep.mubr.f32.mxu1 %v14688_v29  ;;  %9995 = vmatmul.mubr.msk.f32.gmra.mrb[84].mxu0 %vm4750_vm15, %v13682_v51  ;;  %v11355_v2 = vpop.permute.xlu1 %11354  ;;  %v13848_v13 = vld [vmem:[%s14643_s13 + $0x50] sm:$0xff] }
 0x6ef   : > { %v10405_v54 = vpack.c.bf16 %v7516_v40, %v7515_v26  ;;  %v11340_v11 = vpop.permute.xlu0 %11339  ;;  %7354 = vmatprep.mubr.f32.mxu0 %v14688_v29  ;;  %10383 = vmatprep.subr.bf16.mxu0 %v10382_v41  ;;  %v11356_v41 = vunpack.i.l.bf16 %v11355_v2 }
 0x6f0   : > { %v11342_v31 = vunpack.i.h.bf16 %v11340_v11  ;;  %v11341_v46 = vunpack.i.l.bf16 %v11340_v11  ;;  %10010 = vmatmul.mubr.msk.f32.gmra.mrb[74].mxu1 %vm4750_vm15, %v13833_v0 }
 0x6f1   : > { %10406 = vmatpush1.bf16.msra.mxu1 %v10405_v54  ;;  %7769 = vmatprep.mubr.f32.mxu1 %v14688_v29  ;;  %v11357_v54 = vunpack.i.h.bf16 %v11355_v2 }
 0x6f2   : > { %v7542_v51 = vsel %vm7514_vm3, %v11342_v31, %v11337_v16  ;;  %v7546_v21 = vsel %vm7514_vm3, %v11347_v3, %v11342_v31  ;;  %v7541_v43 = vsel %vm7514_vm3, %v11341_v46, %v11336_v6  ;;  %v7545_v60 = vsel %vm7514_vm3, %v11346_v32, %v11341_v46  ;;  %9996 = vmatmul.mubr.msk.f32.gmra.mrb[86].mxu0 %vm4750_vm15, %v13712_v14  ;;  %v10004_v46 = vld [vmem:[%s14643_s13 + $0x58] sm:$0xff] }
 0x6f3   : > { %v10384_v40 = vpack.c.bf16 %v7542_v51, %v7541_v43  ;;  %v10407_v26 = vpack.c.bf16 %v7546_v21, %v7545_v60  ;;  %v11350_v11 = vpop.permute.xlu0 %11349  ;;  %7668 = vmatprep.mubr.f32.mxu0 %v14688_v29  ;;  %v7523_v6 = vsel %vm7514_vm3, %v11286_v17, %v11356_v41  ;;  %v7524_v31 = vsel %vm7514_vm3, %v11287_v34, %v11357_v54 }
 0x6f4   : > { %v11352_v16 = vunpack.i.h.bf16 %v11350_v11  ;;  %v11351_v35 = vunpack.i.l.bf16 %v11350_v11  ;;  %10011 = vmatmul.mubr.msk.f32.gmra.mrb[76].mxu1 %vm4750_vm15, %v13848_v13  ;;  %v7519_v14 = vsel %vm7514_vm3, %v11356_v41, %v11331_v23  ;;  %v7520_v34 = vsel %vm7514_vm3, %v11357_v54, %v11332_v24 }
 0x6f5   : > { %10385 = vmatpush1.bf16.msra.mxu0 %v10384_v40  ;;  %10409 = vmatprep.subr.msk.bf16.mxu1 %vm13815_vm5, %v10407_v26  ;;  %v10394_v51 = vpack.c.bf16 %v7520_v34, %v7519_v14  ;;  %v10396_v43 = vpack.c.bf16 %v7524_v31, %v7523_v6 }
 0x6f6   : > { %v7518_v2 = vsel %vm7514_vm3, %v11352_v16, %v11347_v3  ;;  %v7517_v62 = vsel %vm7514_vm3, %v11351_v35, %v11346_v32  ;;  %7775 = vmatprep.mubr.f32.mxu1 %v14688_v29  ;;  %v14702_v3 = vunpack.i.l.bf16 %v13754_v4 }
 0x6f7   : > { %v10410_v17 = vpack.c.bf16 %v7518_v2, %v7517_v62  ;;  %v11360_v21 = vpop.permute.xlu0 %11359  ;;  %10395 = vmatprep.subr.bf16.mxu0 %v10394_v51 }
 0x6f8   : > { %v11362_v23 = vunpack.i.h.bf16 %v11360_v21  ;;  %v11361_v60 = vunpack.i.l.bf16 %v11360_v21  ;;  %10005 = vmatmul.mubr.msk.f32.vlgmr.msra.gmra.mrb[72].mxu0 %vm4750_vm15, %v13805_v52  ;;  %10012 = vmatmul.mubr.msk.f32.gmra.mrb[78].mxu1 %vm4750_vm15, %v10004_v46 }
 0x6f9   : > { %10411 = vmatpush1.bf16.msra.mxu1 %v10410_v17  ;;  %10397 = vmatpush1.bf16.msra.mxu0 %v10396_v43 }
 0x6fa   : > { %v7526_v24 = vsel %vm7514_vm3, %v11307_v37, %v11362_v23  ;;  %v7525_v32 = vsel %vm7514_vm3, %v14702_v3, %v11361_v60  ;;  %7674 = vmatprep.mubr.f32.mxu0 %v14688_v29  ;;  %v7521_v40 = vsel %vm7514_vm3, %v11361_v60, %v11351_v35  ;;  %7935 = vmatprep.mubr.f32.mxu1 %v14688_v29 }
 0x6fb   : > { %v10400_v26 = vpack.c.bf16 %v7526_v24, %v7525_v32  ;;  %v7522_v54 = vsel %vm7514_vm3, %v11362_v23, %v11352_v16 }
 0x6fc   : > { %10006 = vmatmul.mubr.msk.f32.gmra.mrb[74].mxu0 %vm4750_vm15, %v13833_v0  ;;  %10021 = vmatmul.mubr.msk.f32.vlgmr.msra.gmra.mrb[80].mxu1 %vm4750_vm15, %v13805_v52  ;;  %v10398_v4 = vpack.c.bf16 %v7522_v54, %v7521_v40 }
 0x6fd   : > { %7680 = vmatprep.mubr.f32.mxu0 %v14688_v29  ;;  %7941 = vmatprep.mubr.f32.mxu1 %v14688_v29 }
 0x6fe   : > { %10399 = vmatprep.subr.bf16.mxu0 %v10398_v4 }
 0x6ff   : > { %10401 = vmatpush1.bf16.msra.mxu0 %v10400_v26 }
 0x700   : > { %10007 = vmatmul.mubr.msk.f32.gmra.mrb[76].mxu0 %vm4750_vm15, %v13848_v13  ;;  %10022 = vmatmul.mubr.msk.f32.gmra.mrb[82].mxu1 %vm4750_vm15, %v13833_v0 }
 0x701   : > { %7686 = vmatprep.mubr.f32.mxu0 %v14688_v29  ;;  %7947 = vmatprep.mubr.f32.mxu1 %v14688_v29 }
 0x704   : > { %10008 = vmatmul.mubr.msk.f32.gmra.mrb[78].mxu0 %vm4750_vm15, %v10004_v46  ;;  %10023 = vmatmul.mubr.msk.f32.gmra.mrb[84].mxu1 %vm4750_vm15, %v13848_v13 }
 0x705   : > { %7846 = vmatprep.mubr.f32.mxu0 %v14688_v29  ;;  %7953 = vmatprep.mubr.f32.mxu1 %v14688_v29 }
 0x708   : > { %10013 = vmatmul.mubr.msk.f32.vlgmr.msra.gmra.mrb[80].mxu0 %vm4750_vm15, %v13805_v52  ;;  %10024 = vmatmul.mubr.msk.f32.gmra.mrb[86].mxu1 %vm4750_vm15, %v10004_v46  ;;  %v13933_v52 = vpop.permute.xlu1 %7998  ;;  %v13936_v11 = vpop.permute.xlu0 %8003 }
 0x709   : > { %7852 = vmatprep.mubr.f32.mxu0 %v14688_v29  ;;  %8382 = vmatprep.mubr.f32.mxu1 %v14688_v29 }
 0x70c   : > { %10014 = vmatmul.mubr.msk.f32.gmra.mrb[82].mxu0 %vm4750_vm15, %v13833_v0  ;;  %v13943_v43 = vpop.permute.xlu1 %8008  ;;  %v13947_v24 = vpop.permute.xlu0 %8013 }
 0x70d   : > { %7858 = vmatprep.mubr.f32.mxu0 %v14688_v29 }
 0x710   : > { %10015 = vmatmul.mubr.msk.f32.gmra.mrb[84].mxu0 %vm4750_vm15, %v13848_v13 }
 0x711   : > { %7864 = vmatprep.mubr.f32.mxu0 %v14688_v29 }
 0x714   : > { %10016 = vmatmul.mubr.msk.f32.gmra.mrb[86].mxu0 %vm4750_vm15, %v10004_v46 }
 0x715   : > { %8293 = vmatprep.mubr.f32.mxu0 %v14688_v29 }
 0x7bf   : > { %v7759_v37 = vpop.f32.mrb[72].mxu1 }
 0x7c0   : > { %v7761_v35 = vpop.f32.mrb[73].mxu1  ;;  %v8018_v41 = vadd.f32 %v13933_v52, %v7759_v37 }
 0x7c1   : > { %v8019_v0 = vadd.f32 %v13933_v52, %v7761_v35 }
 0x7c2   : > { %v8050_v14 = vmax.f32 %v8018_v41, 0.0 }
 0x7c3   : > { %v7765_v16 = vpop.f32.mrb[74].mxu1  ;;  %v8051_v2 = vmax.f32 %v8019_v0, 0.0 }
 0x7c4   : > { %v8026_v6 = vadd.f32 %v13936_v11, %v7765_v16  ;;  %v7767_v13 = vpop.f32.mrb[75].mxu1 }
 0x7c5   : > { %v8027_v31 = vadd.f32 %v13936_v11, %v7767_v13 }
 0x7c6   : > { %v8058_v46 = vmax.f32 %v8026_v6, 0.0 }
 0x7c7   : > { %v8059_v62 = vmax.f32 %v8027_v31, 0.0  ;;  %v7771_v34 = vpop.f32.mrb[76].mxu1 }
 0x7c8   : > { %v13941_v17 = vpack.i.bf16 %v8058_v46, %v8050_v14  ;;  %v10422_v51 = vpack.c.bf16 %v8058_v46, %v8050_v14  ;;  %v7773_v21 = vpop.f32.mrb[77].mxu1  ;;  %v8034_v3 = vadd.f32 %v13943_v43, %v7771_v34 }
 0x7c9   : > { %v13945_v23 = vpack.i.bf16 %v8059_v62, %v8051_v2  ;;  %v10420_v60 = vpack.c.bf16 %v8059_v62, %v8051_v2  ;;  %v8035_v32 = vadd.f32 %v13943_v43, %v7773_v21 }
 0x7ca   : > { %11364 = vrot.lane.b32.xlu1 %v13941_v17, %s11597_s2  ;;  %v8066_v41 = vmax.f32 %v8034_v3, 0.0 }
 0x7cb   : > { %11374 = vrot.lane.b32.xlu0 %v13945_v23, %s11597_s2  ;;  %v7670_v40 = vpop.f32.mrb[72].mxu0  ;;  %v7777_v26 = vpop.f32.mrb[78].mxu1  ;;  %10421 = vmatprep.subr.bf16.mxu1 %v10420_v60  ;;  %v8067_v6 = vmax.f32 %v8035_v32, 0.0 }
 0x7cc   : > { %v8042_v54 = vadd.f32 %v13947_v24, %v7777_v26  ;;  %v7672_v4 = vpop.f32.mrb[73].mxu0  ;;  %v7779_v37 = vpop.f32.mrb[79].mxu1  ;;  %10423 = vmatpush1.bf16.msra.mxu1 %v10422_v51  ;;  %v8016_v0 = vadd.f32 %v13933_v52, %v7670_v40 }
 0x7cd   : > { %v8043_v35 = vadd.f32 %v13947_v24, %v7779_v37  ;;  %v8017_v13 = vadd.f32 %v13933_v52, %v7672_v4 }
 0x7ce   : > { %v8074_v16 = vmax.f32 %v8042_v54, 0.0  ;;  %v8048_v26 = vmax.f32 %v8016_v0, 0.0 }
 0x7cf   : > { %v8075_v31 = vmax.f32 %v8043_v35, 0.0  ;;  %v7676_v14 = vpop.f32.mrb[74].mxu0  ;;  %v7937_v46 = vpop.f32.mrb[80].mxu1  ;;  %v8049_v32 = vmax.f32 %v8017_v13, 0.0 }
 0x7d0   : > { %v13959_v2 = vpack.i.bf16 %v8074_v16, %v8066_v41  ;;  %v10426_v62 = vpack.c.bf16 %v8074_v16, %v8066_v41  ;;  %v8024_v34 = vadd.f32 %v13936_v11, %v7676_v14  ;;  %v7678_v21 = vpop.f32.mrb[75].mxu0  ;;  %v7939_v60 = vpop.f32.mrb[81].mxu1  ;;  %v8022_v4 = vadd.f32 %v13933_v52, %v7937_v46 }
 0x7d1   : > { %v13962_v51 = vpack.i.bf16 %v8075_v31, %v8067_v6  ;;  %v8025_v3 = vadd.f32 %v13936_v11, %v7678_v21  ;;  %v10424_v54 = vpack.c.bf16 %v8075_v31, %v8067_v6  ;;  %v8023_v16 = vadd.f32 %v13933_v52, %v7939_v60  ;;  %v13975_v6 = vld [vmem:[%s14645_s15 + $0x20] sm:$0xff] }
 0x7d2   : > { %v8056_v40 = vmax.f32 %v8024_v34, 0.0  ;;  %v8054_v34 = vmax.f32 %v8022_v4, 0.0 }
 0x7d3   : > { %v8057_v37 = vmax.f32 %v8025_v3, 0.0  ;;  %v7682_v35 = vpop.f32.mrb[76].mxu0  ;;  %v7943_v44 = vpop.f32.mrb[82].mxu1  ;;  %10425 = vmatprep.subr.bf16.mxu1 %v10424_v54 }
 0x7d4   : > { %v13966_v33 = vpack.i.bf16 %v8056_v40, %v8048_v26  ;;  %v10414_v41 = vpack.c.bf16 %v8056_v40, %v8048_v26  ;;  %v7684_v14 = vpop.f32.mrb[77].mxu0  ;;  %v7945_v63 = vpop.f32.mrb[83].mxu1  ;;  %v8030_v0 = vadd.f32 %v13936_v11, %v7943_v44  ;;  %10427 = vmatpush1.bf16.msra.mxu1 %v10426_v62  ;;  %v8032_v13 = vadd.f32 %v13943_v43, %v7682_v35 }
 0x7d5   : > { %v13969_v55 = vpack.i.bf16 %v8057_v37, %v8049_v32  ;;  %v8031_v31 = vadd.f32 %v13936_v11, %v7945_v63  ;;  %v10412_v46 = vpack.c.bf16 %v8057_v37, %v8049_v32  ;;  %v8033_v60 = vadd.f32 %v13943_v43, %v7684_v14 }
 0x7d6   : > { %11369 = vrot.lane.b32.xlu1 %v13966_v33, %s11597_s2  ;;  %v8062_v21 = vmax.f32 %v8030_v0, 0.0  ;;  %v8055_v62 = vmax.f32 %v8023_v16, 0.0  ;;  %v13994_v16 = vld [vmem:[%s14645_s15 + $0x28] sm:$0xff]  ;;  %v8064_v14 = vmax.f32 %v8032_v13, 0.0 }
 0x7d7   : > { %v7949_v3 = vpop.f32.mrb[84].mxu1  ;;  %11379 = vrot.lane.b32.xlu0 %v13969_v55, %s11597_s2  ;;  %v7688_v44 = vpop.f32.mrb[78].mxu0  ;;  %v8063_v26 = vmax.f32 %v8031_v31, 0.0  ;;  %10413 = vmatprep.subr.bf16.mxu0 %v10412_v46  ;;  %v8065_v46 = vmax.f32 %v8033_v60, 0.0 }
 0x7d8   : > { %v8038_v40 = vadd.f32 %v13943_v43, %v7949_v3  ;;  %v8040_v54 = vadd.f32 %v13947_v24, %v7688_v44  ;;  %v7690_v63 = vpop.f32.mrb[79].mxu0  ;;  %v7951_v35 = vpop.f32.mrb[85].mxu1  ;;  %10033 = vmatmul.mubr.msk.f32.vlgmr.msra.gmra.mrb[88].mxu1 %vm4750_vm15, %v13975_v6  ;;  %v13988_v32 = vpack.i.bf16 %v8062_v21, %v8054_v34  ;;  %v10438_v4 = vpack.c.bf16 %v8062_v21, %v8054_v34 }
 0x7d9   : > { %v8041_v37 = vadd.f32 %v13947_v24, %v7690_v63  ;;  %10415 = vmatpush1.bf16.msra.mxu0 %v10414_v41  ;;  %v13996_v0 = vpack.i.bf16 %v8063_v26, %v8055_v62  ;;  %8388 = vmatprep.mubr.f32.mxu1 %v14688_v29  ;;  %v8039_v44 = vadd.f32 %v13943_v43, %v7951_v35 }
 0x7da   : > { %v8072_v31 = vmax.f32 %v8040_v54, 0.0  ;;  %v10436_v34 = vpack.c.bf16 %v8063_v26, %v8055_v62  ;;  %v8070_v60 = vmax.f32 %v8038_v40, 0.0  ;;  %v14014_v26 = vld [vmem:[%s14645_s15 + $0x30] sm:$0xff] }
 0x7db   : > { %v8073_v3 = vmax.f32 %v8041_v37, 0.0  ;;  %v7955_v47 = vpop.f32.mrb[86].mxu1  ;;  %11384 = vrot.lane.b32.xlu0 %v13959_v2, %s11597_s2  ;;  %v7848_v41 = vpop.f32.mrb[80].mxu0 }
 0x7dc   : > { %v14002_v21 = vpack.i.bf16 %v8072_v31, %v8064_v14  ;;  %v10418_v63 = vpack.c.bf16 %v8072_v31, %v8064_v14  ;;  %v8046_v13 = vadd.f32 %v13947_v24, %v7955_v47  ;;  %v7850_v18 = vpop.f32.mrb[81].mxu0  ;;  %v7957_v53 = vpop.f32.mrb[87].mxu1  ;;  %10034 = vmatmul.mubr.msk.f32.gmra.mrb[90].mxu1 %vm4750_vm15, %v13994_v16  ;;  %10437 = vmatprep.subr.bf16.mxu1 %v10436_v34 }
 0x7dd   : > { %v14007_v54 = vpack.i.bf16 %v8073_v3, %v8065_v46  ;;  %v8020_v62 = vadd.f32 %v13933_v52, %v7848_v41  ;;  %8394 = vmatprep.mubr.f32.mxu1 %v14688_v29  ;;  %v8021_v47 = vadd.f32 %v13933_v52, %v7850_v18  ;;  %v8047_v37 = vadd.f32 %v13947_v24, %v7957_v53 }
 0x7de   : > { %v8078_v35 = vmax.f32 %v8046_v13, 0.0  ;;  %10439 = vmatpush1.bf16.msra.mxu1 %v10438_v4  ;;  %v10416_v14 = vpack.c.bf16 %v8073_v3, %v8065_v46  ;;  %v8071_v18 = vmax.f32 %v8039_v44, 0.0  ;;  %v14032_v46 = vld [vmem:[%s14645_s15 + $0x38] sm:$0xff] }
 0x7df   : > { %11389 = vrot.lane.b32.xlu0 %v14002_v21, %s11597_s2  ;;  %11394 = vrot.lane.b32.xlu1 %v14007_v54, %s11597_s2  ;;  %v7854_v40 = vpop.f32.mrb[82].mxu0  ;;  %v8079_v52 = vmax.f32 %v8047_v37, 0.0  ;;  %v8052_v3 = vmax.f32 %v8020_v62, 0.0  ;;  %v8053_v13 = vmax.f32 %v8021_v47, 0.0 }
 0x7e0   : > { %v14022_v31 = vpack.i.bf16 %v8078_v35, %v8070_v60  ;;  %v10442_v34 = vpack.c.bf16 %v8078_v35, %v8070_v60  ;;  %10417 = vmatprep.subr.bf16.mxu0 %v10416_v14  ;;  %v7856_v41 = vpop.f32.mrb[83].mxu0  ;;  %10035 = vmatmul.mubr.msk.f32.gmra.mrb[92].mxu1 %vm4750_vm15, %v14014_v26  ;;  %v8028_v53 = vadd.f32 %v13936_v11, %v7854_v40 }
 0x7e1   : > { %v8029_v4 = vadd.f32 %v13936_v11, %v7856_v41  ;;  %10419 = vmatpush1.bf16.msra.mxu0 %v10418_v63  ;;  %8400 = vmatprep.mubr.f32.mxu1 %v14688_v29  ;;  %v14034_v60 = vpack.i.bf16 %v8079_v52, %v8071_v18  ;;  %v10440_v37 = vpack.c.bf16 %v8079_v52, %v8071_v18 }
 0x7e2   : > { %v8060_v35 = vmax.f32 %v8028_v53, 0.0 }
 0x7e3   : > { %v8061_v14 = vmax.f32 %v8029_v4, 0.0  ;;  %11399 = vrot.lane.b32.xlu1 %v13996_v0, %s11597_s2  ;;  %v7860_v44 = vpop.f32.mrb[84].mxu0  ;;  %11414 = vrot.lane.b32.xlu0 %v14034_v60, %s11597_s2 }
 0x7e4   : > { %v7862_v11 = vpop.f32.mrb[85].mxu0  ;;  %10029 = vmatmul.mubr.msk.f32.vlgmr.msra.gmra.mrb[88].mxu0 %vm4750_vm15, %v13975_v6  ;;  %10036 = vmatmul.mubr.msk.f32.gmra.mrb[94].mxu1 %vm4750_vm15, %v14032_v46  ;;  %v11458_v63 = vpack.i.bf16 %v8060_v35, %v8052_v3  ;;  %v10430_v40 = vpack.c.bf16 %v8060_v35, %v8052_v3  ;;  %v8036_v47 = vadd.f32 %v13943_v43, %v7860_v44 }
 0x7e5   : > { %v14042_v62 = vpack.i.bf16 %v8061_v14, %v8053_v13  ;;  %10441 = vmatprep.subr.bf16.mxu1 %v10440_v37  ;;  %v10428_v41 = vpack.c.bf16 %v8061_v14, %v8053_v13  ;;  %8299 = vmatprep.mubr.f32.mxu0 %v14688_v29  ;;  %v8037_v18 = vadd.f32 %v13943_v43, %v7862_v11 }
 0x7e6   : > { %10443 = vmatpush1.bf16.msra.mxu1 %v10442_v34  ;;  %v8068_v13 = vmax.f32 %v8036_v47, 0.0  ;;  %8560 = vmatprep.mubr.f32.mxu1 %v14688_v29 }
 0x7e7   : > { %11404 = vrot.lane.b32.xlu1 %v13962_v51, %s11597_s2  ;;  %v7866_v52 = vpop.f32.mrb[86].mxu0  ;;  %10429 = vmatprep.subr.bf16.mxu0 %v10428_v41  ;;  %v8069_v34 = vmax.f32 %v8037_v18, 0.0 }
 0x7e8   : > { %v8044_v53 = vadd.f32 %v13947_v24, %v7866_v52  ;;  %v7868_v4 = vpop.f32.mrb[87].mxu0  ;;  %10030 = vmatmul.mubr.msk.f32.gmra.mrb[90].mxu0 %vm4750_vm15, %v13994_v16  ;;  %11419 = vrot.lane.b32.xlu0 %v14042_v62, %s11597_s2 }
 0x7e9   : > { %v8045_v3 = vadd.f32 %v13947_v24, %v7868_v4  ;;  %10431 = vmatpush1.bf16.msra.mxu0 %v10430_v40  ;;  %8305 = vmatprep.mubr.f32.mxu0 %v14688_v29 }
 0x7ea   : > { %v8076_v43 = vmax.f32 %v8044_v53, 0.0  ;;  %10041 = vmatmul.mubr.msk.f32.vlgmr.msra.gmra.mrb[96].mxu1 %vm4750_vm15, %v13975_v6 }
 0x7eb   : > { %v8077_v35 = vmax.f32 %v8045_v3, 0.0  ;;  %11409 = vrot.lane.b32.xlu1 %v11458_v63, %s11597_s2  ;;  %8566 = vmatprep.mubr.f32.mxu1 %v14688_v29 }
 0x7ec   : > { %v11483_v14 = vpack.i.bf16 %v8076_v43, %v8068_v13  ;;  %v10434_v44 = vpack.c.bf16 %v8076_v43, %v8068_v13  ;;  %10031 = vmatmul.mubr.msk.f32.gmra.mrb[92].mxu0 %vm4750_vm15, %v14014_v26  ;;  %11429 = vrot.lane.b32.xlu0 %v14022_v31, %s11597_s2 }
 0x7ed   : > { %v11513_v24 = vpack.i.bf16 %v8077_v35, %v8069_v34  ;;  %v10432_v37 = vpack.c.bf16 %v8077_v35, %v8069_v34  ;;  %8311 = vmatprep.mubr.f32.mxu0 %v14688_v29 }
 0x7ee   : > { %10042 = vmatmul.mubr.msk.f32.gmra.mrb[98].mxu1 %vm4750_vm15, %v13994_v16 }
 0x7ef   : > { %11424 = vrot.lane.b32.xlu1 %v13988_v32, %s11597_s2  ;;  %10433 = vmatprep.subr.bf16.mxu0 %v10432_v37 }
 0x7f0   : > { %10435 = vmatpush1.bf16.msra.mxu0 %v10434_v44  ;;  %11439 = vrot.lane.b32.xlu0 %v11483_v14, %s11597_s2 }
 0x7f1   : > { %10032 = vmatmul.mubr.msk.f32.gmra.mrb[94].mxu0 %vm4750_vm15, %v14032_v46  ;;  %8572 = vmatprep.mubr.f32.mxu1 %v14688_v29 }
 0x7f2   : > { %8471 = vmatprep.mubr.f32.mxu0 %v14688_v29  ;;  %10043 = vmatmul.mubr.msk.f32.gmra.mrb[100].mxu1 %vm4750_vm15, %v14014_v26 }
 0x7f3   : > { %11434 = vrot.lane.b32.xlu1 %v13969_v55, %s11598_s18  ;;  %8578 = vmatprep.mubr.f32.mxu1 %v14688_v29  ;;  %v9487_v55 = vld [vmem:[%s14646_s16 + $0x8] sm:$0xff] }
 0x7f4   : > { %11444 = vrot.lane.b32.xlu0 %v13941_v17, %s11598_s18  ;;  %v9489_v17 = vld [vmem:[%s14646_s16 + $0x18] sm:$0xff] }
 0x7f5   : > { %10037 = vmatmul.mubr.msk.f32.vlgmr.msra.gmra.mrb[96].mxu0 %vm4750_vm15, %v13975_v6 }
 0x7f6   : > { %8477 = vmatprep.mubr.f32.mxu0 %v14688_v29  ;;  %10044 = vmatmul.mubr.msk.f32.gmra.mrb[102].mxu1 %vm4750_vm15, %v14032_v46 }
 0x7f7   : > { %11449 = vrot.lane.b32.xlu1 %v11513_v24, %s11597_s2  ;;  %8750 = vmatprep.mubr.f32.mxu1 %v14688_v29 }
 0x7f8   : > { %11459 = vrot.lane.b32.xlu0 %v11458_v63, %s11598_s18 }
 0x7f9   : > { %10038 = vmatmul.mubr.msk.f32.gmra.mrb[98].mxu0 %vm4750_vm15, %v13994_v16 }
 0x7fa   : > { %8483 = vmatprep.mubr.f32.mxu0 %v14688_v29 }
 0x7fb   : > { %11454 = vrot.lane.b32.xlu1 %v13945_v23, %s11598_s18  ;;  %v9488_v23 = vld [vmem:[%s14646_s16 + $0x10] sm:$0xff] }
 0x7fc   : > { %11469 = vrot.lane.b32.xlu0 %v14007_v54, %s11598_s18 }
 0x7fd   : > { %10039 = vmatmul.mubr.msk.f32.gmra.mrb[100].mxu0 %vm4750_vm15, %v14014_v26 }
 0x7fe   : > { %8489 = vmatprep.mubr.f32.mxu0 %v14688_v29 }
 0x7ff   : > { %11464 = vrot.lane.b32.xlu1 %v13966_v33, %s11598_s18  ;;  %v9486_v33 = vld [vmem:[%s14646_s16] sm:$0xff] }
 0x800   : > { %11479 = vrot.lane.b32.xlu0 %v13962_v51, %s11598_s18 }
 0x801   : > { %10040 = vmatmul.mubr.msk.f32.gmra.mrb[102].mxu0 %vm4750_vm15, %v14032_v46 }
 0x802   : > { %8661 = vmatprep.mubr.f32.mxu0 %v14688_v29 }
 0x803   : > { %11474 = vrot.lane.b32.xlu1 %v13959_v2, %s11598_s18 }
 0x804   : > { %11489 = vrot.lane.b32.xlu0 %v14002_v21, %s11598_s18 }
 0x807   : > { %11484 = vrot.lane.b32.xlu1 %v11483_v14, %s11598_s18 }
 0x808   : > { %11499 = vrot.lane.b32.xlu0 %v13988_v32, %s11598_s18 }
 0x80b   : > { %11494 = vrot.lane.b32.xlu1 %v14042_v62, %s11598_s18 }
 0x80c   : > { %11514 = vrot.lane.b32.xlu0 %v11513_v24, %s11598_s18 }
 0x80f   : > { %11504 = vrot.lane.b32.xlu1 %v13996_v0, %s11598_s18 }
 0x810   : > { %11519 = vrot.lane.b32.xlu0 %v14034_v60, %s11598_s18 }
 0x813   : > { %11509 = vrot.lane.b32.xlu1 %v14022_v31, %s11598_s18  ;;  %s9652_s18 = sshll.u32 %s14486_s3, 4  ;;  %s14580_s18 = int_to_ptr.vmem [resolvable:$true] %s9652_s18 }
 0x814   : > { %9497 = vperm.xlu0 %10881, %v9487_v55   ;;  %s11527_s23 = scalar_lea.vmem %s14580_s18, 4096  ;;  %p11534_p0 = scmp.lt.s32.totalorder %s14580_s18, %s11532_s22 }
 0x815   : > { %p11528_p11 = scmp.ne.s32.totalorder %s14580_s18, %s11527_s23  ;;  %p11535_p1 = scmp.lt.s32.totalorder %s11533_s29, %s11527_s23 }
 0x817   : > { %9492 = vperm.xlu1 %10882, %v9486_v33   ;;  %p11529_p12 = pnand %p11528_p11, %p11730_p5  ;;  %p11536_p2 = por %p11535_p1, %p11534_p0 }
 0x818   : > { %9507 = vperm.xlu0 %10881, %v9489_v17  }
 0x819   : > { %p11530_p13 = pneg %p11529_p12 }
 0x81b   : > { %9502 = vperm.xlu1 %10882, %v9488_v23   ;;  %p11537_p3 = pnand %p11536_p2, %p11530_p13 }
 0x83c   : > { %v11365_v2 = vpop.permute.xlu1 %11364 }
 0x83d   : > { %v11367_v51 = vunpack.i.h.bf16 %v11365_v2  ;;  %v11366_v6 = vunpack.i.l.bf16 %v11365_v2  ;;  %v14137_v32 = vpop.permute.xlu0 %11374 }
 0x83e   : > { %v11377_v16 = vunpack.i.h.bf16 %v14137_v32  ;;  %v11376_v0 = vunpack.i.l.bf16 %v14137_v32 }
 0x840   : > { %v8160_v21 = vsel %vm6632_vm0, %v11366_v6, %v11376_v0  ;;  %v8161_v54 = vsel %vm6632_vm0, %v11367_v51, %v11377_v16 }
 0x841   : > { %v10454_v26 = vpack.c.bf16 %v8161_v54, %v8160_v21 }
 0x843   : > { %10455 = vmatprep.subr.bf16.mxu1 %v10454_v26 }
 0x848   : > { %v11370_v31 = vpop.permute.xlu1 %11369 }
 0x849   : > { %v11372_v46 = vunpack.i.h.bf16 %v11370_v31  ;;  %v11371_v60 = vunpack.i.l.bf16 %v11370_v31  ;;  %v11380_v11 = vpop.permute.xlu0 %11379 }
 0x84a   : > { %v11382_v63 = vunpack.i.h.bf16 %v11380_v11  ;;  %v11381_v40 = vunpack.i.l.bf16 %v11380_v11 }
 0x84c   : > { %v8165_v62 = vsel %vm6632_vm0, %v11382_v63, %v11367_v51  ;;  %v8164_v47 = vsel %vm6632_vm0, %v11381_v40, %v11366_v6  ;;  %v8168_v41 = vsel %vm6632_vm0, %v11371_v60, %v11381_v40  ;;  %v8169_v18 = vsel %vm6632_vm0, %v11372_v46, %v11382_v63 }
 0x84d   : > { %v10456_v52 = vpack.c.bf16 %v8165_v62, %v8164_v47  ;;  %v11385_v53 = vpop.permute.xlu0 %11384  ;;  %v10444_v4 = vpack.c.bf16 %v8169_v18, %v8168_v41 }
 0x84e   : > { %v11387_v21 = vunpack.i.h.bf16 %v11385_v53  ;;  %v11386_v54 = vunpack.i.l.bf16 %v11385_v53 }
 0x84f   : > { %10445 = vmatprep.subr.bf16.mxu0 %v10444_v4  ;;  %10457 = vmatpush1.bf16.msra.mxu1 %v10456_v52 }
 0x851   : > { %v11390_v3 = vpop.permute.xlu0 %11389  ;;  %v11395_v13 = vpop.permute.xlu1 %11394 }
 0x852   : > { %v11392_v43 = vunpack.i.h.bf16 %v11390_v3  ;;  %v11391_v34 = vunpack.i.l.bf16 %v11390_v3  ;;  %v11397_v35 = vunpack.i.h.bf16 %v11395_v13  ;;  %v11396_v14 = vunpack.i.l.bf16 %v11395_v13 }
 0x854   : > { %v8170_v55 = vsel %vm6632_vm0, %v11391_v34, %v11396_v14  ;;  %v8171_v33 = vsel %vm6632_vm0, %v11392_v43, %v11397_v35 }
 0x855   : > { %v14157_v44 = vpop.permute.xlu1 %11399  ;;  %v14165_v17 = vpop.permute.xlu0 %11414  ;;  %v10449_v11 = vpack.c.bf16 %v8171_v33, %v8170_v55  ;;  %v14200_v55 = vld [vmem:[%s14645_s15] sm:$0xff] }
 0x856   : > { %v11402_v24 = vunpack.i.h.bf16 %v14157_v44  ;;  %v11401_v37 = vunpack.i.l.bf16 %v14157_v44  ;;  %v11417_v23 = vunpack.i.h.bf16 %v14165_v17  ;;  %v11416_v2 = vunpack.i.l.bf16 %v14165_v17 }
 0x858   : > { %v8173_v51 = vsel %vm6632_vm0, %v11402_v24, %v11372_v46  ;;  %v8172_v6 = vsel %vm6632_vm0, %v11401_v37, %v11371_v60  ;;  %v8174_v63 = vsel %vm6632_vm0, %v11416_v2, %v11391_v34  ;;  %v8175_v40 = vsel %vm6632_vm0, %v11417_v23, %v11392_v43 }
 0x859   : > { %v10446_v26 = vpack.c.bf16 %v8173_v51, %v8172_v6  ;;  %v14173_v31 = vpop.permute.xlu1 %11404  ;;  %v8167_v46 = vsel %vm6632_vm0, %v11397_v35, %v11387_v21  ;;  %v8166_v60 = vsel %vm6632_vm0, %v11396_v14, %v11386_v54  ;;  %v10451_v53 = vpack.c.bf16 %v8175_v40, %v8174_v63 }
 0x85a   : > { %v11407_v62 = vunpack.i.h.bf16 %v14173_v31  ;;  %v11406_v47 = vunpack.i.l.bf16 %v14173_v31  ;;  %v11420_v41 = vpop.permute.xlu0 %11419  ;;  %v10460_v13 = vpack.c.bf16 %v8167_v46, %v8166_v60 }
 0x85b   : > { %10448 = vmatpush1.bf16.msk.msra.mxu0 %vm13654_vm2, %v10446_v26  ;;  %v11422_v35 = vunpack.i.h.bf16 %v11420_v41  ;;  %v11421_v14 = vunpack.i.l.bf16 %v11420_v41 }
 0x85c   : > { %10450 = vmatprep.subr.bf16.mxu0 %v10449_v11  ;;  %v8162_v18 = vsel %vm6632_vm0, %v11386_v54, %v11406_v47  ;;  %v8163_v52 = vsel %vm6632_vm0, %v11387_v21, %v11407_v62 }
 0x85d   : > { %v11410_v4 = vpop.permute.xlu1 %11409  ;;  %v10458_v3 = vpack.c.bf16 %v8163_v52, %v8162_v18 }
 0x85e   : > { %v11412_v43 = vunpack.i.h.bf16 %v11410_v4  ;;  %v11411_v34 = vunpack.i.l.bf16 %v11410_v4  ;;  %v11430_v44 = vpop.permute.xlu0 %11429 }
 0x85f   : > { %10453 = vmatpush1.bf16.msk.msra.mxu0 %vm13654_vm2, %v10451_v53  ;;  %10459 = vmatprep.subr.bf16.mxu1 %v10458_v3  ;;  %v11432_v59 = vunpack.i.h.bf16 %v11430_v44  ;;  %v11431_v26 = vunpack.i.l.bf16 %v11430_v44 }
 0x860   : > { %v8157_v33 = vsel %vm6632_vm0, %v11377_v16, %v11412_v43  ;;  %v8156_v17 = vsel %vm6632_vm0, %v11376_v0, %v11411_v34  ;;  %10461 = vmatpush1.bf16.msra.mxu1 %v10460_v13  ;;  %v8152_v21 = vsel %vm6632_vm0, %v11411_v34, %v11421_v14  ;;  %v8153_v54 = vsel %vm6632_vm0, %v11412_v43, %v11422_v35  ;;  %v14222_v0 = vld [vmem:[%s14645_s15 + $0x8] sm:$0xff] }
 0x861   : > { %v10464_v51 = vpack.c.bf16 %v8157_v33, %v8156_v17  ;;  %v11425_v6 = vpop.permute.xlu1 %11424  ;;  %v10462_v32 = vpack.c.bf16 %v8153_v54, %v8152_v21  ;;  %v8146_v53 = vsel %vm6632_vm0, %v11431_v26, %v11416_v2  ;;  %v8147_v4 = vsel %vm6632_vm0, %v11432_v59, %v11417_v23  ;;  %v14269_v54 = vld [vmem:[%s14645_s15 + $0x18] sm:$0xff] }
 0x862   : > { %v11427_v11 = vunpack.i.h.bf16 %v11425_v6  ;;  %v11426_v63 = vunpack.i.l.bf16 %v11425_v6  ;;  %10049 = vmatmul.mubr.msk.f32.vlgmr.msra.gmra.mrb[88].mxu0 %vm4750_vm15, %v14200_v55  ;;  %v11440_v16 = vpop.permute.xlu0 %11439 }
 0x863   : > { %10053 = vmatmul.mubr.msk.f32.vlgmr.msra.gmra.mrb[88].mxu1 %vm4750_vm15, %v14200_v55  ;;  %8667 = vmatprep.mubr.f32.mxu0 %v14688_v29  ;;  %v11442_v3 = vunpack.i.h.bf16 %v11440_v16  ;;  %v11441_v13 = vunpack.i.l.bf16 %v11440_v16 }
 0x864   : > { %v8148_v40 = vsel %vm6632_vm0, %v11421_v14, %v11426_v63  ;;  %v8149_v46 = vsel %vm6632_vm0, %v11422_v35, %v11427_v11  ;;  %10463 = vmatprep.subr.bf16.mxu0 %v10462_v32  ;;  %8756 = vmatprep.mubr.f32.mxu1 %v14688_v29  ;;  %v8144_v41 = vsel %vm6632_vm0, %v11426_v63, %v11401_v37 }
 0x865   : > { %10465 = vmatpush1.bf16.msra.mxu0 %v10464_v51  ;;  %v14229_v60 = vpop.permute.xlu1 %11434  ;;  %v8145_v18 = vsel %vm6632_vm0, %v11427_v11, %v11402_v24  ;;  %v10472_v52 = vpack.c.bf16 %v8149_v46, %v8148_v40  ;;  %v14247_v24 = vld [vmem:[%s14645_s15 + $0x10] sm:$0xff]  ;;  %v10474_v14 = vpack.c.bf16 %v8147_v4, %v8146_v53  ;;  %v8159_v51 = vsel %vm6632_vm0, %v11407_v62, %v11442_v3 }
 0x866   : > { %10050 = vmatmul.mubr.msk.f32.gmra.mrb[90].mxu0 %vm4750_vm15, %v14222_v0  ;;  %v11445_v43 = vpop.permute.xlu0 %11444  ;;  %v10470_v37 = vpack.c.bf16 %v8145_v18, %v8144_v41  ;;  %v11436_v34 = vunpack.i.l.bf16 %v14229_v60  ;;  %v11437_v23 = vunpack.i.h.bf16 %v14229_v60  ;;  %v8158_v6 = vsel %vm6632_vm0, %v11406_v47, %v11441_v13 }
 0x867   : > { %10054 = vmatmul.mubr.msk.f32.gmra.mrb[90].mxu1 %vm4750_vm15, %v14222_v0  ;;  %8673 = vmatprep.mubr.f32.mxu0 %v14688_v29  ;;  %v11446_v2 = vunpack.i.l.bf16 %v11445_v43  ;;  %v11447_v35 = vunpack.i.h.bf16 %v11445_v43  ;;  %v10468_v60 = vpack.c.bf16 %v8159_v51, %v8158_v6 }
 0x868   : > { %8762 = vmatprep.mubr.f32.mxu1 %v14688_v29  ;;  %10471 = vmatprep.subr.bf16.mxu1 %v10470_v37 }
 0x869   : > { %v11450_v44 = vpop.permute.xlu1 %11449  ;;  %10473 = vmatpush1.bf16.msra.mxu1 %v10472_v52  ;;  %v9037_v62 = vsel %vm7514_vm3, %v11436_v34, %v11446_v2 }
 0x86a   : > { %v11452_v33 = vunpack.i.h.bf16 %v11450_v44  ;;  %v11451_v17 = vunpack.i.l.bf16 %v11450_v44  ;;  %10051 = vmatmul.mubr.msk.f32.gmra.mrb[92].mxu0 %vm4750_vm15, %v14247_v24  ;;  %10475 = vmatprep.subr.bf16.mxu1 %v10474_v14  ;;  %v14262_v21 = vpop.permute.xlu0 %11459 }
 0x86b   : > { %10055 = vmatmul.mubr.msk.f32.gmra.mrb[92].mxu1 %vm4750_vm15, %v14247_v24  ;;  %8679 = vmatprep.mubr.f32.mxu0 %v14688_v29  ;;  %v11462_v41 = vunpack.i.h.bf16 %v14262_v21  ;;  %v11461_v18 = vunpack.i.l.bf16 %v14262_v21 }
 0x86c   : > { %v8151_v11 = vsel %vm6632_vm0, %v11452_v33, %v11432_v59  ;;  %v8150_v31 = vsel %vm6632_vm0, %v11451_v17, %v11431_v26  ;;  %8768 = vmatprep.mubr.f32.mxu1 %v14688_v29  ;;  %v8154_v32 = vsel %vm6632_vm0, %v11441_v13, %v11451_v17  ;;  %v8155_v16 = vsel %vm6632_vm0, %v11442_v3, %v11452_v33 }
 0x86d   : > { %v10476_v47 = vpack.c.bf16 %v8151_v11, %v8150_v31  ;;  %v11455_v63 = vpop.permute.xlu1 %11454  ;;  %v9038_v59 = vsel %vm7514_vm3, %v11437_v23, %v11447_v35  ;;  %v10466_v46 = vpack.c.bf16 %v8155_v16, %v8154_v32 }
 0x86e   : > { %v11457_v40 = vunpack.i.h.bf16 %v11455_v63  ;;  %v11456_v26 = vunpack.i.l.bf16 %v11455_v63  ;;  %10052 = vmatmul.mubr.msk.f32.gmra.mrb[94].mxu0 %vm4750_vm15, %v14269_v54  ;;  %v11470_v52 = vpop.permute.xlu0 %11469  ;;  %v10478_v3 = vpack.c.bf16 %v9038_v59, %v9037_v62 }
 0x86f   : > { %10056 = vmatmul.mubr.msk.f32.gmra.mrb[94].mxu1 %vm4750_vm15, %v14269_v54  ;;  %8839 = vmatprep.mubr.f32.mxu0 %v14688_v29 }
 0x870   : > { %v9034_v53 = vsel %vm7514_vm3, %v11447_v35, %v11457_v40  ;;  %v9033_v4 = vsel %vm7514_vm3, %v11446_v2, %v11456_v26  ;;  %10467 = vmatprep.subr.bf16.mxu0 %v10466_v46  ;;  %10477 = vmatpush1.bf16.msra.mxu1 %v10476_v47  ;;  %v9029_v37 = vsel %vm7514_vm3, %v11456_v26, %v11461_v18  ;;  %v11472_v47 = vunpack.i.h.bf16 %v11470_v52 }
 0x871   : > { %v10488_v13 = vpack.c.bf16 %v9034_v53, %v9033_v4  ;;  %10469 = vmatpush1.bf16.msra.mxu0 %v10468_v60  ;;  %v14296_v43 = vpop.permute.xlu1 %11464  ;;  %8928 = vmatprep.mubr.f32.mxu1 %v14688_v29  ;;  %v9030_v35 = vsel %vm7514_vm3, %v11457_v40, %v11462_v41 }
 0x872   : > { %v11467_v2 = vunpack.i.h.bf16 %v14296_v43  ;;  %v11466_v14 = vunpack.i.l.bf16 %v14296_v43  ;;  %10479 = vmatprep.subr.bf16.mxu0 %v10478_v3  ;;  %v10486_v44 = vpack.c.bf16 %v9030_v35, %v9029_v37  ;;  %v11480_v33 = vpop.permute.xlu0 %11479 }
 0x873   : > { %10061 = vmatmul.mubr.msk.f32.vlgmr.msra.gmra.mrb[96].mxu1 %vm4750_vm15, %v14200_v55  ;;  %v11482_v32 = vunpack.i.h.bf16 %v11480_v33  ;;  %v11481_v16 = vunpack.i.l.bf16 %v11480_v33 }
 0x874   : > { %v9042_v17 = vsel %vm7514_vm3, %v11467_v2, %v11437_v23  ;;  %v9041_v51 = vsel %vm7514_vm3, %v11466_v14, %v11436_v34  ;;  %10057 = vmatmul.mubr.msk.f32.vlgmr.msra.gmra.mrb[96].mxu0 %vm4750_vm15, %v14200_v55  ;;  %10487 = vmatprep.subr.bf16.mxu1 %v10486_v44  ;;  %v11471_v23 = vunpack.i.l.bf16 %v11470_v52 }
 0x875   : > { %v10480_v6 = vpack.c.bf16 %v9042_v17, %v9041_v51  ;;  %10489 = vmatpush1.bf16.msra.mxu1 %v10488_v13  ;;  %v11475_v11 = vpop.permute.xlu1 %11474  ;;  %8845 = vmatprep.mubr.f32.mxu0 %v14688_v29 }
 0x876   : > { %v11477_v31 = vunpack.i.h.bf16 %v11475_v11  ;;  %v11476_v62 = vunpack.i.l.bf16 %v11475_v11  ;;  %8934 = vmatprep.mubr.f32.mxu1 %v14688_v29  ;;  %v14323_v63 = vpop.permute.xlu0 %11489 }
 0x877   : > { %10062 = vmatmul.mubr.msk.f32.gmra.mrb[98].mxu1 %vm4750_vm15, %v14222_v0  ;;  %10481 = vmatpush1.bf16.msra.mxu0 %v10480_v6  ;;  %v11492_v55 = vunpack.i.h.bf16 %v14323_v63  ;;  %v11491_v34 = vunpack.i.l.bf16 %v14323_v63 }
 0x878   : > { %10058 = vmatmul.mubr.msk.f32.gmra.mrb[98].mxu0 %vm4750_vm15, %v14222_v0  ;;  %8940 = vmatprep.mubr.f32.mxu1 %v14688_v29  ;;  %v9039_v40 = vsel %vm7514_vm3, %v11471_v23, %v11476_v62  ;;  %v9040_v26 = vsel %vm7514_vm3, %v11472_v47, %v11477_v31  ;;  %v9036_v4 = vsel %vm7514_vm3, %v11477_v31, %v11482_v32 }
 0x879   : > { %v14332_v59 = vpop.permute.xlu1 %11484  ;;  %8851 = vmatprep.mubr.f32.mxu0 %v14688_v29  ;;  %v9043_v46 = vsel %vm7514_vm3, %v11491_v34, %v11471_v23  ;;  %v9044_v0 = vsel %vm7514_vm3, %v11492_v55, %v11472_v47  ;;  %v9035_v3 = vsel %vm7514_vm3, %v11476_v62, %v11481_v16  ;;  %v10482_v37 = vpack.c.bf16 %v9040_v26, %v9039_v40 }
 0x87a   : > { %v11487_v60 = vunpack.i.h.bf16 %v14332_v59  ;;  %v11486_v52 = vunpack.i.l.bf16 %v14332_v59  ;;  %v10484_v53 = vpack.c.bf16 %v9044_v0, %v9043_v46  ;;  %v11500_v13 = vpop.permute.xlu0 %11499  ;;  %v10492_v51 = vpack.c.bf16 %v9036_v4, %v9035_v3 }
 0x87b   : > { %10063 = vmatmul.mubr.msk.f32.gmra.mrb[100].mxu1 %vm4750_vm15, %v14247_v24  ;;  %10483 = vmatprep.subr.bf16.mxu0 %v10482_v37  ;;  %v11501_v31 = vunpack.i.l.bf16 %v11500_v13 }
 0x87c   : > { %10059 = vmatmul.mubr.msk.f32.gmra.mrb[100].mxu0 %vm4750_vm15, %v14247_v24  ;;  %8946 = vmatprep.mubr.f32.mxu1 %v14688_v29  ;;  %v9031_v35 = vsel %vm7514_vm3, %v11481_v16, %v11486_v52  ;;  %v9032_v44 = vsel %vm7514_vm3, %v11482_v32, %v11487_v60  ;;  %v11502_v24 = vunpack.i.h.bf16 %v11500_v13  ;;  %v14380_v32 = vld [vmem:[%s14645_s15 + $0x40] sm:$0xff] }
 0x87d   : > { %v11495_v33 = vpop.permute.xlu1 %11494  ;;  %8857 = vmatprep.mubr.f32.mxu0 %v14688_v29  ;;  %v10490_v17 = vpack.c.bf16 %v9032_v44, %v9031_v35  ;;  %10485 = vmatpush1.bf16.msra.mxu0 %v10484_v53  ;;  %v10066_v35 = vld [vmem:[%s14645_s15 + $0x48] sm:$0xff] }
 0x87e   : > { %v11497_v6 = vunpack.i.h.bf16 %v11495_v33  ;;  %v11496_v11 = vunpack.i.l.bf16 %v11495_v33  ;;  %v11515_v62 = vpop.permute.xlu0 %11514 }
 0x87f   : > { %10064 = vmatmul.mubr.msk.f32.gmra.mrb[102].mxu1 %vm4750_vm15, %v14269_v54  ;;  %10491 = vmatprep.subr.bf16.mxu1 %v10490_v17  ;;  %v11517_v26 = vunpack.i.h.bf16 %v11515_v62  ;;  %v11516_v46 = vunpack.i.l.bf16 %v11515_v62 }
 0x880   : > { %v9026_v47 = vsel %vm7514_vm3, %v11462_v41, %v11497_v6  ;;  %v9025_v23 = vsel %vm7514_vm3, %v11461_v18, %v11496_v11  ;;  %10060 = vmatmul.mubr.msk.f32.gmra.mrb[102].mxu0 %vm4750_vm15, %v14269_v54  ;;  %10493 = vmatpush1.bf16.msra.mxu1 %v10492_v51  ;;  %v9021_v21 = vsel %vm7514_vm3, %v11496_v11, %v11501_v31 }
 0x881   : > { %v11505_v16 = vpop.permute.xlu1 %11504  ;;  %9162 = vmatprep.mubr.f32.mxu0 %v14688_v29  ;;  %9251 = vmatprep.mubr.f32.mxu1 %v14688_v29  ;;  %v9022_v41 = vsel %vm7514_vm3, %v11497_v6, %v11502_v24  ;;  %v10496_v18 = vpack.c.bf16 %v9026_v47, %v9025_v23 }
 0x882   : > { %v11507_v40 = vunpack.i.h.bf16 %v11505_v16  ;;  %v11506_v54 = vunpack.i.l.bf16 %v11505_v16  ;;  %v11520_v0 = vpop.permute.xlu0 %11519  ;;  %v10494_v53 = vpack.c.bf16 %v9022_v41, %v9021_v21  ;;  %v10068_v16 = vld [vmem:[%s14645_s15 + $0x58] sm:$0xff] }
 0x883   : > { %10073 = vmatmul.mubr.msk.f32.vlgmr.msra.gmra.mrb[88].mxu1 %vm4750_vm15, %v14380_v32  ;;  %v11522_v4 = vunpack.i.h.bf16 %v11520_v0  ;;  %v11521_v3 = vunpack.i.l.bf16 %v11520_v0 }
 0x884   : > { %v9018_v13 = vsel %vm7514_vm3, %v11502_v24, %v11507_v40  ;;  %v9017_v37 = vsel %vm7514_vm3, %v11501_v31, %v11506_v54  ;;  %10069 = vmatmul.mubr.msk.f32.vlgmr.msra.gmra.mrb[88].mxu0 %vm4750_vm15, %v14380_v32  ;;  %9257 = vmatprep.mubr.f32.mxu1 %v14688_v29  ;;  %v9045_v44 = vsel %vm7514_vm3, %v11506_v54, %v11466_v14 }
 0x885   : > { %v9046_v33 = vsel %vm7514_vm3, %v11507_v40, %v11467_v2  ;;  %v10505_v17 = vpack.c.bf16 %v9018_v13, %v9017_v37  ;;  %10495 = vmatprep.subr.bf16.mxu0 %v10494_v53  ;;  %v11510_v51 = vpop.permute.xlu1 %11509  ;;  %9168 = vmatprep.mubr.f32.mxu0 %v14688_v29  ;;  %v9048_v6 = vsel %vm7514_vm3, %v11522_v4, %v11492_v55 }
 0x886   : > { %v9047_v14 = vsel %vm7514_vm3, %v11521_v3, %v11491_v34  ;;  %v10502_v11 = vpack.c.bf16 %v9046_v33, %v9045_v44  ;;  %10497 = vmatpush1.bf16.msra.mxu0 %v10496_v18  ;;  %v11512_v43 = vunpack.i.h.bf16 %v11510_v51  ;;  %v9027_v2 = vsel %vm7514_vm3, %v11486_v52, %v11516_v46  ;;  %v10067_v34 = vld [vmem:[%s14645_s15 + $0x50] sm:$0xff] }
 0x887   : > { %v9028_v24 = vsel %vm7514_vm3, %v11487_v60, %v11517_v26  ;;  %v11511_v31 = vunpack.i.l.bf16 %v11510_v51  ;;  %10074 = vmatmul.mubr.msk.f32.gmra.mrb[90].mxu1 %vm4750_vm15, %v10066_v35  ;;  %v10507_v55 = vpack.c.bf16 %v9048_v6, %v9047_v14 }
 0x888   : > { %v9020_v63 = vsel %vm7514_vm3, %v11512_v43, %v11522_v4  ;;  %10070 = vmatmul.mubr.msk.f32.gmra.mrb[90].mxu0 %vm4750_vm15, %v10066_v35  ;;  %10504 = vmatprep.subr.msk.bf16.mxu1 %vm13815_vm5, %v10502_v11  ;;  %v9024_v59 = vsel %vm7514_vm3, %v11517_v26, %v11512_v43  ;;  %v10500_v23 = vpack.c.bf16 %v9028_v24, %v9027_v2 }
 0x889   : > { %v9019_v60 = vsel %vm7514_vm3, %v11511_v31, %v11521_v3  ;;  %10506 = vmatpush1.bf16.msra.mxu1 %v10505_v17  ;;  %9174 = vmatprep.mubr.f32.mxu0 %v14688_v29  ;;  %v9023_v52 = vsel %vm7514_vm3, %v11516_v46, %v11511_v31 }
 0x88a   : > { %v10510_v62 = vpack.c.bf16 %v9020_v63, %v9019_v60  ;;  %10509 = vmatprep.subr.msk.bf16.mxu1 %vm13815_vm5, %v10507_v55  ;;  %9263 = vmatprep.mubr.f32.mxu1 %v14688_v29  ;;  %v10498_v47 = vpack.c.bf16 %v9024_v59, %v9023_v52 }
 0x88b   : > { %10075 = vmatmul.mubr.msk.f32.gmra.mrb[92].mxu1 %vm4750_vm15, %v10067_v34 }
 0x88c   : > { %10071 = vmatmul.mubr.msk.f32.gmra.mrb[92].mxu0 %vm4750_vm15, %v10067_v34  ;;  %10499 = vmatprep.subr.bf16.mxu0 %v10498_v47 }
 0x88d   : > { %10501 = vmatpush1.bf16.msra.mxu0 %v10500_v23  ;;  %10511 = vmatpush1.bf16.msra.mxu1 %v10510_v62 }
 0x88e   : > { %9180 = vmatprep.mubr.f32.mxu0 %v14688_v29  ;;  %9269 = vmatprep.mubr.f32.mxu1 %v14688_v29 }
 0x88f   : > { %10076 = vmatmul.mubr.msk.f32.gmra.mrb[94].mxu1 %vm4750_vm15, %v10068_v16 }
 0x890   : > { %10072 = vmatmul.mubr.msk.f32.gmra.mrb[94].mxu0 %vm4750_vm15, %v10068_v16  ;;  %9429 = vmatprep.mubr.f32.mxu1 %v14688_v29 }
 0x891   : > { %9340 = vmatprep.mubr.f32.mxu0 %v14688_v29 }
 0x893   : > { %10085 = vmatmul.mubr.msk.f32.vlgmr.msra.gmra.mrb[96].mxu1 %vm4750_vm15, %v14380_v32  ;;  %v14478_v46 = vpop.permute.xlu0 %9497 }
 0x894   : > { %10077 = vmatmul.mubr.msk.f32.vlgmr.msra.gmra.mrb[96].mxu0 %vm4750_vm15, %v14380_v32  ;;  %9435 = vmatprep.mubr.f32.mxu1 %v14688_v29 }
 0x895   : > { %9346 = vmatprep.mubr.f32.mxu0 %v14688_v29 }
 0x896   : > { %v14470_v15 = vpop.permute.xlu1 %9492 }
 0x897   : > { %10086 = vmatmul.mubr.msk.f32.gmra.mrb[98].mxu1 %vm4750_vm15, %v10066_v35 }
 0x898   : > { %10078 = vmatmul.mubr.msk.f32.gmra.mrb[98].mxu0 %vm4750_vm15, %v10066_v35  ;;  %9441 = vmatprep.mubr.f32.mxu1 %v14688_v29 }
 0x899   : > { %9352 = vmatprep.mubr.f32.mxu0 %v14688_v29 }
 0x89b   : > { %10087 = vmatmul.mubr.msk.f32.gmra.mrb[100].mxu1 %vm4750_vm15, %v10067_v34 }
 0x89c   : > { %10079 = vmatmul.mubr.msk.f32.gmra.mrb[100].mxu0 %vm4750_vm15, %v10067_v34  ;;  %9447 = vmatprep.mubr.f32.mxu1 %v14688_v29 }
 0x89d   : > { %9358 = vmatprep.mubr.f32.mxu0 %v14688_v29 }
 0x89f   : > { %10088 = vmatmul.mubr.msk.f32.gmra.mrb[102].mxu1 %vm4750_vm15, %v10068_v16 }
 0x8a0   : > { %10080 = vmatmul.mubr.msk.f32.gmra.mrb[102].mxu0 %vm4750_vm15, %v10068_v16 }
 0x956   : > { %v9253_v20 = vpop.f32.mrb[88].mxu1 }
 0x957   : > { %v9164_v32 = vpop.f32.mrb[88].mxu0  ;;  %v9512_v21 = vadd.f32 %v14470_v15, %v9253_v20  ;;  %v9255_v41 = vpop.f32.mrb[89].mxu1 }
 0x958   : > { %v9510_v18 = vadd.f32 %v14470_v15, %v9164_v32  ;;  %v9166_v40 = vpop.f32.mrb[89].mxu0  ;;  %v9513_v54 = vadd.f32 %v14470_v15, %v9255_v41  ;;  %v14505_v20 = vpop.permute.xlu0 %9507 }
 0x959   : > { %v9544_v29 = vmax.f32 %v9512_v21, 0.0  ;;  %v9511_v26 = vadd.f32 %v14470_v15, %v9166_v40 }
 0x95a   : > { %v9542_v0 = vmax.f32 %v9510_v18, 0.0  ;;  %v9545_v53 = vmax.f32 %v9513_v54, 0.0  ;;  %v9259_v4 = vpop.f32.mrb[90].mxu1 }
 0x95b   : > { %v9576_v3 = vadd.f32 %v9544_v29, %v13249_v9  ;;  %v9543_v13 = vmax.f32 %v9511_v26, 0.0  ;;  %v9170_v37 = vpop.f32.mrb[90].mxu0  ;;  %v9520_v35 = vadd.f32 %v14478_v46, %v9259_v4  ;;  %v9261_v44 = vpop.f32.mrb[91].mxu1 }
 0x95c   : > { %v9574_v33 = vadd.f32 %v9542_v0, %v13300_v58  ;;  %v9577_v17 = vadd.f32 %v9545_v53, %v13255_v48  ;;  %v9518_v51 = vadd.f32 %v14478_v46, %v9170_v37  ;;  %v9172_v6 = vpop.f32.mrb[91].mxu0  ;;  %v9521_v14 = vadd.f32 %v14478_v46, %v9261_v44  ;;  %v14491_v58 = vpop.permute.xlu1 %9502 }
 0x95d   : > { %9608 = vst [vmem:[%s14486_s3 + $0x10] sm:$0xff] %v9576_v3  ;;  %v9575_v9 = vadd.f32 %v9543_v13, %v13292_v12  ;;  %v9552_v11 = vmax.f32 %v9520_v35, 0.0  ;;  %v9519_v43 = vadd.f32 %v14478_v46, %v9172_v6 }
 0x95e   : > { %9606 = vst [vmem:[%s14486_s3] sm:$0xff] %v9574_v33  ;;  %9609 = vst [vmem:[%s14486_s3 + $0x18] sm:$0xff] %v9577_v17  ;;  %v9550_v48 = vmax.f32 %v9518_v51, 0.0  ;;  %v9553_v2 = vmax.f32 %v9521_v14, 0.0  ;;  %v9265_v24 = vpop.f32.mrb[92].mxu1 }
 0x95f   : > { %9607 = vst [vmem:[%s14486_s3 + $0x8] sm:$0xff] %v9575_v9  ;;  %v9584_v31 = vadd.f32 %v9552_v11, %v13251_v38  ;;  %v9551_v55 = vmax.f32 %v9519_v43, 0.0  ;;  %v9176_v63 = vpop.f32.mrb[92].mxu0  ;;  %v9528_v12 = vadd.f32 %v14491_v58, %v9265_v24  ;;  %v9267_v34 = vpop.f32.mrb[93].mxu1 }
 0x960   : > { %v9582_v59 = vadd.f32 %v9550_v48, %v13284_v61  ;;  %v9585_v60 = vadd.f32 %v9553_v2, %v13257_v36  ;;  %v9526_v52 = vadd.f32 %v14491_v58, %v9176_v63  ;;  %v9178_v62 = vpop.f32.mrb[93].mxu0  ;;  %v9529_v47 = vadd.f32 %v14491_v58, %v9267_v34 }
 0x961   : > { %9616 = vst [vmem:[%s14486_s3 + $0x50] sm:$0xff] %v9584_v31  ;;  %v9583_v23 = vadd.f32 %v9551_v55, %v13294_v45  ;;  %v9560_v38 = vmax.f32 %v9528_v12, 0.0  ;;  %v9527_v16 = vadd.f32 %v14491_v58, %v9178_v62 }
 0x962   : > { %9614 = vst [vmem:[%s14486_s3 + $0x40] sm:$0xff] %v9582_v59  ;;  %9617 = vst [vmem:[%s14486_s3 + $0x58] sm:$0xff] %v9585_v60  ;;  %v9558_v32 = vmax.f32 %v9526_v52, 0.0  ;;  %v9561_v61 = vmax.f32 %v9529_v47, 0.0  ;;  %v9271_v21 = vpop.f32.mrb[94].mxu1 }
 0x963   : > { %9615 = vst [vmem:[%s14486_s3 + $0x48] sm:$0xff] %v9583_v23  ;;  %v9592_v36 = vadd.f32 %v9560_v38, %v13302_v22  ;;  %v9559_v41 = vmax.f32 %v9527_v16, 0.0  ;;  %v9182_v18 = vpop.f32.mrb[94].mxu0  ;;  %v9536_v45 = vadd.f32 %v14505_v20, %v9271_v21  ;;  %v9273_v40 = vpop.f32.mrb[95].mxu1 }
 0x964   : > { %v9590_v54 = vadd.f32 %v9558_v32, %v13370_v7  ;;  %v9593_v29 = vadd.f32 %v9561_v61, %v13324_v27  ;;  %v9534_v26 = vadd.f32 %v14505_v20, %v9182_v18  ;;  %v9184_v0 = vpop.f32.mrb[95].mxu0  ;;  %v9537_v53 = vadd.f32 %v14505_v20, %v9273_v40 }
 0x965   : > { %9624 = vst [vmem:[%s14486_s3 + $0x90] sm:$0xff] %v9592_v36  ;;  %v9591_v4 = vadd.f32 %v9559_v41, %v13354_v1  ;;  %v9568_v3 = vmax.f32 %v9536_v45, 0.0  ;;  %v9535_v22 = vadd.f32 %v14505_v20, %v9184_v0  ;;  %v14703_v0 = vld [vmem:[#allocation13_spill] sm:$0xff] }
 0x966   : > { %9622 = vst [vmem:[%s14486_s3 + $0x80] sm:$0xff] %v9590_v54  ;;  %9625 = vst [vmem:[%s14486_s3 + $0x98] sm:$0xff] %v9593_v29  ;;  %v9566_v13 = vmax.f32 %v9534_v26, 0.0  ;;  %v9569_v37 = vmax.f32 %v9537_v53, 0.0  ;;  %v9431_v35 = vpop.f32.mrb[96].mxu1  ;;  %v14704_v53 = vld [vmem:[#allocation8_spill] sm:$0xff] }
 0x967   : > { %9623 = vst [vmem:[%s14486_s3 + $0x88] sm:$0xff] %v9591_v4  ;;  %v9600_v27 = vadd.f32 %v9568_v3, %v13318_v19  ;;  %v9567_v7 = vmax.f32 %v9535_v22, 0.0  ;;  %v9342_v44 = vpop.f32.mrb[96].mxu0  ;;  %v9516_v33 = vadd.f32 %v14470_v15, %v9431_v35  ;;  %v9433_v1 = vpop.f32.mrb[97].mxu1 }
 0x968   : > { %v9598_v17 = vadd.f32 %v9566_v13, %v13362_v25  ;;  %v9601_v51 = vadd.f32 %v9569_v37, %v13326_v50  ;;  %v9514_v6 = vadd.f32 %v14470_v15, %v9342_v44  ;;  %v9344_v14 = vpop.f32.mrb[97].mxu0  ;;  %v9517_v9 = vadd.f32 %v14470_v15, %v9433_v1  ;;  %v14705_v37 = vld [vmem:[#allocation11_spill] sm:$0xff] }
 0x969   : > { %9632 = vst [vmem:[%s14486_s3 + $0xd0] sm:$0xff] %v9600_v27  ;;  %v9599_v11 = vadd.f32 %v9567_v7, %v13364_v49  ;;  %v9548_v43 = vmax.f32 %v9516_v33, 0.0  ;;  %v9515_v19 = vadd.f32 %v14470_v15, %v9344_v14  ;;  %v14706_v33 = vld [vmem:[#allocation7_spill] sm:$0xff]  ;;  %v14708_v14 = vld [vmem:[#allocation9_spill] sm:$0xff] }
 0x96a   : > { %9630 = vst [vmem:[%s14486_s3 + $0xc0] sm:$0xff] %v9598_v17  ;;  %9633 = vst [vmem:[%s14486_s3 + $0xd8] sm:$0xff] %v9601_v51  ;;  %v9546_v48 = vmax.f32 %v9514_v6, 0.0  ;;  %v9549_v2 = vmax.f32 %v9517_v9, 0.0  ;;  %v9437_v24 = vpop.f32.mrb[98].mxu1  ;;  %v14707_v51 = vld [vmem:[#allocation10_spill] sm:$0xff] }
 0x96b   : > { %9631 = vst [vmem:[%s14486_s3 + $0xc8] sm:$0xff] %v9599_v11  ;;  %v9580_v50 = vadd.f32 %v9548_v43, %v13372_v42  ;;  %v9547_v25 = vmax.f32 %v9515_v19, 0.0  ;;  %v9348_v31 = vpop.f32.mrb[98].mxu0  ;;  %v9524_v55 = vadd.f32 %v14478_v46, %v9437_v24  ;;  %v9439_v49 = vpop.f32.mrb[99].mxu1 }
 0x96c   : > { %v9578_v63 = vadd.f32 %v9546_v48, %v13449_v30  ;;  %v9581_v15 = vadd.f32 %v9549_v2, %v13393_v10  ;;  %v9522_v12 = vadd.f32 %v14478_v46, %v9348_v31  ;;  %v9350_v34 = vpop.f32.mrb[99].mxu0  ;;  %v9525_v59 = vadd.f32 %v14478_v46, %v9439_v49 }
 0x96d   : > { %9612 = vst [vmem:[%s14486_s3 + $0x30] sm:$0xff] %v9580_v50  ;;  %v9579_v60 = vadd.f32 %v9547_v25, %v13441_v5  ;;  %v9556_v52 = vmax.f32 %v9524_v55, 0.0  ;;  %v9523_v42 = vadd.f32 %v14478_v46, %v9350_v34 }
 0x96e   : > { %9610 = vst [vmem:[%s14486_s3 + $0x20] sm:$0xff] %v9578_v63  ;;  %9613 = vst [vmem:[%s14486_s3 + $0x38] sm:$0xff] %v9581_v15  ;;  %v9554_v62 = vmax.f32 %v9522_v12, 0.0  ;;  %v9557_v47 = vmax.f32 %v9525_v59, 0.0  ;;  %v9443_v23 = vpop.f32.mrb[100].mxu1 }
 0x96f   : > { %9611 = vst [vmem:[%s14486_s3 + $0x28] sm:$0xff] %v9579_v60  ;;  %v9588_v10 = vadd.f32 %v9556_v52, %v13395_v8  ;;  %v9555_v30 = vmax.f32 %v9523_v42, 0.0  ;;  %v9354_v38 = vpop.f32.mrb[100].mxu0  ;;  %v9532_v16 = vadd.f32 %v14491_v58, %v9443_v23  ;;  %v9445_v5 = vpop.f32.mrb[101].mxu1 }
 0x970   : > { %v9586_v32 = vadd.f32 %v9554_v62, %v13431_v39  ;;  %v9589_v46 = vadd.f32 %v9557_v47, %v13399_v57  ;;  %v9530_v61 = vadd.f32 %v14491_v58, %v9354_v38  ;;  %v9356_v21 = vpop.f32.mrb[101].mxu0  ;;  %v9533_v36 = vadd.f32 %v14491_v58, %v9445_v5 }
 0x971   : > { %9620 = vst [vmem:[%s14486_s3 + $0x70] sm:$0xff] %v9588_v10  ;;  %v9587_v41 = vadd.f32 %v9555_v30, %v13443_v56  ;;  %v9564_v18 = vmax.f32 %v9532_v16, 0.0  ;;  %v9531_v8 = vadd.f32 %v14491_v58, %v9356_v21 }
 0x972   : > { %9618 = vst [vmem:[%s14486_s3 + $0x60] sm:$0xff] %v9586_v32  ;;  %9621 = vst [vmem:[%s14486_s3 + $0x78] sm:$0xff] %v9589_v46  ;;  %v9562_v45 = vmax.f32 %v9530_v61, 0.0  ;;  %v9565_v40 = vmax.f32 %v9533_v36, 0.0  ;;  %v9449_v54 = vpop.f32.mrb[102].mxu1 }
 0x973   : > { %9619 = vst [vmem:[%s14486_s3 + $0x68] sm:$0xff] %v9587_v41  ;;  %v9596_v57 = vadd.f32 %v9564_v18, %v13471_v28  ;;  %v9563_v39 = vmax.f32 %v9531_v8, 0.0  ;;  %v9360_v29 = vpop.f32.mrb[102].mxu0  ;;  %v9540_v56 = vadd.f32 %v14505_v20, %v9449_v54  ;;  %v9451_v26 = vpop.f32.mrb[103].mxu1 }
 0x974   : > { %v9594_v58 = vadd.f32 %v9562_v45, %v14703_v0  ;;  %v9597_v4 = vadd.f32 %v9565_v40, %v14704_v53  ;;  %v9538_v3 = vadd.f32 %v14505_v20, %v9360_v29  ;;  %v9362_v22 = vpop.f32.mrb[103].mxu0  ;;  %v9541_v13 = vadd.f32 %v14505_v20, %v9451_v26 }
 0x975   : > { %9628 = vst [vmem:[%s14486_s3 + $0xb0] sm:$0xff] %v9596_v57  ;;  %v9595_v28 = vadd.f32 %v9563_v39, %v14705_v37  ;;  %v9572_v35 = vmax.f32 %v9540_v56, 0.0  ;;  %v9539_v27 = vadd.f32 %v14505_v20, %v9362_v22  ;;  %v14709_v20 = vld [vmem:[#allocation12_spill] sm:$0xff] }
 0x976   : > { %9626 = vst [vmem:[%s14486_s3 + $0xa0] sm:$0xff] %v9594_v58  ;;  %9629 = vst [vmem:[%s14486_s3 + $0xb8] sm:$0xff] %v9597_v4  ;;  %v9570_v7 = vmax.f32 %v9538_v3, 0.0  ;;  %v9573_v44 = vmax.f32 %v9541_v13, 0.0 }
 0x977   : > { %9627 = vst [vmem:[%s14486_s3 + $0xa8] sm:$0xff] %v9595_v28  ;;  %v9604_v1 = vadd.f32 %v9572_v35, %v14706_v33  ;;  %v9571_v17 = vmax.f32 %v9539_v27, 0.0 }
 0x978   : > { %v9602_v6 = vadd.f32 %v9570_v7, %v14707_v51  ;;  %v9605_v9 = vadd.f32 %v9573_v44, %v14708_v14 }
 0x979   : > { %9636 = vst [vmem:[%s14486_s3 + $0xf0] sm:$0xff] %v9604_v1  ;;  %v9603_v11 = vadd.f32 %v9571_v17, %v14709_v20 }
 0x97a   : > { %9634 = vst [vmem:[%s14486_s3 + $0xe0] sm:$0xff] %v9602_v6  ;;  %9637 = vst [vmem:[%s14486_s3 + $0xf8] sm:$0xff] %v9605_v9 }
 0x97b   : > { %9635 = vst [vmem:[%s14486_s3 + $0xe8] sm:$0xff] %v9603_v11 }
 0x97c   : > { %11540 = shalt.err (!%p11537_p3)
}
 0x97d   : > { %s11541_s21 = scalar_lea.hbm %s14578_s28, 4096  ;;  %s11545_s2 = scalar_lea.hbm %s14647_s17, 8192 }
 0x97e   : > { %p11542_p4 = scmp.ne.s32.totalorder %s14578_s28, %s11541_s21  ;;  %p11546_p9 = scmp.lt.u32.totalorder %s14578_s28, %s14647_s17 }
 0x97f   : > { %p11547_p10 = scmp.lt.u32.totalorder %s11545_s2, %s11541_s21  ;;  %p11549_p12 = scmp.lt.u32.totalorder %s11541_s21, %s14578_s28 }
 0x980   : > { %p11543_p7 = pnand %p11542_p4, %p11730_p5 }
 0x981   : > { %p11548_p11 = por %p11547_p10, %p11546_p9 }
 0x982   : > { %p11544_p8 = pneg %p11543_p7 }
 0x983   : > { %p11550_p13 = por %p11549_p12, %p11548_p11 }
 0x985   : > { %p11551_p0 = pnand %p11550_p13, %p11544_p8 }
 0x987   : > { %11554 = shalt.err (!%p11551_p0)
}
 0x988   : > { %s11600_s23 = smov 1024   ;;  %s11601_s29 = smov 64  }
 0x989   : > { %10832 = dma.vmem_to_hbm [thread:$0]  (%p11730_p5), %s14580_s18, 4096, %s14578_s28, %s14589_s26, %s11600_s23, %s11600_s23, %s11601_s29  }
 0x98a PF: > { %p10838_p1 = scmp.ge.s32.totalorder %s11589_s27, 2  ;;  %s9667_s3 = sand.u32 1, %s11577_s24  }
 0x98b   : > { %s9668_s21 = scalar_lea.sflag [#allocation3], %s9667_s3 }
 0x98c   : > { %p10835_p2 = pnand %p10838_p1, %p11734_p6 }
 0x98e   : > { %11572 = dma.done.wait (!%p10835_p2), %s9668_s21, 4096  }
 0x98f   : > { %11574 = vsyncadd (!%p10835_p2), %s9668_s21, 4294963200  ;;  %s14710_s30 = sld [smem:[#allocation5_spill]]  ;;  %s14711_s26 = sld [smem:[#allocation6_spill]] }
 0x990   : > { %p27_p3 = scmp.ge.s32.totalorder %s11717_s0, 4   ;;  %s14712_s24 = smov %s11581_s25 }
 0x991   : > { %s14714_s27 = smov %s11717_s0 }
 0x992   :  { %29 = sbr.rel (!%p27_p3) target bundleno = 8 (0x8), region = 135 }
 0x995   : > { %s14713_s25 = smov %s14710_s30 }
 0x999   :  { %9673 = vsyncpa [#allocation3], 1 }
 0x99a   :  { %9675 = vsyncpa [#allocation3 + $0x1], 1 }

</bundles_post_ra>
